<compile_context>
chip_gen: v7x
topology: tpu7x:2x2x1
jax: 0.10.0
libtpu: 0.0.40
codegen_flags: <defaults>
</compile_context>

<pallas_src>
import functools

import numpy as np

import jax
import jax.numpy as jnp
from jax import lax
from jax.experimental import pallas as pl
from jax.experimental.pallas import tpu as pltpu

EPS = 1e-5          # nn.InstanceNorm2d default eps
LRELU_SLOPE = 0.2   # nn.LeakyReLU(0.2)
CIN_PAD = 8         # pad first-conv input channels to a full sublane tile

_TAPS = tuple((dy, dx) for dy in (-1, 0, 1) for dx in (-1, 0, 1))


# ----------------------------------------------------------------------------
# Fused kernel (one batch sample per grid step)
# ----------------------------------------------------------------------------
def _segbranch_kernel(x_ref, mask_in_ref, mask_mid_ref, w0_ref, w11_ref,
                      w12_ref, w21_ref, w22_ref, wout_ref, logit_ref, seg_ref,
                      *, H, W, n_classes):
    HW = H * W
    inv_hw = 1.0 / float(HW)

    def conv3x3_in(act, w_ref, mask_ref, act_kind):
        """3x3 conv (zero pad 1) + InstanceNorm2d(affine=False) + activation.

        act:      (Cin, HW) f32, channel-major / lane-dense.
        w_ref:    (9, Cout, Cin) per-tap weights.
        mask_ref: (9, Cin, HW) 0/1 border-validity masks (pre-broadcast).
        Nine MXU dots accumulated in f32 -- no im2col col buffer, all tiles
        stay in vregs.  Conv bias omitted (cancelled by the IN that follows).
        """
        acc = None
        for t, (dy, dx) in enumerate(_TAPS):
            s = dy * W + dx
            if s == 0:
                piece = act                      # center tap: fully valid
            else:
                # piece[:, p] == act[:, (p + s) % HW]; wrap positions are the
                # exact out-of-bounds positions and are zeroed by the mask.
                piece = pltpu.roll(act, shift=(-s) % HW, axis=1) * mask_ref[t]
            part = jnp.dot(w_ref[t], piece, preferred_element_type=jnp.float32)
            acc = part if acc is None else acc + part

        # InstanceNorm2d(affine=False): single-pass stats, var = E[x^2]-mean^2.
        mean = jnp.sum(acc, axis=1, keepdims=True) * inv_hw
        msq = jnp.sum(acc * acc, axis=1, keepdims=True) * inv_hw
        var = msq - mean * mean
        out = (acc - mean) * lax.rsqrt(var + EPS)
        if act_kind == "lrelu":
            out = jnp.where(out >= 0.0, out, LRELU_SLOPE * out)
        elif act_kind == "relu":
            out = jnp.maximum(out, 0.0)
        return out

    # self.conv
    a = conv3x3_in(x_ref[0].astype(jnp.float32), w0_ref, mask_in_ref, "lrelu")
    # self.resblk1
    h = conv3x3_in(a, w11_ref, mask_mid_ref, "relu")
    a = a + conv3x3_in(h, w12_ref, mask_mid_ref, None)
    # self.resblk2
    h = conv3x3_in(a, w21_ref, mask_mid_ref, "relu")
    a = a + conv3x3_in(h, w22_ref, mask_mid_ref, None)

    # self.conv_out: 1x1 conv, no bias -> logits (n_classes, HW), lane-dense.
    logits = jnp.dot(wout_ref[...], a, preferred_element_type=jnp.float32)

    # argmax over classes (first-index tie-break, torch semantics) + one-hot.
    # NOTE: if a logit were NaN the one-hot row would be all-zero; inputs here
    # are finite so this matches torch.argmax + scatter_.
    clsf = lax.broadcasted_iota(jnp.int32, (n_classes, HW), 0).astype(jnp.float32)
    mx = jnp.max(logits, axis=0, keepdims=True)
    lab = jnp.min(jnp.where(logits >= mx, clsf, float(n_classes)),
                  axis=0, keepdims=True)
    seg = (clsf == lab).astype(jnp.float32)

    logit_ref[0] = logits
    seg_ref[0] = seg


# ----------------------------------------------------------------------------
# Wrapper (layout glue only: free reshapes, constant border masks, BlockSpecs)
# ----------------------------------------------------------------------------
def _tap_masks(H, W, C):
    """(9, C, H*W) f32 validity masks for the 3x3 taps (zero padding)."""
    yy, xx = np.mgrid[0:H, 0:W]
    rows = []
    for dy in (-1, 0, 1):
        for dx in (-1, 0, 1):
            valid = ((yy + dy >= 0) & (yy + dy < H) &
                     (xx + dx >= 0) & (xx + dx < W)).reshape(H * W)
            rows.append(np.broadcast_to(valid.astype(np.float32), (C, H * W)))
    return jnp.asarray(np.stack(rows, axis=0))                # (9, C, HW)


def prepare_params(p, cin_pad=CIN_PAD):
    """PyTorch-layout weights -> kernel layout.

    3x3 conv (Cout, Cin, 3, 3) -> (9, Cout, Cin) tap-major (ky, kx), matching
    the kernel's tap loop.  First conv's Cin is zero-padded to `cin_pad`.
    1x1 conv (ncls, mid, 1, 1) -> (ncls, mid).  Conv biases are intentionally
    unused (a per-channel constant is a no-op before affine=False IN).
    """
    def per_tap(w, pad_to=None):
        co, ci = w.shape[0], w.shape[1]
        wt = jnp.transpose(w, (2, 3, 0, 1)).reshape(9, co, ci)
        if pad_to is not None and pad_to > ci:
            wt = jnp.pad(wt, ((0, 0), (0, 0), (0, pad_to - ci)))
        return wt

    return {
        "w0": per_tap(p["conv_w"], cin_pad),
        "w11": per_tap(p["r1_w1"]), "w12": per_tap(p["r1_w2"]),
        "w21": per_tap(p["r2_w1"]), "w22": per_tap(p["r2_w2"]),
        "wout": p["out_w"][:, :, 0, 0],
    }


def seg_branch_forward(x_nchw, kp):
    N, Cin, H, W = x_nchw.shape
    HW = H * W
    mid = kp["w11"].shape[1]
    cin_pad = kp["w0"].shape[2]
    ncls = kp["wout"].shape[0]

    x = x_nchw.reshape(N, Cin, HW).astype(jnp.float32)         # free reshape
    if cin_pad > Cin:
        x = jnp.pad(x, ((0, 0), (0, cin_pad - Cin), (0, 0)))   # tiny (16 KB)
    masks_in = _tap_masks(H, W, cin_pad)                       # trace-time consts
    masks_mid = _tap_masks(H, W, mid)

    kernel = functools.partial(_segbranch_kernel, H=H, W=W, n_classes=ncls)
    logit, seg = pl.pallas_call(
        kernel,
        out_shape=(jax.ShapeDtypeStruct((N, ncls, HW), jnp.float32),
                   jax.ShapeDtypeStruct((N, ncls, HW), jnp.float32)),
        grid=(N,),
        in_specs=[
            pl.BlockSpec((1, cin_pad, HW), lambda n: (n, 0, 0)),   # x sample
            pl.BlockSpec((9, cin_pad, HW), lambda n: (0, 0, 0)),   # masks (in)
            pl.BlockSpec((9, mid, HW), lambda n: (0, 0, 0)),       # masks (mid)
            pl.BlockSpec((9, mid, cin_pad), lambda n: (0, 0, 0)),  # conv
            pl.BlockSpec((9, mid, mid), lambda n: (0, 0, 0)),      # resblk1 c1
            pl.BlockSpec((9, mid, mid), lambda n: (0, 0, 0)),      # resblk1 c2
            pl.BlockSpec((9, mid, mid), lambda n: (0, 0, 0)),      # resblk2 c1
            pl.BlockSpec((9, mid, mid), lambda n: (0, 0, 0)),      # resblk2 c2
            pl.BlockSpec((ncls, mid), lambda n: (0, 0)),           # conv_out
        ],
        out_specs=(pl.BlockSpec((1, ncls, HW), lambda n: (n, 0, 0)),
                   pl.BlockSpec((1, ncls, HW), lambda n: (n, 0, 0))),
        compiler_params=pltpu.CompilerParams(
            dimension_semantics=("parallel",)),
    )(x, masks_in, masks_mid, kp["w0"], kp["w11"], kp["w12"], kp["w21"],
      kp["w22"], kp["wout"])

    # (N, ncls, H*W) -> NCHW is a free, row-major-compatible reshape.
    return logit.reshape(N, ncls, H, W), seg.reshape(N, ncls, H, W)


# ----------------------------------------------------------------------------
# Parameter init (PyTorch OIHW layout) and a pure-JAX/XLA reference forward
# ----------------------------------------------------------------------------
def init_params(key, in_chan, mid_chan, n_classes):
    ks = jax.random.split(key, 6)

    def w3(k, cout, cin):
        scale = 1.0 / np.sqrt(9.0 * cin)
        return scale * jax.random.normal(k, (cout, cin, 3, 3), jnp.float32)

    return {
        "conv_w": w3(ks[0], mid_chan, in_chan),
        "r1_w1": w3(ks[1], mid_chan, mid_chan),
        "r1_w2": w3(ks[2], mid_chan, mid_chan),
        "r2_w1": w3(ks[3], mid_chan, mid_chan),
        "r2_w2": w3(ks[4], mid_chan, mid_chan),
        "out_w": (1.0 / np.sqrt(float(mid_chan))) *
                 jax.random.normal(ks[5], (n_classes, mid_chan, 1, 1),
                                   jnp.float32),
    }


def ref_forward(x, p, n_classes):
    """Pure XLA reference of the same SegBranch forward (NCHW)."""
    def conv3(x, w):
        return lax.conv_general_dilated(
            x, w, window_strides=(1, 1), padding=((1, 1), (1, 1)),
            dimension_numbers=("NCHW", "OIHW", "NCHW"),
            precision=lax.Precision.HIGHEST)

    def block(x, w, act):
        y = conv3(x, w)
        m = jnp.mean(y, axis=(2, 3), keepdims=True)
        v = jnp.var(y, axis=(2, 3), keepdims=True)
        y = (y - m) * lax.rsqrt(v + EPS)
        if act == "lrelu":
            y = jnp.where(y >= 0.0, y, LRELU_SLOPE * y)
        elif act == "relu":
            y = jnp.maximum(y, 0.0)
        return y

    a = block(x, p["conv_w"], "lrelu")
    h = block(a, p["r1_w1"], "relu")
    a = a + block(h, p["r1_w2"], None)
    h = block(a, p["r2_w1"], "relu")
    a = a + block(h, p["r2_w2"], None)
    logit = lax.conv_general_dilated(
        a, p["out_w"], (1, 1), "VALID",
        dimension_numbers=("NCHW", "OIHW", "NCHW"),
        precision=lax.Precision.HIGHEST)
    lab = jnp.argmax(logit, axis=1)
    seg = jax.nn.one_hot(lab, n_classes, axis=1, dtype=jnp.float32)
    return logit, seg


if __name__ == "__main__":
    in_chan, mid_chan, n_classes = 4, 32, 4
    N, H, W = 2, 16, 16

    key = jax.random.PRNGKey(0)
    k_x, k_p = jax.random.split(key)
    x = jax.random.normal(k_x, (N, in_chan, H, W), jnp.float32)
    params = init_params(k_p, in_chan, mid_chan, n_classes)
    kparams = prepare_params(params)

    logit, segmap = jax.jit(seg_branch_forward)(x, kparams)
    jax.block_until_ready((logit, segmap))

    assert logit.shape == (N, n_classes, H, W)
    assert segmap.shape == (N, n_classes, H, W)
    # segmap must be a valid one-hot over the class axis, consistent with logit
    assert bool(jnp.all(jnp.sum(segmap, axis=1) == 1.0))
    assert bool(jnp.all(jnp.argmax(logit, axis=1) == jnp.argmax(segmap, axis=1)))

    # numerical check of the fused kernel against the pure-XLA reference
    ref_logit, _ = ref_forward(x, params, n_classes)
    err = float(jnp.max(jnp.abs(logit - ref_logit)))
    assert err < 5e-2, f"logit mismatch vs reference: max abs err {err}"

    print("KERNEL_OK")
</pallas_src>

<mosaic_0001>
module attributes {stable_mosaic.version = 11 : i64} {
  func.func @_segbranch_kernel(%arg0: i32, %arg1: memref<1x8x256xf32, #tpu.memory_space<vmem>>, %arg2: memref<9x8x256xf32, #tpu.memory_space<vmem>>, %arg3: memref<9x32x256xf32, #tpu.memory_space<vmem>>, %arg4: memref<9x32x8xf32, #tpu.memory_space<vmem>>, %arg5: memref<9x32x32xf32, #tpu.memory_space<vmem>>, %arg6: memref<9x32x32xf32, #tpu.memory_space<vmem>>, %arg7: memref<9x32x32xf32, #tpu.memory_space<vmem>>, %arg8: memref<9x32x32xf32, #tpu.memory_space<vmem>>, %arg9: memref<4x32xf32, #tpu.memory_space<vmem>>, %arg10: memref<1x4x256xf32, #tpu.memory_space<vmem>>, %arg11: memref<1x4x256xf32, #tpu.memory_space<vmem>>) attributes {dimension_semantics = [#tpu.dimension_semantics<parallel>], iteration_bounds = array<i64: 2>, scalar_prefetch = 0 : i64, scratch_operands = 0 : i64, tpu.core_type = #tpu.core_type<tc>, window_params = [{transform_indices = @transform_0, window_bounds = array<i64: 1, 8, 256>}, {pipeline_mode = #tpu.pipeline_mode<synchronous>, transform_indices = @transform_1, window_bounds = array<i64: 9, 8, 256>}, {pipeline_mode = #tpu.pipeline_mode<synchronous>, transform_indices = @transform_2, window_bounds = array<i64: 9, 32, 256>}, {pipeline_mode = #tpu.pipeline_mode<synchronous>, transform_indices = @transform_3, window_bounds = array<i64: 9, 32, 8>}, {pipeline_mode = #tpu.pipeline_mode<synchronous>, transform_indices = @transform_4, window_bounds = array<i64: 9, 32, 32>}, {pipeline_mode = #tpu.pipeline_mode<synchronous>, transform_indices = @transform_5, window_bounds = array<i64: 9, 32, 32>}, {pipeline_mode = #tpu.pipeline_mode<synchronous>, transform_indices = @transform_6, window_bounds = array<i64: 9, 32, 32>}, {pipeline_mode = #tpu.pipeline_mode<synchronous>, transform_indices = @transform_7, window_bounds = array<i64: 9, 32, 32>}, {pipeline_mode = #tpu.pipeline_mode<synchronous>, transform_indices = @transform_8, window_bounds = array<i64: 4, 32>}, {transform_indices = @transform_9, window_bounds = array<i64: 1, 4, 256>}, {transform_indices = @transform_10, window_bounds = array<i64: 1, 4, 256>}]} {
    %c0 = arith.constant 0 : index
    %c0_0 = arith.constant 0 : index
    %c0_1 = arith.constant 0 : index
    %0 = vector.load %arg1[%c0, %c0_0, %c0_1] : memref<1x8x256xf32, #tpu.memory_space<vmem>>, vector<1x8x256xf32>
    %1 = vector.shape_cast %0 : vector<1x8x256xf32> to vector<8x256xf32>
    %c17_i32 = arith.constant 17 : i32
    %2 = tpu.dynamic_rotate %1 by %c17_i32 dim 1 : vector<8x256xf32>, i32 -> vector<8x256xf32>
    %c0_2 = arith.constant 0 : index
    %c0_3 = arith.constant 0 : index
    %c0_4 = arith.constant 0 : index
    %3 = vector.load %arg2[%c0_2, %c0_3, %c0_4] : memref<9x8x256xf32, #tpu.memory_space<vmem>>, vector<1x8x256xf32>
    %4 = vector.shape_cast %3 : vector<1x8x256xf32> to vector<8x256xf32>
    %5 = arith.mulf %2, %4 : vector<8x256xf32>
    %c0_5 = arith.constant 0 : index
    %c0_6 = arith.constant 0 : index
    %c0_7 = arith.constant 0 : index
    %6 = vector.load %arg4[%c0_5, %c0_6, %c0_7] : memref<9x32x8xf32, #tpu.memory_space<vmem>>, vector<1x32x8xf32>
    %7 = vector.shape_cast %6 : vector<1x32x8xf32> to vector<32x8xf32>
    %cst = arith.constant dense<0.000000e+00> : vector<32x256xf32>
    %8 = tpu.matmul %7, %5, %cst {dimension_numbers = #tpu.dot_dimension_numbers<[1], [0], [0], [1], [0, 0, 1, 1], [], []>} : vector<32x8xf32>, vector<8x256xf32>, vector<32x256xf32> -> vector<32x256xf32>
    %c16_i32 = arith.constant 16 : i32
    %9 = tpu.dynamic_rotate %1 by %c16_i32 dim 1 : vector<8x256xf32>, i32 -> vector<8x256xf32>
    %c1 = arith.constant 1 : index
    %c0_8 = arith.constant 0 : index
    %c0_9 = arith.constant 0 : index
    %10 = vector.load %arg2[%c1, %c0_8, %c0_9] : memref<9x8x256xf32, #tpu.memory_space<vmem>>, vector<1x8x256xf32>
    %11 = vector.shape_cast %10 : vector<1x8x256xf32> to vector<8x256xf32>
    %12 = arith.mulf %9, %11 : vector<8x256xf32>
    %c1_10 = arith.constant 1 : index
    %c0_11 = arith.constant 0 : index
    %c0_12 = arith.constant 0 : index
    %13 = vector.load %arg4[%c1_10, %c0_11, %c0_12] : memref<9x32x8xf32, #tpu.memory_space<vmem>>, vector<1x32x8xf32>
    %14 = vector.shape_cast %13 : vector<1x32x8xf32> to vector<32x8xf32>
    %cst_13 = arith.constant dense<0.000000e+00> : vector<32x256xf32>
    %15 = tpu.matmul %14, %12, %cst_13 {dimension_numbers = #tpu.dot_dimension_numbers<[1], [0], [0], [1], [0, 0, 1, 1], [], []>} : vector<32x8xf32>, vector<8x256xf32>, vector<32x256xf32> -> vector<32x256xf32>
    %16 = arith.addf %8, %15 : vector<32x256xf32>
    %c15_i32 = arith.constant 15 : i32
    %17 = tpu.dynamic_rotate %1 by %c15_i32 dim 1 : vector<8x256xf32>, i32 -> vector<8x256xf32>
    %c2 = arith.constant 2 : index
    %c0_14 = arith.constant 0 : index
    %c0_15 = arith.constant 0 : index
    %18 = vector.load %arg2[%c2, %c0_14, %c0_15] : memref<9x8x256xf32, #tpu.memory_space<vmem>>, vector<1x8x256xf32>
    %19 = vector.shape_cast %18 : vector<1x8x256xf32> to vector<8x256xf32>
    %20 = arith.mulf %17, %19 : vector<8x256xf32>
    %c2_16 = arith.constant 2 : index
    %c0_17 = arith.constant 0 : index
    %c0_18 = arith.constant 0 : index
    %21 = vector.load %arg4[%c2_16, %c0_17, %c0_18] : memref<9x32x8xf32, #tpu.memory_space<vmem>>, vector<1x32x8xf32>
    %22 = vector.shape_cast %21 : vector<1x32x8xf32> to vector<32x8xf32>
    %cst_19 = arith.constant dense<0.000000e+00> : vector<32x256xf32>
    %23 = tpu.matmul %22, %20, %cst_19 {dimension_numbers = #tpu.dot_dimension_numbers<[1], [0], [0], [1], [0, 0, 1, 1], [], []>} : vector<32x8xf32>, vector<8x256xf32>, vector<32x256xf32> -> vector<32x256xf32>
    %24 = arith.addf %16, %23 : vector<32x256xf32>
    %c1_i32 = arith.constant 1 : i32
    %25 = tpu.dynamic_rotate %1 by %c1_i32 dim 1 : vector<8x256xf32>, i32 -> vector<8x256xf32>
    %c3 = arith.constant 3 : index
    %c0_20 = arith.constant 0 : index
    %c0_21 = arith.constant 0 : index
    %26 = vector.load %arg2[%c3, %c0_20, %c0_21] : memref<9x8x256xf32, #tpu.memory_space<vmem>>, vector<1x8x256xf32>
    %27 = vector.shape_cast %26 : vector<1x8x256xf32> to vector<8x256xf32>
    %28 = arith.mulf %25, %27 : vector<8x256xf32>
    %c3_22 = arith.constant 3 : index
    %c0_23 = arith.constant 0 : index
    %c0_24 = arith.constant 0 : index
    %29 = vector.load %arg4[%c3_22, %c0_23, %c0_24] : memref<9x32x8xf32, #tpu.memory_space<vmem>>, vector<1x32x8xf32>
    %30 = vector.shape_cast %29 : vector<1x32x8xf32> to vector<32x8xf32>
    %cst_25 = arith.constant dense<0.000000e+00> : vector<32x256xf32>
    %31 = tpu.matmul %30, %28, %cst_25 {dimension_numbers = #tpu.dot_dimension_numbers<[1], [0], [0], [1], [0, 0, 1, 1], [], []>} : vector<32x8xf32>, vector<8x256xf32>, vector<32x256xf32> -> vector<32x256xf32>
    %32 = arith.addf %24, %31 : vector<32x256xf32>
    %c4 = arith.constant 4 : index
    %c0_26 = arith.constant 0 : index
    %c0_27 = arith.constant 0 : index
    %33 = vector.load %arg4[%c4, %c0_26, %c0_27] : memref<9x32x8xf32, #tpu.memory_space<vmem>>, vector<1x32x8xf32>
    %34 = vector.shape_cast %33 : vector<1x32x8xf32> to vector<32x8xf32>
    %cst_28 = arith.constant dense<0.000000e+00> : vector<32x256xf32>
    %35 = tpu.matmul %34, %1, %cst_28 {dimension_numbers = #tpu.dot_dimension_numbers<[1], [0], [0], [1], [0, 0, 1, 1], [], []>} : vector<32x8xf32>, vector<8x256xf32>, vector<32x256xf32> -> vector<32x256xf32>
    %36 = arith.addf %32, %35 : vector<32x256xf32>
    %c255_i32 = arith.constant 255 : i32
    %37 = tpu.dynamic_rotate %1 by %c255_i32 dim 1 : vector<8x256xf32>, i32 -> vector<8x256xf32>
    %c5 = arith.constant 5 : index
    %c0_29 = arith.constant 0 : index
    %c0_30 = arith.constant 0 : index
    %38 = vector.load %arg2[%c5, %c0_29, %c0_30] : memref<9x8x256xf32, #tpu.memory_space<vmem>>, vector<1x8x256xf32>
    %39 = vector.shape_cast %38 : vector<1x8x256xf32> to vector<8x256xf32>
    %40 = arith.mulf %37, %39 : vector<8x256xf32>
    %c5_31 = arith.constant 5 : index
    %c0_32 = arith.constant 0 : index
    %c0_33 = arith.constant 0 : index
    %41 = vector.load %arg4[%c5_31, %c0_32, %c0_33] : memref<9x32x8xf32, #tpu.memory_space<vmem>>, vector<1x32x8xf32>
    %42 = vector.shape_cast %41 : vector<1x32x8xf32> to vector<32x8xf32>
    %cst_34 = arith.constant dense<0.000000e+00> : vector<32x256xf32>
    %43 = tpu.matmul %42, %40, %cst_34 {dimension_numbers = #tpu.dot_dimension_numbers<[1], [0], [0], [1], [0, 0, 1, 1], [], []>} : vector<32x8xf32>, vector<8x256xf32>, vector<32x256xf32> -> vector<32x256xf32>
    %44 = arith.addf %36, %43 : vector<32x256xf32>
    %c241_i32 = arith.constant 241 : i32
    %45 = tpu.dynamic_rotate %1 by %c241_i32 dim 1 : vector<8x256xf32>, i32 -> vector<8x256xf32>
    %c6 = arith.constant 6 : index
    %c0_35 = arith.constant 0 : index
    %c0_36 = arith.constant 0 : index
    %46 = vector.load %arg2[%c6, %c0_35, %c0_36] : memref<9x8x256xf32, #tpu.memory_space<vmem>>, vector<1x8x256xf32>
    %47 = vector.shape_cast %46 : vector<1x8x256xf32> to vector<8x256xf32>
    %48 = arith.mulf %45, %47 : vector<8x256xf32>
    %c6_37 = arith.constant 6 : index
    %c0_38 = arith.constant 0 : index
    %c0_39 = arith.constant 0 : index
    %49 = vector.load %arg4[%c6_37, %c0_38, %c0_39] : memref<9x32x8xf32, #tpu.memory_space<vmem>>, vector<1x32x8xf32>
    %50 = vector.shape_cast %49 : vector<1x32x8xf32> to vector<32x8xf32>
    %cst_40 = arith.constant dense<0.000000e+00> : vector<32x256xf32>
    %51 = tpu.matmul %50, %48, %cst_40 {dimension_numbers = #tpu.dot_dimension_numbers<[1], [0], [0], [1], [0, 0, 1, 1], [], []>} : vector<32x8xf32>, vector<8x256xf32>, vector<32x256xf32> -> vector<32x256xf32>
    %52 = arith.addf %44, %51 : vector<32x256xf32>
    %c240_i32 = arith.constant 240 : i32
    %53 = tpu.dynamic_rotate %1 by %c240_i32 dim 1 : vector<8x256xf32>, i32 -> vector<8x256xf32>
    %c7 = arith.constant 7 : index
    %c0_41 = arith.constant 0 : index
    %c0_42 = arith.constant 0 : index
    %54 = vector.load %arg2[%c7, %c0_41, %c0_42] : memref<9x8x256xf32, #tpu.memory_space<vmem>>, vector<1x8x256xf32>
    %55 = vector.shape_cast %54 : vector<1x8x256xf32> to vector<8x256xf32>
    %56 = arith.mulf %53, %55 : vector<8x256xf32>
    %c7_43 = arith.constant 7 : index
    %c0_44 = arith.constant 0 : index
    %c0_45 = arith.constant 0 : index
    %57 = vector.load %arg4[%c7_43, %c0_44, %c0_45] : memref<9x32x8xf32, #tpu.memory_space<vmem>>, vector<1x32x8xf32>
    %58 = vector.shape_cast %57 : vector<1x32x8xf32> to vector<32x8xf32>
    %cst_46 = arith.constant dense<0.000000e+00> : vector<32x256xf32>
    %59 = tpu.matmul %58, %56, %cst_46 {dimension_numbers = #tpu.dot_dimension_numbers<[1], [0], [0], [1], [0, 0, 1, 1], [], []>} : vector<32x8xf32>, vector<8x256xf32>, vector<32x256xf32> -> vector<32x256xf32>
    %60 = arith.addf %52, %59 : vector<32x256xf32>
    %c239_i32 = arith.constant 239 : i32
    %61 = tpu.dynamic_rotate %1 by %c239_i32 dim 1 : vector<8x256xf32>, i32 -> vector<8x256xf32>
    %c8 = arith.constant 8 : index
    %c0_47 = arith.constant 0 : index
    %c0_48 = arith.constant 0 : index
    %62 = vector.load %arg2[%c8, %c0_47, %c0_48] : memref<9x8x256xf32, #tpu.memory_space<vmem>>, vector<1x8x256xf32>
    %63 = vector.shape_cast %62 : vector<1x8x256xf32> to vector<8x256xf32>
    %64 = arith.mulf %61, %63 : vector<8x256xf32>
    %c8_49 = arith.constant 8 : index
    %c0_50 = arith.constant 0 : index
    %c0_51 = arith.constant 0 : index
    %65 = vector.load %arg4[%c8_49, %c0_50, %c0_51] : memref<9x32x8xf32, #tpu.memory_space<vmem>>, vector<1x32x8xf32>
    %66 = vector.shape_cast %65 : vector<1x32x8xf32> to vector<32x8xf32>
    %cst_52 = arith.constant dense<0.000000e+00> : vector<32x256xf32>
    %67 = tpu.matmul %66, %64, %cst_52 {dimension_numbers = #tpu.dot_dimension_numbers<[1], [0], [0], [1], [0, 0, 1, 1], [], []>} : vector<32x8xf32>, vector<8x256xf32>, vector<32x256xf32> -> vector<32x256xf32>
    %68 = arith.addf %60, %67 : vector<32x256xf32>
    %cst_53 = arith.constant dense<0.000000e+00> : vector<32xf32>
    %69 = vector.multi_reduction <add>, %68, %cst_53 [1] : vector<32x256xf32> to vector<32xf32>
    %70 = vector.shape_cast %69 : vector<32xf32> to vector<32x1xf32>
    %cst_54 = arith.constant 3.906250e-03 : f32
    %71 = vector.broadcast %cst_54 : f32 to vector<32x1xf32>
    %72 = arith.mulf %70, %71 : vector<32x1xf32>
    %73 = arith.mulf %68, %68 : vector<32x256xf32>
    %cst_55 = arith.constant dense<0.000000e+00> : vector<32xf32>
    %74 = vector.multi_reduction <add>, %73, %cst_55 [1] : vector<32x256xf32> to vector<32xf32>
    %75 = vector.shape_cast %74 : vector<32xf32> to vector<32x1xf32>
    %cst_56 = arith.constant 3.906250e-03 : f32
    %76 = vector.broadcast %cst_56 : f32 to vector<32x1xf32>
    %77 = arith.mulf %75, %76 : vector<32x1xf32>
    %78 = arith.mulf %72, %72 : vector<32x1xf32>
    %79 = arith.subf %77, %78 : vector<32x1xf32>
    %80 = vector.broadcast %72 : vector<32x1xf32> to vector<32x256xf32>
    %81 = arith.subf %68, %80 : vector<32x256xf32>
    %cst_57 = arith.constant 9.99999974E-6 : f32
    %82 = vector.broadcast %cst_57 : f32 to vector<32x1xf32>
    %83 = arith.addf %79, %82 : vector<32x1xf32>
    %84 = math.rsqrt %83 : vector<32x1xf32>
    %85 = vector.broadcast %84 : vector<32x1xf32> to vector<32x256xf32>
    %86 = arith.mulf %81, %85 : vector<32x256xf32>
    %cst_58 = arith.constant 0.000000e+00 : f32
    %87 = vector.broadcast %cst_58 : f32 to vector<32x256xf32>
    %88 = arith.cmpf oge, %86, %87 : vector<32x256xf32>
    %cst_59 = arith.constant 2.000000e-01 : f32
    %89 = vector.broadcast %cst_59 : f32 to vector<32x256xf32>
    %90 = arith.mulf %89, %86 : vector<32x256xf32>
    %91 = arith.select %88, %86, %90 : vector<32x256xi1>, vector<32x256xf32>
    %c17_i32_60 = arith.constant 17 : i32
    %92 = tpu.dynamic_rotate %91 by %c17_i32_60 dim 1 : vector<32x256xf32>, i32 -> vector<32x256xf32>
    %c0_61 = arith.constant 0 : index
    %c0_62 = arith.constant 0 : index
    %c0_63 = arith.constant 0 : index
    %93 = vector.load %arg3[%c0_61, %c0_62, %c0_63] : memref<9x32x256xf32, #tpu.memory_space<vmem>>, vector<1x32x256xf32>
    %94 = vector.shape_cast %93 : vector<1x32x256xf32> to vector<32x256xf32>
    %95 = arith.mulf %92, %94 : vector<32x256xf32>
    %c0_64 = arith.constant 0 : index
    %c0_65 = arith.constant 0 : index
    %c0_66 = arith.constant 0 : index
    %96 = vector.load %arg5[%c0_64, %c0_65, %c0_66] : memref<9x32x32xf32, #tpu.memory_space<vmem>>, vector<1x32x32xf32>
    %97 = vector.shape_cast %96 : vector<1x32x32xf32> to vector<32x32xf32>
    %cst_67 = arith.constant dense<0.000000e+00> : vector<32x256xf32>
    %98 = tpu.matmul %97, %95, %cst_67 {dimension_numbers = #tpu.dot_dimension_numbers<[1], [0], [0], [1], [0, 0, 1, 1], [], []>} : vector<32x32xf32>, vector<32x256xf32>, vector<32x256xf32> -> vector<32x256xf32>
    %c16_i32_68 = arith.constant 16 : i32
    %99 = tpu.dynamic_rotate %91 by %c16_i32_68 dim 1 : vector<32x256xf32>, i32 -> vector<32x256xf32>
    %c1_69 = arith.constant 1 : index
    %c0_70 = arith.constant 0 : index
    %c0_71 = arith.constant 0 : index
    %100 = vector.load %arg3[%c1_69, %c0_70, %c0_71] : memref<9x32x256xf32, #tpu.memory_space<vmem>>, vector<1x32x256xf32>
    %101 = vector.shape_cast %100 : vector<1x32x256xf32> to vector<32x256xf32>
    %102 = arith.mulf %99, %101 : vector<32x256xf32>
    %c1_72 = arith.constant 1 : index
    %c0_73 = arith.constant 0 : index
    %c0_74 = arith.constant 0 : index
    %103 = vector.load %arg5[%c1_72, %c0_73, %c0_74] : memref<9x32x32xf32, #tpu.memory_space<vmem>>, vector<1x32x32xf32>
    %104 = vector.shape_cast %103 : vector<1x32x32xf32> to vector<32x32xf32>
    %cst_75 = arith.constant dense<0.000000e+00> : vector<32x256xf32>
    %105 = tpu.matmul %104, %102, %cst_75 {dimension_numbers = #tpu.dot_dimension_numbers<[1], [0], [0], [1], [0, 0, 1, 1], [], []>} : vector<32x32xf32>, vector<32x256xf32>, vector<32x256xf32> -> vector<32x256xf32>
    %106 = arith.addf %98, %105 : vector<32x256xf32>
    %c15_i32_76 = arith.constant 15 : i32
    %107 = tpu.dynamic_rotate %91 by %c15_i32_76 dim 1 : vector<32x256xf32>, i32 -> vector<32x256xf32>
    %c2_77 = arith.constant 2 : index
    %c0_78 = arith.constant 0 : index
    %c0_79 = arith.constant 0 : index
    %108 = vector.load %arg3[%c2_77, %c0_78, %c0_79] : memref<9x32x256xf32, #tpu.memory_space<vmem>>, vector<1x32x256xf32>
    %109 = vector.shape_cast %108 : vector<1x32x256xf32> to vector<32x256xf32>
    %110 = arith.mulf %107, %109 : vector<32x256xf32>
    %c2_80 = arith.constant 2 : index
    %c0_81 = arith.constant 0 : index
    %c0_82 = arith.constant 0 : index
    %111 = vector.load %arg5[%c2_80, %c0_81, %c0_82] : memref<9x32x32xf32, #tpu.memory_space<vmem>>, vector<1x32x32xf32>
    %112 = vector.shape_cast %111 : vector<1x32x32xf32> to vector<32x32xf32>
    %cst_83 = arith.constant dense<0.000000e+00> : vector<32x256xf32>
    %113 = tpu.matmul %112, %110, %cst_83 {dimension_numbers = #tpu.dot_dimension_numbers<[1], [0], [0], [1], [0, 0, 1, 1], [], []>} : vector<32x32xf32>, vector<32x256xf32>, vector<32x256xf32> -> vector<32x256xf32>
    %114 = arith.addf %106, %113 : vector<32x256xf32>
    %c1_i32_84 = arith.constant 1 : i32
    %115 = tpu.dynamic_rotate %91 by %c1_i32_84 dim 1 : vector<32x256xf32>, i32 -> vector<32x256xf32>
    %c3_85 = arith.constant 3 : index
    %c0_86 = arith.constant 0 : index
    %c0_87 = arith.constant 0 : index
    %116 = vector.load %arg3[%c3_85, %c0_86, %c0_87] : memref<9x32x256xf32, #tpu.memory_space<vmem>>, vector<1x32x256xf32>
    %117 = vector.shape_cast %116 : vector<1x32x256xf32> to vector<32x256xf32>
    %118 = arith.mulf %115, %117 : vector<32x256xf32>
    %c3_88 = arith.constant 3 : index
    %c0_89 = arith.constant 0 : index
    %c0_90 = arith.constant 0 : index
    %119 = vector.load %arg5[%c3_88, %c0_89, %c0_90] : memref<9x32x32xf32, #tpu.memory_space<vmem>>, vector<1x32x32xf32>
    %120 = vector.shape_cast %119 : vector<1x32x32xf32> to vector<32x32xf32>
    %cst_91 = arith.constant dense<0.000000e+00> : vector<32x256xf32>
    %121 = tpu.matmul %120, %118, %cst_91 {dimension_numbers = #tpu.dot_dimension_numbers<[1], [0], [0], [1], [0, 0, 1, 1], [], []>} : vector<32x32xf32>, vector<32x256xf32>, vector<32x256xf32> -> vector<32x256xf32>
    %122 = arith.addf %114, %121 : vector<32x256xf32>
    %c4_92 = arith.constant 4 : index
    %c0_93 = arith.constant 0 : index
    %c0_94 = arith.constant 0 : index
    %123 = vector.load %arg5[%c4_92, %c0_93, %c0_94] : memref<9x32x32xf32, #tpu.memory_space<vmem>>, vector<1x32x32xf32>
    %124 = vector.shape_cast %123 : vector<1x32x32xf32> to vector<32x32xf32>
    %cst_95 = arith.constant dense<0.000000e+00> : vector<32x256xf32>
    %125 = tpu.matmul %124, %91, %cst_95 {dimension_numbers = #tpu.dot_dimension_numbers<[1], [0], [0], [1], [0, 0, 1, 1], [], []>} : vector<32x32xf32>, vector<32x256xf32>, vector<32x256xf32> -> vector<32x256xf32>
    %126 = arith.addf %122, %125 : vector<32x256xf32>
    %c255_i32_96 = arith.constant 255 : i32
    %127 = tpu.dynamic_rotate %91 by %c255_i32_96 dim 1 : vector<32x256xf32>, i32 -> vector<32x256xf32>
    %c5_97 = arith.constant 5 : index
    %c0_98 = arith.constant 0 : index
    %c0_99 = arith.constant 0 : index
    %128 = vector.load %arg3[%c5_97, %c0_98, %c0_99] : memref<9x32x256xf32, #tpu.memory_space<vmem>>, vector<1x32x256xf32>
    %129 = vector.shape_cast %128 : vector<1x32x256xf32> to vector<32x256xf32>
    %130 = arith.mulf %127, %129 : vector<32x256xf32>
    %c5_100 = arith.constant 5 : index
    %c0_101 = arith.constant 0 : index
    %c0_102 = arith.constant 0 : index
    %131 = vector.load %arg5[%c5_100, %c0_101, %c0_102] : memref<9x32x32xf32, #tpu.memory_space<vmem>>, vector<1x32x32xf32>
    %132 = vector.shape_cast %131 : vector<1x32x32xf32> to vector<32x32xf32>
    %cst_103 = arith.constant dense<0.000000e+00> : vector<32x256xf32>
    %133 = tpu.matmul %132, %130, %cst_103 {dimension_numbers = #tpu.dot_dimension_numbers<[1], [0], [0], [1], [0, 0, 1, 1], [], []>} : vector<32x32xf32>, vector<32x256xf32>, vector<32x256xf32> -> vector<32x256xf32>
    %134 = arith.addf %126, %133 : vector<32x256xf32>
    %c241_i32_104 = arith.constant 241 : i32
    %135 = tpu.dynamic_rotate %91 by %c241_i32_104 dim 1 : vector<32x256xf32>, i32 -> vector<32x256xf32>
    %c6_105 = arith.constant 6 : index
    %c0_106 = arith.constant 0 : index
    %c0_107 = arith.constant 0 : index
    %136 = vector.load %arg3[%c6_105, %c0_106, %c0_107] : memref<9x32x256xf32, #tpu.memory_space<vmem>>, vector<1x32x256xf32>
    %137 = vector.shape_cast %136 : vector<1x32x256xf32> to vector<32x256xf32>
    %138 = arith.mulf %135, %137 : vector<32x256xf32>
    %c6_108 = arith.constant 6 : index
    %c0_109 = arith.constant 0 : index
    %c0_110 = arith.constant 0 : index
    %139 = vector.load %arg5[%c6_108, %c0_109, %c0_110] : memref<9x32x32xf32, #tpu.memory_space<vmem>>, vector<1x32x32xf32>
    %140 = vector.shape_cast %139 : vector<1x32x32xf32> to vector<32x32xf32>
    %cst_111 = arith.constant dense<0.000000e+00> : vector<32x256xf32>
    %141 = tpu.matmul %140, %138, %cst_111 {dimension_numbers = #tpu.dot_dimension_numbers<[1], [0], [0], [1], [0, 0, 1, 1], [], []>} : vector<32x32xf32>, vector<32x256xf32>, vector<32x256xf32> -> vector<32x256xf32>
    %142 = arith.addf %134, %141 : vector<32x256xf32>
    %c240_i32_112 = arith.constant 240 : i32
    %143 = tpu.dynamic_rotate %91 by %c240_i32_112 dim 1 : vector<32x256xf32>, i32 -> vector<32x256xf32>
    %c7_113 = arith.constant 7 : index
    %c0_114 = arith.constant 0 : index
    %c0_115 = arith.constant 0 : index
    %144 = vector.load %arg3[%c7_113, %c0_114, %c0_115] : memref<9x32x256xf32, #tpu.memory_space<vmem>>, vector<1x32x256xf32>
    %145 = vector.shape_cast %144 : vector<1x32x256xf32> to vector<32x256xf32>
    %146 = arith.mulf %143, %145 : vector<32x256xf32>
    %c7_116 = arith.constant 7 : index
    %c0_117 = arith.constant 0 : index
    %c0_118 = arith.constant 0 : index
    %147 = vector.load %arg5[%c7_116, %c0_117, %c0_118] : memref<9x32x32xf32, #tpu.memory_space<vmem>>, vector<1x32x32xf32>
    %148 = vector.shape_cast %147 : vector<1x32x32xf32> to vector<32x32xf32>
    %cst_119 = arith.constant dense<0.000000e+00> : vector<32x256xf32>
    %149 = tpu.matmul %148, %146, %cst_119 {dimension_numbers = #tpu.dot_dimension_numbers<[1], [0], [0], [1], [0, 0, 1, 1], [], []>} : vector<32x32xf32>, vector<32x256xf32>, vector<32x256xf32> -> vector<32x256xf32>
    %150 = arith.addf %142, %149 : vector<32x256xf32>
    %c239_i32_120 = arith.constant 239 : i32
    %151 = tpu.dynamic_rotate %91 by %c239_i32_120 dim 1 : vector<32x256xf32>, i32 -> vector<32x256xf32>
    %c8_121 = arith.constant 8 : index
    %c0_122 = arith.constant 0 : index
    %c0_123 = arith.constant 0 : index
    %152 = vector.load %arg3[%c8_121, %c0_122, %c0_123] : memref<9x32x256xf32, #tpu.memory_space<vmem>>, vector<1x32x256xf32>
    %153 = vector.shape_cast %152 : vector<1x32x256xf32> to vector<32x256xf32>
    %154 = arith.mulf %151, %153 : vector<32x256xf32>
    %c8_124 = arith.constant 8 : index
    %c0_125 = arith.constant 0 : index
    %c0_126 = arith.constant 0 : index
    %155 = vector.load %arg5[%c8_124, %c0_125, %c0_126] : memref<9x32x32xf32, #tpu.memory_space<vmem>>, vector<1x32x32xf32>
    %156 = vector.shape_cast %155 : vector<1x32x32xf32> to vector<32x32xf32>
    %cst_127 = arith.constant dense<0.000000e+00> : vector<32x256xf32>
    %157 = tpu.matmul %156, %154, %cst_127 {dimension_numbers = #tpu.dot_dimension_numbers<[1], [0], [0], [1], [0, 0, 1, 1], [], []>} : vector<32x32xf32>, vector<32x256xf32>, vector<32x256xf32> -> vector<32x256xf32>
    %158 = arith.addf %150, %157 : vector<32x256xf32>
    %cst_128 = arith.constant dense<0.000000e+00> : vector<32xf32>
    %159 = vector.multi_reduction <add>, %158, %cst_128 [1] : vector<32x256xf32> to vector<32xf32>
    %160 = vector.shape_cast %159 : vector<32xf32> to vector<32x1xf32>
    %cst_129 = arith.constant 3.906250e-03 : f32
    %161 = vector.broadcast %cst_129 : f32 to vector<32x1xf32>
    %162 = arith.mulf %160, %161 : vector<32x1xf32>
    %163 = arith.mulf %158, %158 : vector<32x256xf32>
    %cst_130 = arith.constant dense<0.000000e+00> : vector<32xf32>
    %164 = vector.multi_reduction <add>, %163, %cst_130 [1] : vector<32x256xf32> to vector<32xf32>
    %165 = vector.shape_cast %164 : vector<32xf32> to vector<32x1xf32>
    %cst_131 = arith.constant 3.906250e-03 : f32
    %166 = vector.broadcast %cst_131 : f32 to vector<32x1xf32>
    %167 = arith.mulf %165, %166 : vector<32x1xf32>
    %168 = arith.mulf %162, %162 : vector<32x1xf32>
    %169 = arith.subf %167, %168 : vector<32x1xf32>
    %170 = vector.broadcast %162 : vector<32x1xf32> to vector<32x256xf32>
    %171 = arith.subf %158, %170 : vector<32x256xf32>
    %cst_132 = arith.constant 9.99999974E-6 : f32
    %172 = vector.broadcast %cst_132 : f32 to vector<32x1xf32>
    %173 = arith.addf %169, %172 : vector<32x1xf32>
    %174 = math.rsqrt %173 : vector<32x1xf32>
    %175 = vector.broadcast %174 : vector<32x1xf32> to vector<32x256xf32>
    %176 = arith.mulf %171, %175 : vector<32x256xf32>
    %cst_133 = arith.constant 0.000000e+00 : f32
    %177 = vector.broadcast %cst_133 : f32 to vector<32x256xf32>
    %178 = arith.maximumf %176, %177 : vector<32x256xf32>
    %c17_i32_134 = arith.constant 17 : i32
    %179 = tpu.dynamic_rotate %178 by %c17_i32_134 dim 1 : vector<32x256xf32>, i32 -> vector<32x256xf32>
    %c0_135 = arith.constant 0 : index
    %c0_136 = arith.constant 0 : index
    %c0_137 = arith.constant 0 : index
    %180 = vector.load %arg3[%c0_135, %c0_136, %c0_137] : memref<9x32x256xf32, #tpu.memory_space<vmem>>, vector<1x32x256xf32>
    %181 = vector.shape_cast %180 : vector<1x32x256xf32> to vector<32x256xf32>
    %182 = arith.mulf %179, %181 : vector<32x256xf32>
    %c0_138 = arith.constant 0 : index
    %c0_139 = arith.constant 0 : index
    %c0_140 = arith.constant 0 : index
    %183 = vector.load %arg6[%c0_138, %c0_139, %c0_140] : memref<9x32x32xf32, #tpu.memory_space<vmem>>, vector<1x32x32xf32>
    %184 = vector.shape_cast %183 : vector<1x32x32xf32> to vector<32x32xf32>
    %cst_141 = arith.constant dense<0.000000e+00> : vector<32x256xf32>
    %185 = tpu.matmul %184, %182, %cst_141 {dimension_numbers = #tpu.dot_dimension_numbers<[1], [0], [0], [1], [0, 0, 1, 1], [], []>} : vector<32x32xf32>, vector<32x256xf32>, vector<32x256xf32> -> vector<32x256xf32>
    %c16_i32_142 = arith.constant 16 : i32
    %186 = tpu.dynamic_rotate %178 by %c16_i32_142 dim 1 : vector<32x256xf32>, i32 -> vector<32x256xf32>
    %c1_143 = arith.constant 1 : index
    %c0_144 = arith.constant 0 : index
    %c0_145 = arith.constant 0 : index
    %187 = vector.load %arg3[%c1_143, %c0_144, %c0_145] : memref<9x32x256xf32, #tpu.memory_space<vmem>>, vector<1x32x256xf32>
    %188 = vector.shape_cast %187 : vector<1x32x256xf32> to vector<32x256xf32>
    %189 = arith.mulf %186, %188 : vector<32x256xf32>
    %c1_146 = arith.constant 1 : index
    %c0_147 = arith.constant 0 : index
    %c0_148 = arith.constant 0 : index
    %190 = vector.load %arg6[%c1_146, %c0_147, %c0_148] : memref<9x32x32xf32, #tpu.memory_space<vmem>>, vector<1x32x32xf32>
    %191 = vector.shape_cast %190 : vector<1x32x32xf32> to vector<32x32xf32>
    %cst_149 = arith.constant dense<0.000000e+00> : vector<32x256xf32>
    %192 = tpu.matmul %191, %189, %cst_149 {dimension_numbers = #tpu.dot_dimension_numbers<[1], [0], [0], [1], [0, 0, 1, 1], [], []>} : vector<32x32xf32>, vector<32x256xf32>, vector<32x256xf32> -> vector<32x256xf32>
    %193 = arith.addf %185, %192 : vector<32x256xf32>
    %c15_i32_150 = arith.constant 15 : i32
    %194 = tpu.dynamic_rotate %178 by %c15_i32_150 dim 1 : vector<32x256xf32>, i32 -> vector<32x256xf32>
    %c2_151 = arith.constant 2 : index
    %c0_152 = arith.constant 0 : index
    %c0_153 = arith.constant 0 : index
    %195 = vector.load %arg3[%c2_151, %c0_152, %c0_153] : memref<9x32x256xf32, #tpu.memory_space<vmem>>, vector<1x32x256xf32>
    %196 = vector.shape_cast %195 : vector<1x32x256xf32> to vector<32x256xf32>
    %197 = arith.mulf %194, %196 : vector<32x256xf32>
    %c2_154 = arith.constant 2 : index
    %c0_155 = arith.constant 0 : index
    %c0_156 = arith.constant 0 : index
    %198 = vector.load %arg6[%c2_154, %c0_155, %c0_156] : memref<9x32x32xf32, #tpu.memory_space<vmem>>, vector<1x32x32xf32>
    %199 = vector.shape_cast %198 : vector<1x32x32xf32> to vector<32x32xf32>
    %cst_157 = arith.constant dense<0.000000e+00> : vector<32x256xf32>
    %200 = tpu.matmul %199, %197, %cst_157 {dimension_numbers = #tpu.dot_dimension_numbers<[1], [0], [0], [1], [0, 0, 1, 1], [], []>} : vector<32x32xf32>, vector<32x256xf32>, vector<32x256xf32> -> vector<32x256xf32>
    %201 = arith.addf %193, %200 : vector<32x256xf32>
    %c1_i32_158 = arith.constant 1 : i32
    %202 = tpu.dynamic_rotate %178 by %c1_i32_158 dim 1 : vector<32x256xf32>, i32 -> vector<32x256xf32>
    %c3_159 = arith.constant 3 : index
    %c0_160 = arith.constant 0 : index
    %c0_161 = arith.constant 0 : index
    %203 = vector.load %arg3[%c3_159, %c0_160, %c0_161] : memref<9x32x256xf32, #tpu.memory_space<vmem>>, vector<1x32x256xf32>
    %204 = vector.shape_cast %203 : vector<1x32x256xf32> to vector<32x256xf32>
    %205 = arith.mulf %202, %204 : vector<32x256xf32>
    %c3_162 = arith.constant 3 : index
    %c0_163 = arith.constant 0 : index
    %c0_164 = arith.constant 0 : index
    %206 = vector.load %arg6[%c3_162, %c0_163, %c0_164] : memref<9x32x32xf32, #tpu.memory_space<vmem>>, vector<1x32x32xf32>
    %207 = vector.shape_cast %206 : vector<1x32x32xf32> to vector<32x32xf32>
    %cst_165 = arith.constant dense<0.000000e+00> : vector<32x256xf32>
    %208 = tpu.matmul %207, %205, %cst_165 {dimension_numbers = #tpu.dot_dimension_numbers<[1], [0], [0], [1], [0, 0, 1, 1], [], []>} : vector<32x32xf32>, vector<32x256xf32>, vector<32x256xf32> -> vector<32x256xf32>
    %209 = arith.addf %201, %208 : vector<32x256xf32>
    %c4_166 = arith.constant 4 : index
    %c0_167 = arith.constant 0 : index
    %c0_168 = arith.constant 0 : index
    %210 = vector.load %arg6[%c4_166, %c0_167, %c0_168] : memref<9x32x32xf32, #tpu.memory_space<vmem>>, vector<1x32x32xf32>
    %211 = vector.shape_cast %210 : vector<1x32x32xf32> to vector<32x32xf32>
    %cst_169 = arith.constant dense<0.000000e+00> : vector<32x256xf32>
    %212 = tpu.matmul %211, %178, %cst_169 {dimension_numbers = #tpu.dot_dimension_numbers<[1], [0], [0], [1], [0, 0, 1, 1], [], []>} : vector<32x32xf32>, vector<32x256xf32>, vector<32x256xf32> -> vector<32x256xf32>
    %213 = arith.addf %209, %212 : vector<32x256xf32>
    %c255_i32_170 = arith.constant 255 : i32
    %214 = tpu.dynamic_rotate %178 by %c255_i32_170 dim 1 : vector<32x256xf32>, i32 -> vector<32x256xf32>
    %c5_171 = arith.constant 5 : index
    %c0_172 = arith.constant 0 : index
    %c0_173 = arith.constant 0 : index
    %215 = vector.load %arg3[%c5_171, %c0_172, %c0_173] : memref<9x32x256xf32, #tpu.memory_space<vmem>>, vector<1x32x256xf32>
    %216 = vector.shape_cast %215 : vector<1x32x256xf32> to vector<32x256xf32>
    %217 = arith.mulf %214, %216 : vector<32x256xf32>
    %c5_174 = arith.constant 5 : index
    %c0_175 = arith.constant 0 : index
    %c0_176 = arith.constant 0 : index
    %218 = vector.load %arg6[%c5_174, %c0_175, %c0_176] : memref<9x32x32xf32, #tpu.memory_space<vmem>>, vector<1x32x32xf32>
    %219 = vector.shape_cast %218 : vector<1x32x32xf32> to vector<32x32xf32>
    %cst_177 = arith.constant dense<0.000000e+00> : vector<32x256xf32>
    %220 = tpu.matmul %219, %217, %cst_177 {dimension_numbers = #tpu.dot_dimension_numbers<[1], [0], [0], [1], [0, 0, 1, 1], [], []>} : vector<32x32xf32>, vector<32x256xf32>, vector<32x256xf32> -> vector<32x256xf32>
    %221 = arith.addf %213, %220 : vector<32x256xf32>
    %c241_i32_178 = arith.constant 241 : i32
    %222 = tpu.dynamic_rotate %178 by %c241_i32_178 dim 1 : vector<32x256xf32>, i32 -> vector<32x256xf32>
    %c6_179 = arith.constant 6 : index
    %c0_180 = arith.constant 0 : index
    %c0_181 = arith.constant 0 : index
    %223 = vector.load %arg3[%c6_179, %c0_180, %c0_181] : memref<9x32x256xf32, #tpu.memory_space<vmem>>, vector<1x32x256xf32>
    %224 = vector.shape_cast %223 : vector<1x32x256xf32> to vector<32x256xf32>
    %225 = arith.mulf %222, %224 : vector<32x256xf32>
    %c6_182 = arith.constant 6 : index
    %c0_183 = arith.constant 0 : index
    %c0_184 = arith.constant 0 : index
    %226 = vector.load %arg6[%c6_182, %c0_183, %c0_184] : memref<9x32x32xf32, #tpu.memory_space<vmem>>, vector<1x32x32xf32>
    %227 = vector.shape_cast %226 : vector<1x32x32xf32> to vector<32x32xf32>
    %cst_185 = arith.constant dense<0.000000e+00> : vector<32x256xf32>
    %228 = tpu.matmul %227, %225, %cst_185 {dimension_numbers = #tpu.dot_dimension_numbers<[1], [0], [0], [1], [0, 0, 1, 1], [], []>} : vector<32x32xf32>, vector<32x256xf32>, vector<32x256xf32> -> vector<32x256xf32>
    %229 = arith.addf %221, %228 : vector<32x256xf32>
    %c240_i32_186 = arith.constant 240 : i32
    %230 = tpu.dynamic_rotate %178 by %c240_i32_186 dim 1 : vector<32x256xf32>, i32 -> vector<32x256xf32>
    %c7_187 = arith.constant 7 : index
    %c0_188 = arith.constant 0 : index
    %c0_189 = arith.constant 0 : index
    %231 = vector.load %arg3[%c7_187, %c0_188, %c0_189] : memref<9x32x256xf32, #tpu.memory_space<vmem>>, vector<1x32x256xf32>
    %232 = vector.shape_cast %231 : vector<1x32x256xf32> to vector<32x256xf32>
    %233 = arith.mulf %230, %232 : vector<32x256xf32>
    %c7_190 = arith.constant 7 : index
    %c0_191 = arith.constant 0 : index
    %c0_192 = arith.constant 0 : index
    %234 = vector.load %arg6[%c7_190, %c0_191, %c0_192] : memref<9x32x32xf32, #tpu.memory_space<vmem>>, vector<1x32x32xf32>
    %235 = vector.shape_cast %234 : vector<1x32x32xf32> to vector<32x32xf32>
    %cst_193 = arith.constant dense<0.000000e+00> : vector<32x256xf32>
    %236 = tpu.matmul %235, %233, %cst_193 {dimension_numbers = #tpu.dot_dimension_numbers<[1], [0], [0], [1], [0, 0, 1, 1], [], []>} : vector<32x32xf32>, vector<32x256xf32>, vector<32x256xf32> -> vector<32x256xf32>
    %237 = arith.addf %229, %236 : vector<32x256xf32>
    %c239_i32_194 = arith.constant 239 : i32
    %238 = tpu.dynamic_rotate %178 by %c239_i32_194 dim 1 : vector<32x256xf32>, i32 -> vector<32x256xf32>
    %c8_195 = arith.constant 8 : index
    %c0_196 = arith.constant 0 : index
    %c0_197 = arith.constant 0 : index
    %239 = vector.load %arg3[%c8_195, %c0_196, %c0_197] : memref<9x32x256xf32, #tpu.memory_space<vmem>>, vector<1x32x256xf32>
    %240 = vector.shape_cast %239 : vector<1x32x256xf32> to vector<32x256xf32>
    %241 = arith.mulf %238, %240 : vector<32x256xf32>
    %c8_198 = arith.constant 8 : index
    %c0_199 = arith.constant 0 : index
    %c0_200 = arith.constant 0 : index
    %242 = vector.load %arg6[%c8_198, %c0_199, %c0_200] : memref<9x32x32xf32, #tpu.memory_space<vmem>>, vector<1x32x32xf32>
    %243 = vector.shape_cast %242 : vector<1x32x32xf32> to vector<32x32xf32>
    %cst_201 = arith.constant dense<0.000000e+00> : vector<32x256xf32>
    %244 = tpu.matmul %243, %241, %cst_201 {dimension_numbers = #tpu.dot_dimension_numbers<[1], [0], [0], [1], [0, 0, 1, 1], [], []>} : vector<32x32xf32>, vector<32x256xf32>, vector<32x256xf32> -> vector<32x256xf32>
    %245 = arith.addf %237, %244 : vector<32x256xf32>
    %cst_202 = arith.constant dense<0.000000e+00> : vector<32xf32>
    %246 = vector.multi_reduction <add>, %245, %cst_202 [1] : vector<32x256xf32> to vector<32xf32>
    %247 = vector.shape_cast %246 : vector<32xf32> to vector<32x1xf32>
    %cst_203 = arith.constant 3.906250e-03 : f32
    %248 = vector.broadcast %cst_203 : f32 to vector<32x1xf32>
    %249 = arith.mulf %247, %248 : vector<32x1xf32>
    %250 = arith.mulf %245, %245 : vector<32x256xf32>
    %cst_204 = arith.constant dense<0.000000e+00> : vector<32xf32>
    %251 = vector.multi_reduction <add>, %250, %cst_204 [1] : vector<32x256xf32> to vector<32xf32>
    %252 = vector.shape_cast %251 : vector<32xf32> to vector<32x1xf32>
    %cst_205 = arith.constant 3.906250e-03 : f32
    %253 = vector.broadcast %cst_205 : f32 to vector<32x1xf32>
    %254 = arith.mulf %252, %253 : vector<32x1xf32>
    %255 = arith.mulf %249, %249 : vector<32x1xf32>
    %256 = arith.subf %254, %255 : vector<32x1xf32>
    %257 = vector.broadcast %249 : vector<32x1xf32> to vector<32x256xf32>
    %258 = arith.subf %245, %257 : vector<32x256xf32>
    %cst_206 = arith.constant 9.99999974E-6 : f32
    %259 = vector.broadcast %cst_206 : f32 to vector<32x1xf32>
    %260 = arith.addf %256, %259 : vector<32x1xf32>
    %261 = math.rsqrt %260 : vector<32x1xf32>
    %262 = vector.broadcast %261 : vector<32x1xf32> to vector<32x256xf32>
    %263 = arith.mulf %258, %262 : vector<32x256xf32>
    %264 = arith.addf %91, %263 : vector<32x256xf32>
    %c17_i32_207 = arith.constant 17 : i32
    %265 = tpu.dynamic_rotate %264 by %c17_i32_207 dim 1 : vector<32x256xf32>, i32 -> vector<32x256xf32>
    %c0_208 = arith.constant 0 : index
    %c0_209 = arith.constant 0 : index
    %c0_210 = arith.constant 0 : index
    %266 = vector.load %arg3[%c0_208, %c0_209, %c0_210] : memref<9x32x256xf32, #tpu.memory_space<vmem>>, vector<1x32x256xf32>
    %267 = vector.shape_cast %266 : vector<1x32x256xf32> to vector<32x256xf32>
    %268 = arith.mulf %265, %267 : vector<32x256xf32>
    %c0_211 = arith.constant 0 : index
    %c0_212 = arith.constant 0 : index
    %c0_213 = arith.constant 0 : index
    %269 = vector.load %arg7[%c0_211, %c0_212, %c0_213] : memref<9x32x32xf32, #tpu.memory_space<vmem>>, vector<1x32x32xf32>
    %270 = vector.shape_cast %269 : vector<1x32x32xf32> to vector<32x32xf32>
    %cst_214 = arith.constant dense<0.000000e+00> : vector<32x256xf32>
    %271 = tpu.matmul %270, %268, %cst_214 {dimension_numbers = #tpu.dot_dimension_numbers<[1], [0], [0], [1], [0, 0, 1, 1], [], []>} : vector<32x32xf32>, vector<32x256xf32>, vector<32x256xf32> -> vector<32x256xf32>
    %c16_i32_215 = arith.constant 16 : i32
    %272 = tpu.dynamic_rotate %264 by %c16_i32_215 dim 1 : vector<32x256xf32>, i32 -> vector<32x256xf32>
    %c1_216 = arith.constant 1 : index
    %c0_217 = arith.constant 0 : index
    %c0_218 = arith.constant 0 : index
    %273 = vector.load %arg3[%c1_216, %c0_217, %c0_218] : memref<9x32x256xf32, #tpu.memory_space<vmem>>, vector<1x32x256xf32>
    %274 = vector.shape_cast %273 : vector<1x32x256xf32> to vector<32x256xf32>
    %275 = arith.mulf %272, %274 : vector<32x256xf32>
    %c1_219 = arith.constant 1 : index
    %c0_220 = arith.constant 0 : index
    %c0_221 = arith.constant 0 : index
    %276 = vector.load %arg7[%c1_219, %c0_220, %c0_221] : memref<9x32x32xf32, #tpu.memory_space<vmem>>, vector<1x32x32xf32>
    %277 = vector.shape_cast %276 : vector<1x32x32xf32> to vector<32x32xf32>
    %cst_222 = arith.constant dense<0.000000e+00> : vector<32x256xf32>
    %278 = tpu.matmul %277, %275, %cst_222 {dimension_numbers = #tpu.dot_dimension_numbers<[1], [0], [0], [1], [0, 0, 1, 1], [], []>} : vector<32x32xf32>, vector<32x256xf32>, vector<32x256xf32> -> vector<32x256xf32>
    %279 = arith.addf %271, %278 : vector<32x256xf32>
    %c15_i32_223 = arith.constant 15 : i32
    %280 = tpu.dynamic_rotate %264 by %c15_i32_223 dim 1 : vector<32x256xf32>, i32 -> vector<32x256xf32>
    %c2_224 = arith.constant 2 : index
    %c0_225 = arith.constant 0 : index
    %c0_226 = arith.constant 0 : index
    %281 = vector.load %arg3[%c2_224, %c0_225, %c0_226] : memref<9x32x256xf32, #tpu.memory_space<vmem>>, vector<1x32x256xf32>
    %282 = vector.shape_cast %281 : vector<1x32x256xf32> to vector<32x256xf32>
    %283 = arith.mulf %280, %282 : vector<32x256xf32>
    %c2_227 = arith.constant 2 : index
    %c0_228 = arith.constant 0 : index
    %c0_229 = arith.constant 0 : index
    %284 = vector.load %arg7[%c2_227, %c0_228, %c0_229] : memref<9x32x32xf32, #tpu.memory_space<vmem>>, vector<1x32x32xf32>
    %285 = vector.shape_cast %284 : vector<1x32x32xf32> to vector<32x32xf32>
    %cst_230 = arith.constant dense<0.000000e+00> : vector<32x256xf32>
    %286 = tpu.matmul %285, %283, %cst_230 {dimension_numbers = #tpu.dot_dimension_numbers<[1], [0], [0], [1], [0, 0, 1, 1], [], []>} : vector<32x32xf32>, vector<32x256xf32>, vector<32x256xf32> -> vector<32x256xf32>
    %287 = arith.addf %279, %286 : vector<32x256xf32>
    %c1_i32_231 = arith.constant 1 : i32
    %288 = tpu.dynamic_rotate %264 by %c1_i32_231 dim 1 : vector<32x256xf32>, i32 -> vector<32x256xf32>
    %c3_232 = arith.constant 3 : index
    %c0_233 = arith.constant 0 : index
    %c0_234 = arith.constant 0 : index
    %289 = vector.load %arg3[%c3_232, %c0_233, %c0_234] : memref<9x32x256xf32, #tpu.memory_space<vmem>>, vector<1x32x256xf32>
    %290 = vector.shape_cast %289 : vector<1x32x256xf32> to vector<32x256xf32>
    %291 = arith.mulf %288, %290 : vector<32x256xf32>
    %c3_235 = arith.constant 3 : index
    %c0_236 = arith.constant 0 : index
    %c0_237 = arith.constant 0 : index
    %292 = vector.load %arg7[%c3_235, %c0_236, %c0_237] : memref<9x32x32xf32, #tpu.memory_space<vmem>>, vector<1x32x32xf32>
    %293 = vector.shape_cast %292 : vector<1x32x32xf32> to vector<32x32xf32>
    %cst_238 = arith.constant dense<0.000000e+00> : vector<32x256xf32>
    %294 = tpu.matmul %293, %291, %cst_238 {dimension_numbers = #tpu.dot_dimension_numbers<[1], [0], [0], [1], [0, 0, 1, 1], [], []>} : vector<32x32xf32>, vector<32x256xf32>, vector<32x256xf32> -> vector<32x256xf32>
    %295 = arith.addf %287, %294 : vector<32x256xf32>
    %c4_239 = arith.constant 4 : index
    %c0_240 = arith.constant 0 : index
    %c0_241 = arith.constant 0 : index
    %296 = vector.load %arg7[%c4_239, %c0_240, %c0_241] : memref<9x32x32xf32, #tpu.memory_space<vmem>>, vector<1x32x32xf32>
    %297 = vector.shape_cast %296 : vector<1x32x32xf32> to vector<32x32xf32>
    %cst_242 = arith.constant dense<0.000000e+00> : vector<32x256xf32>
    %298 = tpu.matmul %297, %264, %cst_242 {dimension_numbers = #tpu.dot_dimension_numbers<[1], [0], [0], [1], [0, 0, 1, 1], [], []>} : vector<32x32xf32>, vector<32x256xf32>, vector<32x256xf32> -> vector<32x256xf32>
    %299 = arith.addf %295, %298 : vector<32x256xf32>
    %c255_i32_243 = arith.constant 255 : i32
    %300 = tpu.dynamic_rotate %264 by %c255_i32_243 dim 1 : vector<32x256xf32>, i32 -> vector<32x256xf32>
    %c5_244 = arith.constant 5 : index
    %c0_245 = arith.constant 0 : index
    %c0_246 = arith.constant 0 : index
    %301 = vector.load %arg3[%c5_244, %c0_245, %c0_246] : memref<9x32x256xf32, #tpu.memory_space<vmem>>, vector<1x32x256xf32>
    %302 = vector.shape_cast %301 : vector<1x32x256xf32> to vector<32x256xf32>
    %303 = arith.mulf %300, %302 : vector<32x256xf32>
    %c5_247 = arith.constant 5 : index
    %c0_248 = arith.constant 0 : index
    %c0_249 = arith.constant 0 : index
    %304 = vector.load %arg7[%c5_247, %c0_248, %c0_249] : memref<9x32x32xf32, #tpu.memory_space<vmem>>, vector<1x32x32xf32>
    %305 = vector.shape_cast %304 : vector<1x32x32xf32> to vector<32x32xf32>
    %cst_250 = arith.constant dense<0.000000e+00> : vector<32x256xf32>
    %306 = tpu.matmul %305, %303, %cst_250 {dimension_numbers = #tpu.dot_dimension_numbers<[1], [0], [0], [1], [0, 0, 1, 1], [], []>} : vector<32x32xf32>, vector<32x256xf32>, vector<32x256xf32> -> vector<32x256xf32>
    %307 = arith.addf %299, %306 : vector<32x256xf32>
    %c241_i32_251 = arith.constant 241 : i32
    %308 = tpu.dynamic_rotate %264 by %c241_i32_251 dim 1 : vector<32x256xf32>, i32 -> vector<32x256xf32>
    %c6_252 = arith.constant 6 : index
    %c0_253 = arith.constant 0 : index
    %c0_254 = arith.constant 0 : index
    %309 = vector.load %arg3[%c6_252, %c0_253, %c0_254] : memref<9x32x256xf32, #tpu.memory_space<vmem>>, vector<1x32x256xf32>
    %310 = vector.shape_cast %309 : vector<1x32x256xf32> to vector<32x256xf32>
    %311 = arith.mulf %308, %310 : vector<32x256xf32>
    %c6_255 = arith.constant 6 : index
    %c0_256 = arith.constant 0 : index
    %c0_257 = arith.constant 0 : index
    %312 = vector.load %arg7[%c6_255, %c0_256, %c0_257] : memref<9x32x32xf32, #tpu.memory_space<vmem>>, vector<1x32x32xf32>
    %313 = vector.shape_cast %312 : vector<1x32x32xf32> to vector<32x32xf32>
    %cst_258 = arith.constant dense<0.000000e+00> : vector<32x256xf32>
    %314 = tpu.matmul %313, %311, %cst_258 {dimension_numbers = #tpu.dot_dimension_numbers<[1], [0], [0], [1], [0, 0, 1, 1], [], []>} : vector<32x32xf32>, vector<32x256xf32>, vector<32x256xf32> -> vector<32x256xf32>
    %315 = arith.addf %307, %314 : vector<32x256xf32>
    %c240_i32_259 = arith.constant 240 : i32
    %316 = tpu.dynamic_rotate %264 by %c240_i32_259 dim 1 : vector<32x256xf32>, i32 -> vector<32x256xf32>
    %c7_260 = arith.constant 7 : index
    %c0_261 = arith.constant 0 : index
    %c0_262 = arith.constant 0 : index
    %317 = vector.load %arg3[%c7_260, %c0_261, %c0_262] : memref<9x32x256xf32, #tpu.memory_space<vmem>>, vector<1x32x256xf32>
    %318 = vector.shape_cast %317 : vector<1x32x256xf32> to vector<32x256xf32>
    %319 = arith.mulf %316, %318 : vector<32x256xf32>
    %c7_263 = arith.constant 7 : index
    %c0_264 = arith.constant 0 : index
    %c0_265 = arith.constant 0 : index
    %320 = vector.load %arg7[%c7_263, %c0_264, %c0_265] : memref<9x32x32xf32, #tpu.memory_space<vmem>>, vector<1x32x32xf32>
    %321 = vector.shape_cast %320 : vector<1x32x32xf32> to vector<32x32xf32>
    %cst_266 = arith.constant dense<0.000000e+00> : vector<32x256xf32>
    %322 = tpu.matmul %321, %319, %cst_266 {dimension_numbers = #tpu.dot_dimension_numbers<[1], [0], [0], [1], [0, 0, 1, 1], [], []>} : vector<32x32xf32>, vector<32x256xf32>, vector<32x256xf32> -> vector<32x256xf32>
    %323 = arith.addf %315, %322 : vector<32x256xf32>
    %c239_i32_267 = arith.constant 239 : i32
    %324 = tpu.dynamic_rotate %264 by %c239_i32_267 dim 1 : vector<32x256xf32>, i32 -> vector<32x256xf32>
    %c8_268 = arith.constant 8 : index
    %c0_269 = arith.constant 0 : index
    %c0_270 = arith.constant 0 : index
    %325 = vector.load %arg3[%c8_268, %c0_269, %c0_270] : memref<9x32x256xf32, #tpu.memory_space<vmem>>, vector<1x32x256xf32>
    %326 = vector.shape_cast %325 : vector<1x32x256xf32> to vector<32x256xf32>
    %327 = arith.mulf %324, %326 : vector<32x256xf32>
    %c8_271 = arith.constant 8 : index
    %c0_272 = arith.constant 0 : index
    %c0_273 = arith.constant 0 : index
    %328 = vector.load %arg7[%c8_271, %c0_272, %c0_273] : memref<9x32x32xf32, #tpu.memory_space<vmem>>, vector<1x32x32xf32>
    %329 = vector.shape_cast %328 : vector<1x32x32xf32> to vector<32x32xf32>
    %cst_274 = arith.constant dense<0.000000e+00> : vector<32x256xf32>
    %330 = tpu.matmul %329, %327, %cst_274 {dimension_numbers = #tpu.dot_dimension_numbers<[1], [0], [0], [1], [0, 0, 1, 1], [], []>} : vector<32x32xf32>, vector<32x256xf32>, vector<32x256xf32> -> vector<32x256xf32>
    %331 = arith.addf %323, %330 : vector<32x256xf32>
    %cst_275 = arith.constant dense<0.000000e+00> : vector<32xf32>
    %332 = vector.multi_reduction <add>, %331, %cst_275 [1] : vector<32x256xf32> to vector<32xf32>
    %333 = vector.shape_cast %332 : vector<32xf32> to vector<32x1xf32>
    %cst_276 = arith.constant 3.906250e-03 : f32
    %334 = vector.broadcast %cst_276 : f32 to vector<32x1xf32>
    %335 = arith.mulf %333, %334 : vector<32x1xf32>
    %336 = arith.mulf %331, %331 : vector<32x256xf32>
    %cst_277 = arith.constant dense<0.000000e+00> : vector<32xf32>
    %337 = vector.multi_reduction <add>, %336, %cst_277 [1] : vector<32x256xf32> to vector<32xf32>
    %338 = vector.shape_cast %337 : vector<32xf32> to vector<32x1xf32>
    %cst_278 = arith.constant 3.906250e-03 : f32
    %339 = vector.broadcast %cst_278 : f32 to vector<32x1xf32>
    %340 = arith.mulf %338, %339 : vector<32x1xf32>
    %341 = arith.mulf %335, %335 : vector<32x1xf32>
    %342 = arith.subf %340, %341 : vector<32x1xf32>
    %343 = vector.broadcast %335 : vector<32x1xf32> to vector<32x256xf32>
    %344 = arith.subf %331, %343 : vector<32x256xf32>
    %cst_279 = arith.constant 9.99999974E-6 : f32
    %345 = vector.broadcast %cst_279 : f32 to vector<32x1xf32>
    %346 = arith.addf %342, %345 : vector<32x1xf32>
    %347 = math.rsqrt %346 : vector<32x1xf32>
    %348 = vector.broadcast %347 : vector<32x1xf32> to vector<32x256xf32>
    %349 = arith.mulf %344, %348 : vector<32x256xf32>
    %cst_280 = arith.constant 0.000000e+00 : f32
    %350 = vector.broadcast %cst_280 : f32 to vector<32x256xf32>
    %351 = arith.maximumf %349, %350 : vector<32x256xf32>
    %c17_i32_281 = arith.constant 17 : i32
    %352 = tpu.dynamic_rotate %351 by %c17_i32_281 dim 1 : vector<32x256xf32>, i32 -> vector<32x256xf32>
    %c0_282 = arith.constant 0 : index
    %c0_283 = arith.constant 0 : index
    %c0_284 = arith.constant 0 : index
    %353 = vector.load %arg3[%c0_282, %c0_283, %c0_284] : memref<9x32x256xf32, #tpu.memory_space<vmem>>, vector<1x32x256xf32>
    %354 = vector.shape_cast %353 : vector<1x32x256xf32> to vector<32x256xf32>
    %355 = arith.mulf %352, %354 : vector<32x256xf32>
    %c0_285 = arith.constant 0 : index
    %c0_286 = arith.constant 0 : index
    %c0_287 = arith.constant 0 : index
    %356 = vector.load %arg8[%c0_285, %c0_286, %c0_287] : memref<9x32x32xf32, #tpu.memory_space<vmem>>, vector<1x32x32xf32>
    %357 = vector.shape_cast %356 : vector<1x32x32xf32> to vector<32x32xf32>
    %cst_288 = arith.constant dense<0.000000e+00> : vector<32x256xf32>
    %358 = tpu.matmul %357, %355, %cst_288 {dimension_numbers = #tpu.dot_dimension_numbers<[1], [0], [0], [1], [0, 0, 1, 1], [], []>} : vector<32x32xf32>, vector<32x256xf32>, vector<32x256xf32> -> vector<32x256xf32>
    %c16_i32_289 = arith.constant 16 : i32
    %359 = tpu.dynamic_rotate %351 by %c16_i32_289 dim 1 : vector<32x256xf32>, i32 -> vector<32x256xf32>
    %c1_290 = arith.constant 1 : index
    %c0_291 = arith.constant 0 : index
    %c0_292 = arith.constant 0 : index
    %360 = vector.load %arg3[%c1_290, %c0_291, %c0_292] : memref<9x32x256xf32, #tpu.memory_space<vmem>>, vector<1x32x256xf32>
    %361 = vector.shape_cast %360 : vector<1x32x256xf32> to vector<32x256xf32>
    %362 = arith.mulf %359, %361 : vector<32x256xf32>
    %c1_293 = arith.constant 1 : index
    %c0_294 = arith.constant 0 : index
    %c0_295 = arith.constant 0 : index
    %363 = vector.load %arg8[%c1_293, %c0_294, %c0_295] : memref<9x32x32xf32, #tpu.memory_space<vmem>>, vector<1x32x32xf32>
    %364 = vector.shape_cast %363 : vector<1x32x32xf32> to vector<32x32xf32>
    %cst_296 = arith.constant dense<0.000000e+00> : vector<32x256xf32>
    %365 = tpu.matmul %364, %362, %cst_296 {dimension_numbers = #tpu.dot_dimension_numbers<[1], [0], [0], [1], [0, 0, 1, 1], [], []>} : vector<32x32xf32>, vector<32x256xf32>, vector<32x256xf32> -> vector<32x256xf32>
    %366 = arith.addf %358, %365 : vector<32x256xf32>
    %c15_i32_297 = arith.constant 15 : i32
    %367 = tpu.dynamic_rotate %351 by %c15_i32_297 dim 1 : vector<32x256xf32>, i32 -> vector<32x256xf32>
    %c2_298 = arith.constant 2 : index
    %c0_299 = arith.constant 0 : index
    %c0_300 = arith.constant 0 : index
    %368 = vector.load %arg3[%c2_298, %c0_299, %c0_300] : memref<9x32x256xf32, #tpu.memory_space<vmem>>, vector<1x32x256xf32>
    %369 = vector.shape_cast %368 : vector<1x32x256xf32> to vector<32x256xf32>
    %370 = arith.mulf %367, %369 : vector<32x256xf32>
    %c2_301 = arith.constant 2 : index
    %c0_302 = arith.constant 0 : index
    %c0_303 = arith.constant 0 : index
    %371 = vector.load %arg8[%c2_301, %c0_302, %c0_303] : memref<9x32x32xf32, #tpu.memory_space<vmem>>, vector<1x32x32xf32>
    %372 = vector.shape_cast %371 : vector<1x32x32xf32> to vector<32x32xf32>
    %cst_304 = arith.constant dense<0.000000e+00> : vector<32x256xf32>
    %373 = tpu.matmul %372, %370, %cst_304 {dimension_numbers = #tpu.dot_dimension_numbers<[1], [0], [0], [1], [0, 0, 1, 1], [], []>} : vector<32x32xf32>, vector<32x256xf32>, vector<32x256xf32> -> vector<32x256xf32>
    %374 = arith.addf %366, %373 : vector<32x256xf32>
    %c1_i32_305 = arith.constant 1 : i32
    %375 = tpu.dynamic_rotate %351 by %c1_i32_305 dim 1 : vector<32x256xf32>, i32 -> vector<32x256xf32>
    %c3_306 = arith.constant 3 : index
    %c0_307 = arith.constant 0 : index
    %c0_308 = arith.constant 0 : index
    %376 = vector.load %arg3[%c3_306, %c0_307, %c0_308] : memref<9x32x256xf32, #tpu.memory_space<vmem>>, vector<1x32x256xf32>
    %377 = vector.shape_cast %376 : vector<1x32x256xf32> to vector<32x256xf32>
    %378 = arith.mulf %375, %377 : vector<32x256xf32>
    %c3_309 = arith.constant 3 : index
    %c0_310 = arith.constant 0 : index
    %c0_311 = arith.constant 0 : index
    %379 = vector.load %arg8[%c3_309, %c0_310, %c0_311] : memref<9x32x32xf32, #tpu.memory_space<vmem>>, vector<1x32x32xf32>
    %380 = vector.shape_cast %379 : vector<1x32x32xf32> to vector<32x32xf32>
    %cst_312 = arith.constant dense<0.000000e+00> : vector<32x256xf32>
    %381 = tpu.matmul %380, %378, %cst_312 {dimension_numbers = #tpu.dot_dimension_numbers<[1], [0], [0], [1], [0, 0, 1, 1], [], []>} : vector<32x32xf32>, vector<32x256xf32>, vector<32x256xf32> -> vector<32x256xf32>
    %382 = arith.addf %374, %381 : vector<32x256xf32>
    %c4_313 = arith.constant 4 : index
    %c0_314 = arith.constant 0 : index
    %c0_315 = arith.constant 0 : index
    %383 = vector.load %arg8[%c4_313, %c0_314, %c0_315] : memref<9x32x32xf32, #tpu.memory_space<vmem>>, vector<1x32x32xf32>
    %384 = vector.shape_cast %383 : vector<1x32x32xf32> to vector<32x32xf32>
    %cst_316 = arith.constant dense<0.000000e+00> : vector<32x256xf32>
    %385 = tpu.matmul %384, %351, %cst_316 {dimension_numbers = #tpu.dot_dimension_numbers<[1], [0], [0], [1], [0, 0, 1, 1], [], []>} : vector<32x32xf32>, vector<32x256xf32>, vector<32x256xf32> -> vector<32x256xf32>
    %386 = arith.addf %382, %385 : vector<32x256xf32>
    %c255_i32_317 = arith.constant 255 : i32
    %387 = tpu.dynamic_rotate %351 by %c255_i32_317 dim 1 : vector<32x256xf32>, i32 -> vector<32x256xf32>
    %c5_318 = arith.constant 5 : index
    %c0_319 = arith.constant 0 : index
    %c0_320 = arith.constant 0 : index
    %388 = vector.load %arg3[%c5_318, %c0_319, %c0_320] : memref<9x32x256xf32, #tpu.memory_space<vmem>>, vector<1x32x256xf32>
    %389 = vector.shape_cast %388 : vector<1x32x256xf32> to vector<32x256xf32>
    %390 = arith.mulf %387, %389 : vector<32x256xf32>
    %c5_321 = arith.constant 5 : index
    %c0_322 = arith.constant 0 : index
    %c0_323 = arith.constant 0 : index
    %391 = vector.load %arg8[%c5_321, %c0_322, %c0_323] : memref<9x32x32xf32, #tpu.memory_space<vmem>>, vector<1x32x32xf32>
    %392 = vector.shape_cast %391 : vector<1x32x32xf32> to vector<32x32xf32>
    %cst_324 = arith.constant dense<0.000000e+00> : vector<32x256xf32>
    %393 = tpu.matmul %392, %390, %cst_324 {dimension_numbers = #tpu.dot_dimension_numbers<[1], [0], [0], [1], [0, 0, 1, 1], [], []>} : vector<32x32xf32>, vector<32x256xf32>, vector<32x256xf32> -> vector<32x256xf32>
    %394 = arith.addf %386, %393 : vector<32x256xf32>
    %c241_i32_325 = arith.constant 241 : i32
    %395 = tpu.dynamic_rotate %351 by %c241_i32_325 dim 1 : vector<32x256xf32>, i32 -> vector<32x256xf32>
    %c6_326 = arith.constant 6 : index
    %c0_327 = arith.constant 0 : index
    %c0_328 = arith.constant 0 : index
    %396 = vector.load %arg3[%c6_326, %c0_327, %c0_328] : memref<9x32x256xf32, #tpu.memory_space<vmem>>, vector<1x32x256xf32>
    %397 = vector.shape_cast %396 : vector<1x32x256xf32> to vector<32x256xf32>
    %398 = arith.mulf %395, %397 : vector<32x256xf32>
    %c6_329 = arith.constant 6 : index
    %c0_330 = arith.constant 0 : index
    %c0_331 = arith.constant 0 : index
    %399 = vector.load %arg8[%c6_329, %c0_330, %c0_331] : memref<9x32x32xf32, #tpu.memory_space<vmem>>, vector<1x32x32xf32>
    %400 = vector.shape_cast %399 : vector<1x32x32xf32> to vector<32x32xf32>
    %cst_332 = arith.constant dense<0.000000e+00> : vector<32x256xf32>
    %401 = tpu.matmul %400, %398, %cst_332 {dimension_numbers = #tpu.dot_dimension_numbers<[1], [0], [0], [1], [0, 0, 1, 1], [], []>} : vector<32x32xf32>, vector<32x256xf32>, vector<32x256xf32> -> vector<32x256xf32>
    %402 = arith.addf %394, %401 : vector<32x256xf32>
    %c240_i32_333 = arith.constant 240 : i32
    %403 = tpu.dynamic_rotate %351 by %c240_i32_333 dim 1 : vector<32x256xf32>, i32 -> vector<32x256xf32>
    %c7_334 = arith.constant 7 : index
    %c0_335 = arith.constant 0 : index
    %c0_336 = arith.constant 0 : index
    %404 = vector.load %arg3[%c7_334, %c0_335, %c0_336] : memref<9x32x256xf32, #tpu.memory_space<vmem>>, vector<1x32x256xf32>
    %405 = vector.shape_cast %404 : vector<1x32x256xf32> to vector<32x256xf32>
    %406 = arith.mulf %403, %405 : vector<32x256xf32>
    %c7_337 = arith.constant 7 : index
    %c0_338 = arith.constant 0 : index
    %c0_339 = arith.constant 0 : index
    %407 = vector.load %arg8[%c7_337, %c0_338, %c0_339] : memref<9x32x32xf32, #tpu.memory_space<vmem>>, vector<1x32x32xf32>
    %408 = vector.shape_cast %407 : vector<1x32x32xf32> to vector<32x32xf32>
    %cst_340 = arith.constant dense<0.000000e+00> : vector<32x256xf32>
    %409 = tpu.matmul %408, %406, %cst_340 {dimension_numbers = #tpu.dot_dimension_numbers<[1], [0], [0], [1], [0, 0, 1, 1], [], []>} : vector<32x32xf32>, vector<32x256xf32>, vector<32x256xf32> -> vector<32x256xf32>
    %410 = arith.addf %402, %409 : vector<32x256xf32>
    %c239_i32_341 = arith.constant 239 : i32
    %411 = tpu.dynamic_rotate %351 by %c239_i32_341 dim 1 : vector<32x256xf32>, i32 -> vector<32x256xf32>
    %c8_342 = arith.constant 8 : index
    %c0_343 = arith.constant 0 : index
    %c0_344 = arith.constant 0 : index
    %412 = vector.load %arg3[%c8_342, %c0_343, %c0_344] : memref<9x32x256xf32, #tpu.memory_space<vmem>>, vector<1x32x256xf32>
    %413 = vector.shape_cast %412 : vector<1x32x256xf32> to vector<32x256xf32>
    %414 = arith.mulf %411, %413 : vector<32x256xf32>
    %c8_345 = arith.constant 8 : index
    %c0_346 = arith.constant 0 : index
    %c0_347 = arith.constant 0 : index
    %415 = vector.load %arg8[%c8_345, %c0_346, %c0_347] : memref<9x32x32xf32, #tpu.memory_space<vmem>>, vector<1x32x32xf32>
    %416 = vector.shape_cast %415 : vector<1x32x32xf32> to vector<32x32xf32>
    %cst_348 = arith.constant dense<0.000000e+00> : vector<32x256xf32>
    %417 = tpu.matmul %416, %414, %cst_348 {dimension_numbers = #tpu.dot_dimension_numbers<[1], [0], [0], [1], [0, 0, 1, 1], [], []>} : vector<32x32xf32>, vector<32x256xf32>, vector<32x256xf32> -> vector<32x256xf32>
    %418 = arith.addf %410, %417 : vector<32x256xf32>
    %cst_349 = arith.constant dense<0.000000e+00> : vector<32xf32>
    %419 = vector.multi_reduction <add>, %418, %cst_349 [1] : vector<32x256xf32> to vector<32xf32>
    %420 = vector.shape_cast %419 : vector<32xf32> to vector<32x1xf32>
    %cst_350 = arith.constant 3.906250e-03 : f32
    %421 = vector.broadcast %cst_350 : f32 to vector<32x1xf32>
    %422 = arith.mulf %420, %421 : vector<32x1xf32>
    %423 = arith.mulf %418, %418 : vector<32x256xf32>
    %cst_351 = arith.constant dense<0.000000e+00> : vector<32xf32>
    %424 = vector.multi_reduction <add>, %423, %cst_351 [1] : vector<32x256xf32> to vector<32xf32>
    %425 = vector.shape_cast %424 : vector<32xf32> to vector<32x1xf32>
    %cst_352 = arith.constant 3.906250e-03 : f32
    %426 = vector.broadcast %cst_352 : f32 to vector<32x1xf32>
    %427 = arith.mulf %425, %426 : vector<32x1xf32>
    %428 = arith.mulf %422, %422 : vector<32x1xf32>
    %429 = arith.subf %427, %428 : vector<32x1xf32>
    %430 = vector.broadcast %422 : vector<32x1xf32> to vector<32x256xf32>
    %431 = arith.subf %418, %430 : vector<32x256xf32>
    %cst_353 = arith.constant 9.99999974E-6 : f32
    %432 = vector.broadcast %cst_353 : f32 to vector<32x1xf32>
    %433 = arith.addf %429, %432 : vector<32x1xf32>
    %434 = math.rsqrt %433 : vector<32x1xf32>
    %435 = vector.broadcast %434 : vector<32x1xf32> to vector<32x256xf32>
    %436 = arith.mulf %431, %435 : vector<32x256xf32>
    %437 = arith.addf %264, %436 : vector<32x256xf32>
    %c0_354 = arith.constant 0 : index
    %c0_355 = arith.constant 0 : index
    %438 = vector.load %arg9[%c0_354, %c0_355] : memref<4x32xf32, #tpu.memory_space<vmem>>, vector<4x32xf32>
    %cst_356 = arith.constant dense<0.000000e+00> : vector<4x256xf32>
    %439 = tpu.matmul %438, %437, %cst_356 {dimension_numbers = #tpu.dot_dimension_numbers<[1], [0], [0], [1], [0, 0, 1, 1], [], []>} : vector<4x32xf32>, vector<32x256xf32>, vector<4x256xf32> -> vector<4x256xf32>
    %440 = tpu.iota {dimensions = array<i32: 0>} : vector<4x256xi32>
    %441 = arith.sitofp %440 : vector<4x256xi32> to vector<4x256xf32>
    %cst_357 = arith.constant dense<0xFF800000> : vector<256xf32>
    %442 = vector.multi_reduction <maximumf>, %439, %cst_357 [0] : vector<4x256xf32> to vector<256xf32>
    %443 = vector.shape_cast %442 : vector<256xf32> to vector<1x256xf32>
    %444 = vector.broadcast %443 : vector<1x256xf32> to vector<4x256xf32>
    %445 = arith.cmpf oge, %439, %444 : vector<4x256xf32>
    %cst_358 = arith.constant 4.000000e+00 : f32
    %446 = vector.broadcast %cst_358 : f32 to vector<4x256xf32>
    %447 = arith.select %445, %441, %446 : vector<4x256xi1>, vector<4x256xf32>
    %cst_359 = arith.constant dense<0x7F800000> : vector<256xf32>
    %448 = vector.multi_reduction <minimumf>, %447, %cst_359 [0] : vector<4x256xf32> to vector<256xf32>
    %449 = vector.shape_cast %448 : vector<256xf32> to vector<1x256xf32>
    %450 = vector.broadcast %449 : vector<1x256xf32> to vector<4x256xf32>
    %451 = arith.cmpf oeq, %441, %450 : vector<4x256xf32>
    %452 = arith.extui %451 : vector<4x256xi1> to vector<4x256xi32>
    %453 = arith.sitofp %452 : vector<4x256xi32> to vector<4x256xf32>
    %c0_360 = arith.constant 0 : index
    %c0_361 = arith.constant 0 : index
    %c0_362 = arith.constant 0 : index
    %454 = vector.load %arg10[%c0_360, %c0_361, %c0_362] : memref<1x4x256xf32, #tpu.memory_space<vmem>>, vector<1x4x256xf32>
    %455 = vector.shape_cast %454 : vector<1x4x256xf32> to vector<4x256xf32>
    %456 = vector.shape_cast %439 : vector<4x256xf32> to vector<1x4x256xf32>
    tpu.vector_store %arg10[%c0_360, %c0_361, %c0_362], %456 {strides = array<i32>} : memref<1x4x256xf32, #tpu.memory_space<vmem>>, vector<1x4x256xf32>,
    %c0_363 = arith.constant 0 : index
    %c0_364 = arith.constant 0 : index
    %c0_365 = arith.constant 0 : index
    %457 = vector.load %arg11[%c0_363, %c0_364, %c0_365] : memref<1x4x256xf32, #tpu.memory_space<vmem>>, vector<1x4x256xf32>
    %458 = vector.shape_cast %457 : vector<1x4x256xf32> to vector<4x256xf32>
    %459 = vector.shape_cast %453 : vector<4x256xf32> to vector<1x4x256xf32>
    tpu.vector_store %arg11[%c0_363, %c0_364, %c0_365], %459 {strides = array<i32>} : memref<1x4x256xf32, #tpu.memory_space<vmem>>, vector<1x4x256xf32>,
    return
  }
  func.func @transform_0(%arg0: i32) -> (i32, i32, i32) {
    %c0_i32 = arith.constant 0 : i32
    %c0_i32_0 = arith.constant 0 : i32
    %c0_i32_1 = arith.constant 0 : i32
    return %arg0, %c0_i32, %c0_i32_0 : i32, i32, i32
  }
  func.func @transform_1(%arg0: i32) -> (i32, i32, i32) {
    %c0_i32 = arith.constant 0 : i32
    %c0_i32_0 = arith.constant 0 : i32
    %c0_i32_1 = arith.constant 0 : i32
    %c0_i32_2 = arith.constant 0 : i32
    return %c0_i32, %c0_i32_0, %c0_i32_1 : i32, i32, i32
  }
  func.func @transform_2(%arg0: i32) -> (i32, i32, i32) {
    %c0_i32 = arith.constant 0 : i32
    %c0_i32_0 = arith.constant 0 : i32
    %c0_i32_1 = arith.constant 0 : i32
    %c0_i32_2 = arith.constant 0 : i32
    return %c0_i32, %c0_i32_0, %c0_i32_1 : i32, i32, i32
  }
  func.func @transform_3(%arg0: i32) -> (i32, i32, i32) {
    %c0_i32 = arith.constant 0 : i32
    %c0_i32_0 = arith.constant 0 : i32
    %c0_i32_1 = arith.constant 0 : i32
    %c0_i32_2 = arith.constant 0 : i32
    return %c0_i32, %c0_i32_0, %c0_i32_1 : i32, i32, i32
  }
  func.func @transform_4(%arg0: i32) -> (i32, i32, i32) {
    %c0_i32 = arith.constant 0 : i32
    %c0_i32_0 = arith.constant 0 : i32
    %c0_i32_1 = arith.constant 0 : i32
    %c0_i32_2 = arith.constant 0 : i32
    return %c0_i32, %c0_i32_0, %c0_i32_1 : i32, i32, i32
  }
  func.func @transform_5(%arg0: i32) -> (i32, i32, i32) {
    %c0_i32 = arith.constant 0 : i32
    %c0_i32_0 = arith.constant 0 : i32
    %c0_i32_1 = arith.constant 0 : i32
    %c0_i32_2 = arith.constant 0 : i32
    return %c0_i32, %c0_i32_0, %c0_i32_1 : i32, i32, i32
  }
  func.func @transform_6(%arg0: i32) -> (i32, i32, i32) {
    %c0_i32 = arith.constant 0 : i32
    %c0_i32_0 = arith.constant 0 : i32
    %c0_i32_1 = arith.constant 0 : i32
    %c0_i32_2 = arith.constant 0 : i32
    return %c0_i32, %c0_i32_0, %c0_i32_1 : i32, i32, i32
  }
  func.func @transform_7(%arg0: i32) -> (i32, i32, i32) {
    %c0_i32 = arith.constant 0 : i32
    %c0_i32_0 = arith.constant 0 : i32
    %c0_i32_1 = arith.constant 0 : i32
    %c0_i32_2 = arith.constant 0 : i32
    return %c0_i32, %c0_i32_0, %c0_i32_1 : i32, i32, i32
  }
  func.func @transform_8(%arg0: i32) -> (i32, i32) {
    %c0_i32 = arith.constant 0 : i32
    %c0_i32_0 = arith.constant 0 : i32
    %c0_i32_1 = arith.constant 0 : i32
    return %c0_i32, %c0_i32_0 : i32, i32
  }
  func.func @transform_9(%arg0: i32) -> (i32, i32, i32) {
    %c0_i32 = arith.constant 0 : i32
    %c0_i32_0 = arith.constant 0 : i32
    %c0_i32_1 = arith.constant 0 : i32
    return %arg0, %c0_i32, %c0_i32_0 : i32, i32, i32
  }
  func.func @transform_10(%arg0: i32) -> (i32, i32, i32) {
    %c0_i32 = arith.constant 0 : i32
    %c0_i32_0 = arith.constant 0 : i32
    %c0_i32_1 = arith.constant 0 : i32
    return %arg0, %c0_i32, %c0_i32_0 : i32, i32, i32
  }
}

</mosaic_0001>

<bundles_post_ra>
// kernel: seg_branch_forward.1
= control target key start
LH: loop header
LB: loop body
LE: loop exit
PB: predicated region body
PF: predicated region fallthrough
CT: control target
= control target key end

     0   :  { %16 = vsyncpa [#allocation3], 0  ;;  %s11706_s0 = inlined_call_operand.vmem [shape: f32[2,8,256], index: 0, kind: input, shape index: {}]   ;;  %s11707_s1 = inlined_call_operand.hbm [shape: f32[9,8,256], index: 1, kind: input, shape index: {}]   ;;  %s11708_s2 = inlined_call_operand.vmem [shape: f32[9,32,256], index: 2, kind: input, shape index: {}]   ;;  %s11709_s3 = inlined_call_operand.vmem [shape: f32[9,32,8], index: 3, kind: input, shape index: {}]   ;;  %s11710_s4 = inlined_call_operand.hbm [shape: f32[9,32,32], index: 4, kind: input, shape index: {}]   ;;  %s11711_s5 = inlined_call_operand.hbm [shape: f32[9,32,32], index: 5, kind: input, shape index: {}]   ;;  %s11712_s6 = inlined_call_operand.hbm [shape: f32[9,32,32], index: 6, kind: input, shape index: {}]   ;;  %s11713_s7 = inlined_call_operand.hbm [shape: f32[9,32,32], index: 7, kind: input, shape index: {}]   ;;  %s11714_s8 = inlined_call_operand.vmem [shape: f32[4,32], index: 8, kind: input, shape index: {}]   ;;  %s11715_s9 = inlined_call_operand.vmem [shape: f32[2,4,256], index: 9, kind: output, shape index: {0}]   ;;  %s11716_s10 = inlined_call_operand.vmem [shape: f32[2,4,256], index: 10, kind: output, shape index: {1}]  }
   0x1   :  { %17 = vsyncpa [#allocation5], 0 }
   0x2   :  { %18 = vsyncpa [#allocation8], 0  ;;  %s8820_s13 = smov 0  }
   0x3 LB: > { %s8747_s14 = smov [#allocation4]   ;;  %s8826_s16 = sadd.s32 4294967295, %s8745_s13   ;;  %s8745_s13 = sphi %s8820_s13, %s24_s13  }
   0x4   : > { %s306_s15 = sshll.u32 %s8747_s14, 4  ;;  %p7370_p0 = scmp.ge.s32.totalorder %s8745_s13, 1  ;;  %s8831_s15 = int_to_ptr.vmem [resolvable:$true] %s306_s15 }
   0x5   : > { %p275_p1 = scmp.lt.s32.totalorder %s8745_s13, 3  ;;  %p11719_p2 = scmp.eq.s32.totalorder %s8826_s16, 0 }
   0x6   : > { %s8748_s18 = smov [#allocation7]   ;;  %s8749_s21 = smov [#allocation2]  }
   0x7   : > { %p8833_p3 = pnand %p7370_p0, %p275_p1  ;;  %s332_s19 = sshll.u32 %s8748_s18, 4  ;;  %s8839_s19 = int_to_ptr.vmem [resolvable:$true] %s332_s19 }
   0x8   : > { %s287_s22 = sshll.u32 %s8749_s21, 4  ;;  %s8587_s25 = scalar_lea.hbm %s11710_s4, 4608  ;;  %s8847_s22 = int_to_ptr.vmem [resolvable:$true] %s287_s22 }
   0x9   : > { %s11721_s17 = scalar_select %p8833_p3, 1, 0 }
   0xa   : > { %p8303_p4 = pneg %p8833_p3  ;;  %p8588_p6 = scmp.ne.s32.totalorder %s11710_s4, %s8587_s25 }
   0xb   : > { %p8594_p10 = scmp.lt.u32.totalorder %s8587_s25, %s11710_s4 }
   0xc   : > { %p8843_p5 = pnand %p11719_p2, %p8303_p4 }
   0xe   : > { %p8857_p7 = pneg %p8843_p5 }
  0x10   : > { %p8590_p8 = pnand %p8857_p7, %p8588_p6 }
  0x12   : > { %p8591_p9 = pneg %p8590_p8 }
  0x14   : > { %p8596_p11 = pnand %p8594_p10, %p8591_p9 }
  0x16   : > { %8599 = shalt.err (!%p8596_p11)
}
  0x17   : > { %s8600_s11 = scalar_lea.vmem %s8831_s15, 4608  ;;  %p8608_p1 = scmp.lt.s32.totalorder %s8831_s15, %s8831_s15 }
  0x18   : > { %p8601_p12 = scmp.ne.s32.totalorder %s8831_s15, %s8600_s11  ;;  %p8609_p4 = scmp.lt.s32.totalorder %s8600_s11, %s8600_s11 }
  0x1a   : > { %p8603_p13 = pnand %p8601_p12, %p8857_p7  ;;  %p8610_p6 = por %p8609_p4, %p8608_p1 }
  0x1c   : > { %p8604_p0 = pneg %p8603_p13 }
  0x1e   : > { %p8611_p8 = pnand %p8610_p6, %p8604_p0 }
  0x20   : > { %8614 = shalt.err (!%p8611_p8)
}
  0x21   : > { %s11717_s12 = smov 128   ;;  %s8751_s14 = smov 8  }
  0x22   : > { %8309 = dma.hbm_to_vmem [thread:$0]  (!%p8843_p5), %s11710_s4, 4608, %s8831_s15, [#allocation5], %s11717_s12, %s11717_s12, %s8751_s14  }
  0x23   : > { %s8615_s25 = scalar_lea.hbm %s11712_s6, 4608 }
  0x24   : > { %p8616_p9 = scmp.ne.s32.totalorder %s11712_s6, %s8615_s25  ;;  %p8622_p12 = scmp.lt.u32.totalorder %s8615_s25, %s11712_s6 }
  0x26   : > { %p8618_p10 = pnand %p8616_p9, %p8857_p7 }
  0x28   : > { %p8619_p11 = pneg %p8618_p10 }
  0x2a   : > { %p8624_p13 = pnand %p8622_p12, %p8619_p11 }
  0x2c   : > { %8627 = shalt.err (!%p8624_p13)
}
  0x2d   : > { %s8628_s15 = scalar_lea.vmem %s8839_s19, 4608  ;;  %p8636_p6 = scmp.lt.s32.totalorder %s8839_s19, %s8839_s19 }
  0x2e   : > { %p8629_p0 = scmp.ne.s32.totalorder %s8839_s19, %s8628_s15  ;;  %p8637_p8 = scmp.lt.s32.totalorder %s8628_s15, %s8628_s15 }
  0x30   : > { %p8631_p1 = pnand %p8629_p0, %p8857_p7  ;;  %p8638_p9 = por %p8637_p8, %p8636_p6 }
  0x32   : > { %p8632_p4 = pneg %p8631_p1 }
  0x34   : > { %p8639_p10 = pnand %p8638_p9, %p8632_p4 }
  0x36   : > { %8642 = shalt.err (!%p8639_p10)
}
  0x37   : > { %8315 = dma.hbm_to_vmem [thread:$0]  (!%p8843_p5), %s11712_s6, 4608, %s8839_s19, [#allocation8], %s11717_s12, %s11717_s12, %s8751_s14  }
  0x38   : > { %s8643_s24 = scalar_lea.hbm %s11707_s1, 2304 }
  0x39   : > { %p8644_p11 = scmp.ne.s32.totalorder %s11707_s1, %s8643_s24  ;;  %p8650_p0 = scmp.lt.u32.totalorder %s8643_s24, %s11707_s1 }
  0x3b   : > { %p8646_p12 = pnand %p8644_p11, %p8857_p7 }
  0x3d   : > { %p8647_p13 = pneg %p8646_p12 }
  0x3f   : > { %p8652_p1 = pnand %p8650_p0, %p8647_p13 }
  0x41   : > { %8655 = shalt.err (!%p8652_p1)
}
  0x42   : > { %s8656_s19 = scalar_lea.vmem %s8847_s22, 2304  ;;  %p8664_p9 = scmp.lt.s32.totalorder %s8847_s22, %s8847_s22 }
  0x43   : > { %p8657_p4 = scmp.ne.s32.totalorder %s8847_s22, %s8656_s19  ;;  %p8665_p10 = scmp.lt.s32.totalorder %s8656_s19, %s8656_s19 }
  0x45   : > { %p8659_p6 = pnand %p8657_p4, %p8857_p7  ;;  %p8666_p11 = por %p8665_p10, %p8664_p9 }
  0x47   : > { %p8660_p8 = pneg %p8659_p6 }
  0x49   : > { %p8667_p12 = pnand %p8666_p11, %p8660_p8 }
  0x4b   : > { %8670 = shalt.err (!%p8667_p12)
}
  0x4c   : > { %s8752_s30 = smov 256   ;;  %s8753_s15 = smov 16  }
  0x4d   : > { %8306 = dma.hbm_to_vmem [thread:$0]  (!%p8843_p5), %s11707_s1, 2304, %s8847_s22, [#allocation3], %s8752_s30, %s8752_s30, %s8753_s15  }
  0x4e   : > { %s8754_s21 = smov [#allocation6]   ;;  %s8755_s24 = smov [#allocation9]  }
  0x4f   : > { %s319_s23 = sshll.u32 %s8754_s21, 4  ;;  %s345_s25 = sshll.u32 %s8755_s24, 4  ;;  %s320_s23 = int_to_ptr.vmem [resolvable:$true] %s319_s23  ;;  %s8930_s25 = int_to_ptr.vmem [resolvable:$true] %s345_s25 }
  0x50   : > { %s8671_s29 = scalar_lea.hbm %s11711_s5, 4608 }
  0x51   : > { %p8672_p13 = scmp.ne.s32.totalorder %s11711_s5, %s8671_s29  ;;  %p8678_p4 = scmp.lt.u32.totalorder %s8671_s29, %s11711_s5 }
  0x53   : > { %p8674_p0 = pnand %p8672_p13, %p8857_p7 }
  0x55   : > { %p8675_p1 = pneg %p8674_p0 }
  0x57   : > { %p8680_p6 = pnand %p8678_p4, %p8675_p1 }
  0x59   : > { %8683 = shalt.err (!%p8680_p6)
}
  0x5a   : > { %s8684_s30 = scalar_lea.vmem %s320_s23, 4608  ;;  %p8692_p11 = scmp.lt.s32.totalorder %s320_s23, %s320_s23 }
  0x5b   : > { %p8685_p8 = scmp.ne.s32.totalorder %s320_s23, %s8684_s30  ;;  %p8693_p12 = scmp.lt.s32.totalorder %s8684_s30, %s8684_s30 }
  0x5d   : > { %p8687_p9 = pnand %p8685_p8, %p8857_p7  ;;  %p8694_p2 = por %p8693_p12, %p8692_p11 }
  0x5f   : > { %p8688_p10 = pneg %p8687_p9 }
  0x61   : > { %p8695_p3 = pnand %p8694_p2, %p8688_p10 }
  0x63   : > { %8698 = shalt.err (!%p8695_p3)
}
  0x64   : > { %s11724_s12 = smov 128   ;;  %s8699_s26 = scalar_lea.hbm %s11713_s7, 4608 }
  0x65   : > { %8312 = dma.hbm_to_vmem [thread:$0]  (!%p8843_p5), %s11711_s5, 4608, %s320_s23, [#allocation5], %s11724_s12, %s11724_s12, %s8751_s14  }
  0x66   : > { %p8700_p13 = scmp.ne.s32.totalorder %s11713_s7, %s8699_s26  ;;  %p8706_p0 = scmp.lt.u32.totalorder %s8699_s26, %s11713_s7 }
  0x68   : > { %p8702_p2 = pnand %p8700_p13, %p8857_p7 }
  0x6a   : > { %p8703_p3 = pneg %p8702_p2 }
  0x6c   : > { %p8708_p1 = pnand %p8706_p0, %p8703_p3 }
  0x6e   : > { %8711 = shalt.err (!%p8708_p1)
}
  0x6f   : > { %s8712_s23 = scalar_lea.vmem %s8930_s25, 4608  ;;  %p8720_p9 = scmp.lt.s32.totalorder %s8930_s25, %s8930_s25 }
  0x70   : > { %p8713_p4 = scmp.ne.s32.totalorder %s8930_s25, %s8712_s23  ;;  %p8721_p10 = scmp.lt.s32.totalorder %s8712_s23, %s8712_s23 }
  0x72   : > { %p8715_p6 = pnand %p8713_p4, %p8857_p7  ;;  %p8722_p11 = por %p8721_p10, %p8720_p9 }
  0x74   : > { %p8716_p8 = pneg %p8715_p6 }
  0x76   : > { %p8723_p12 = pnand %p8722_p11, %p8716_p8 }
  0x78   : > { %8726 = shalt.err (!%p8723_p12)
}
  0x79   : > { %8318 = dma.hbm_to_vmem [thread:$0]  (!%p8843_p5), %s11713_s7, 4608, %s8930_s25, [#allocation8], %s11724_s12, %s11724_s12, %s8751_s14  }
  0x7a   : > { %p11725_p13 = scmp.ne.s32.totalorder %s11721_s17, 0 }
  0x7b   : > { %p11726_p7 = scmp.eq.s32.totalorder (!%p11725_p13), %s8826_s16, 0 }
  0x7c   : > { %372 = sbr.rel (%p11725_p13) target bundleno = 3574 (0xdf6), region = 56 }
  0x83   : > { %8732 = dma.done.wait (%p11726_p7), [#allocation3], 2304   ;;  %p11727_p2 = pmov %p11726_p7 }
  0x85   : > { %8734 = vsyncadd (%p11727_p2), [#allocation3], 4294964992  ;;  %p11728_p3 = pmov %p11727_p2 }
  0x86   : > { %p11729_p0 = pmov %p11727_p2 }
  0x87   : > { %8736 = dma.done.wait (%p11728_p3), [#allocation5], 9216  }
  0x88   : > { %8738 = vsyncadd (%p11729_p0), [#allocation5], 4294958080  ;;  %p11730_p1 = pmov %p11729_p0 }
  0x89   : > { %p11731_p5 = pmov %p11729_p0 }
  0x8a   : > { %8740 = dma.done.wait (%p11730_p1), [#allocation8], 9216  }
  0x8b   : > { %8742 = vsyncadd (%p11731_p5), [#allocation8], 4294958080  ;;  %p431_p4 = scmp.lt.s32.totalorder %s8826_s16, 1  ;;  %v8756_v0 = vmov 0.0   ;;  %s8757_s25 = smov 127   ;;  %vm482_vm0 = vcmask 64512   ;;  %v452_v7 = vlaneseq }
  0x8c   : > { %1018 = vmatprep.mubr.f32.mxu0 %v8756_v0  ;;  %559 = vmatprep.mubr.f32.mxu1 %v8756_v0  ;;  %s8758_s12 = smov 16   ;;  %v7417_v3 = vld [vmem:[%s11709_s3 + $0x80] sm:$0xff]  ;;  %v7418_v4 = vld [vmem:[%s11709_s3 + $0x88] sm:$0xff]  ;;  %s8759_s26 = smov 17   ;;  %v7419_v5 = vld [vmem:[%s11709_s3 + $0x90] sm:$0xff] }
  0x8d   : > { %s11733_s16 = smov (!%p431_p4, %s8826_s16), 1  ;;  %s8760_s19 = smov 113   ;;  %v7420_v6 = vld [vmem:[%s11709_s3 + $0x98] sm:$0xff]  ;;  %v9040_v8 = vand.u32 127, %v452_v7  ;;  %v1059_v11 = vld [vmem:[#allocation2 + $0x50] sm:$0xff]  ;;  %v7389_v25 = vld [vmem:[%s11709_s3 + $0x20] sm:$0xff] }
  0x8e   : > { %s7662_s17 = sshll.u32 %s11733_s16, 4  ;;  %s8761_s22 = smov 15   ;;  %v474_v12 = vld [vmem:[#allocation2 + $0x18] sm:$0xff]  ;;  %v473_v14 = vld [vmem:[#allocation2 + $0x10] sm:$0xff]  ;;  %v7425_v26 = vld [vmem:[%s11709_s3 + $0xa0] sm:$0xff] }
  0x8f   : > { %s435_s14 = scalar_lea.vmem %s11706_s0, %s7662_s17  ;;  %s8762_s30 = smov 112   ;;  %vm1055_vm1 = vcmp.lt.s32.totalorder %v9040_v8, 127  ;;  %vm469_vm2 = vcmp.lt.s32.totalorder %v9040_v8, 16  ;;  %v1060_v13 = vld [vmem:[#allocation2 + $0x58] sm:$0xff]  ;;  %vm454_vm3 = vcmp.lt.s32.totalorder %v9040_v8, 17  ;;  %v457_v27 = vld [vmem:[#allocation2] sm:$0xff] }
  0x90   : > { %v446_v1 = vld [vmem:[%s435_s14] sm:$0xff]  ;;  %v447_v2 = vld [vmem:[%s435_s14 + $0x8] sm:$0xff]  ;;  %s8763_s17 = smov 1   ;;  %s8764_s20 = smov 111   ;;  %vm1181_vm4 = vcmp.lt.s32.totalorder %v9040_v8, 113  ;;  %vm689_vm5 = vcmp.lt.s32.totalorder %v9040_v8, 15 }
  0x91   : > { %1051 = vrot.lane.b32.xlu1 %v446_v1, %s8757_s25  ;;  %465 = vrot.lane.b32.xlu0 %v446_v1, %s8758_s12  ;;  %v458_v28 = vld [vmem:[#allocation2 + $0x8] sm:$0xff]  ;;  %v1185_v37 = vld [vmem:[#allocation2 + $0x60] sm:$0xff]  ;;  %v7391_v45 = vld [vmem:[%s11709_s3 + $0x30] sm:$0xff]  ;;  %vm1307_vm6 = vcmp.lt.s32.totalorder %v9040_v8, 112  ;;  %vm815_vm7 = vcmp.lt.s32.totalorder %v9040_v8, 1  ;;  %vm1433_vm8 = vcmp.lt.s32.totalorder %v9040_v8, 111 }
  0x92   : > { %954 = vmatprep.subr.mxu0 %v447_v2  ;;  %v7390_v34 = vld [vmem:[%s11709_s3 + $0x28] sm:$0xff]  ;;  %v7427_v46 = vld [vmem:[%s11709_s3 + $0xb0] sm:$0xff]  ;;  %v7392_v52 = vld [vmem:[%s11709_s3 + $0x38] sm:$0xff] }
  0x93   : > { %955 = vmatpush1.msra.mxu0 %v446_v1  ;;  %v7426_v36 = vld [vmem:[%s11709_s3 + $0xa8] sm:$0xff]  ;;  %v7428_v53 = vld [vmem:[%s11709_s3 + $0xb8] sm:$0xff]  ;;  %v693_v57 = vld [vmem:[#allocation2 + $0x20] sm:$0xff] }
  0x94   : > { %7421 = vmatmul.mubr.msk.f32.vlgmr.msra.gmra.mrb[0].mxu0 %vm482_vm0, %v7417_v3  ;;  %v1186_v38 = vld [vmem:[#allocation2 + $0x68] sm:$0xff]  ;;  %v1312_v54 = vld [vmem:[#allocation2 + $0x78] sm:$0xff]  ;;  %v1311_v59 = vld [vmem:[#allocation2 + $0x70] sm:$0xff] }
  0x95   : > { %1053 = vrot.lane.b32.xlu1 %v447_v2, %s8757_s25  ;;  %467 = vrot.lane.b32.xlu0 %v447_v2, %s8758_s12  ;;  %v694_v47 = vld [vmem:[#allocation2 + $0x28] sm:$0xff]  ;;  %v461_v63 = vld [vmem:[%s11709_s3] sm:$0xff] }
  0x96   : > { %1024 = vmatprep.mubr.f32.mxu0 %v8756_v0 }
  0x98   : > { %7422 = vmatmul.mubr.msk.f32.gmra.mrb[2].mxu0 %vm482_vm0, %v7418_v4 }
  0x99   : > { %450 = vrot.lane.b32.xlu1 %v447_v2, %s8759_s26  ;;  %448 = vrot.lane.b32.xlu0 %v446_v1, %s8759_s26 }
  0x9a   : > { %1030 = vmatprep.mubr.f32.mxu0 %v8756_v0 }
  0x9c   : > { %7423 = vmatmul.mubr.msk.f32.gmra.mrb[4].mxu0 %vm482_vm0, %v7419_v5 }
  0x9d   : > { %1179 = vrot.lane.b32.xlu1 %v447_v2, %s8760_s19  ;;  %1177 = vrot.lane.b32.xlu0 %v446_v1, %s8760_s19 }
  0x9e   : > { %1036 = vmatprep.mubr.f32.mxu0 %v8756_v0 }
  0xa0   : > { %7424 = vmatmul.mubr.msk.f32.gmra.mrb[6].mxu0 %vm482_vm0, %v7420_v6 }
  0xa1   : > { %687 = vrot.lane.b32.xlu1 %v447_v2, %s8761_s22  ;;  %685 = vrot.lane.b32.xlu0 %v446_v1, %s8761_s22 }
  0xa2   : > { %1144 = vmatprep.mubr.f32.mxu0 %v8756_v0 }
  0xa5   : > { %1305 = vrot.lane.b32.xlu1 %v447_v2, %s8762_s30  ;;  %1303 = vrot.lane.b32.xlu0 %v446_v1, %s8762_s30 }
  0xa9   : > { %813 = vrot.lane.b32.xlu1 %v447_v2, %s8763_s17  ;;  %811 = vrot.lane.b32.xlu0 %v446_v1, %s8763_s17 }
  0xad   : > { %1431 = vrot.lane.b32.xlu1 %v447_v2, %s8764_s20  ;;  %1429 = vrot.lane.b32.xlu0 %v446_v1, %s8764_s20  ;;  %v7433_v1 = vld [vmem:[%s11709_s3 + $0xc0] sm:$0xff]  ;;  %v820_v2 = vld [vmem:[#allocation2 + $0x38] sm:$0xff] }
 0x103   : > { %v1052_v9 = vpop.permute.xlu1 %1051  ;;  %v466_v10 = vpop.permute.xlu0 %465 }
 0x107   : > { %v1054_v15 = vpop.permute.xlu1 %1053  ;;  %v468_v16 = vpop.permute.xlu0 %467 }
 0x108   : > { %v1056_v17 = vsel %vm1055_vm1, %v1052_v9, %v1054_v15  ;;  %v1057_v18 = vsel %vm1055_vm1, %v1054_v15, %v1052_v9  ;;  %v470_v19 = vsel %vm469_vm2, %v466_v10, %v468_v16  ;;  %v471_v20 = vsel %vm469_vm2, %v468_v16, %v466_v10 }
 0x109   : > { %v1061_v21 = vmul.f32 %v1059_v11, %v1056_v17  ;;  %v476_v22 = vmul.f32 %v474_v12, %v470_v19  ;;  %v1062_v23 = vmul.f32 %v1060_v13, %v1057_v18  ;;  %v475_v24 = vmul.f32 %v473_v14, %v471_v20  ;;  %v462_v11 = vld [vmem:[%s11709_s3 + $0x8] sm:$0xff]  ;;  %v463_v18 = vld [vmem:[%s11709_s3 + $0x10] sm:$0xff]  ;;  %v464_v20 = vld [vmem:[%s11709_s3 + $0x18] sm:$0xff] }
 0x10a   : > { %v7434_v12 = vld [vmem:[%s11709_s3 + $0xc8] sm:$0xff]  ;;  %v7435_v19 = vld [vmem:[%s11709_s3 + $0xd0] sm:$0xff] }
 0x10b   : > { %495 = vmatprep.subr.mxu1 %v476_v22  ;;  %1080 = vmatprep.subr.mxu0 %v1062_v23  ;;  %v451_v29 = vpop.permute.xlu1 %450  ;;  %v449_v30 = vpop.permute.xlu0 %448  ;;  %v1438_v13 = vld [vmem:[#allocation2 + $0x88] sm:$0xff]  ;;  %v819_v22 = vld [vmem:[#allocation2 + $0x30] sm:$0xff] }
 0x10c   : > { %496 = vmatpush1.msra.mxu1 %v475_v24  ;;  %1081 = vmatpush1.msra.mxu0 %v1061_v21  ;;  %v455_v31 = vsel %vm454_vm3, %v449_v30, %v451_v29  ;;  %v456_v32 = vsel %vm454_vm3, %v451_v29, %v449_v30  ;;  %v7436_v21 = vld [vmem:[%s11709_s3 + $0xd8] sm:$0xff]  ;;  %v1437_v24 = vld [vmem:[#allocation2 + $0x80] sm:$0xff]  ;;  %v7402_v30 = vld [vmem:[%s11709_s3 + $0x48] sm:$0xff] }
 0x10d   : > { %7393 = vmatmul.mubr.msk.f32.vlgmr.msra.gmra.mrb[0].mxu1 %vm482_vm0, %v7389_v25  ;;  %7429 = vmatmul.mubr.msk.f32.vlgmr.msra.gmra.mrb[0].mxu0 %vm482_vm0, %v7425_v26  ;;  %v459_v33 = vmul.f32 %v457_v27, %v456_v32  ;;  %v460_v35 = vmul.f32 %v458_v28, %v455_v31  ;;  %v7401_v26 = vld [vmem:[%s11709_s3 + $0x40] sm:$0xff]  ;;  %v7442_v31 = vld [vmem:[%s11709_s3 + $0xe8] sm:$0xff]  ;;  %v7403_v32 = vld [vmem:[%s11709_s3 + $0x50] sm:$0xff] }
 0x10e   : > { %565 = vmatprep.mubr.f32.mxu1 %v8756_v0  ;;  %1150 = vmatprep.mubr.f32.mxu0 %v8756_v0  ;;  %v7441_v27 = vld [vmem:[%s11709_s3 + $0xe0] sm:$0xff] }
 0x10f   : > { %596 = vmatprep.subr.mxu1 %v460_v35  ;;  %v1180_v39 = vpop.permute.xlu1 %1179  ;;  %v1178_v40 = vpop.permute.xlu0 %1177  ;;  %v7444_v35 = vld [vmem:[%s11709_s3 + $0xf8] sm:$0xff] }
 0x110   : > { %597 = vmatpush1.msra.mxu1 %v459_v33  ;;  %v1182_v41 = vsel %vm1181_vm4, %v1178_v40, %v1180_v39  ;;  %v1183_v42 = vsel %vm1181_vm4, %v1180_v39, %v1178_v40  ;;  %v7443_v33 = vld [vmem:[%s11709_s3 + $0xf0] sm:$0xff]  ;;  %v7450_v39 = vld [vmem:[%s11709_s3 + $0x108] sm:$0xff] }
 0x111   : > { %7394 = vmatmul.mubr.msk.f32.gmra.mrb[2].mxu1 %vm482_vm0, %v7390_v34  ;;  %7430 = vmatmul.mubr.msk.f32.gmra.mrb[2].mxu0 %vm482_vm0, %v7426_v36  ;;  %v1187_v43 = vmul.f32 %v1185_v37, %v1182_v41  ;;  %v1188_v44 = vmul.f32 %v1186_v38, %v1183_v42  ;;  %v7404_v34 = vld [vmem:[%s11709_s3 + $0x58] sm:$0xff]  ;;  %v7409_v36 = vld [vmem:[%s11709_s3 + $0x60] sm:$0xff]  ;;  %v7410_v38 = vld [vmem:[%s11709_s3 + $0x68] sm:$0xff] }
 0x112   : > { %571 = vmatprep.mubr.f32.mxu1 %v8756_v0  ;;  %1156 = vmatprep.mubr.f32.mxu0 %v8756_v0  ;;  %v7449_v37 = vld [vmem:[%s11709_s3 + $0x100] sm:$0xff]  ;;  %v7411_v40 = vld [vmem:[%s11709_s3 + $0x70] sm:$0xff]  ;;  %v7412_v41 = vld [vmem:[%s11709_s3 + $0x78] sm:$0xff] }
 0x113   : > { %1206 = vmatprep.subr.mxu0 %v1188_v44  ;;  %v688_v48 = vpop.permute.xlu1 %687  ;;  %v686_v49 = vpop.permute.xlu0 %685  ;;  %v7451_v42 = vld [vmem:[%s11709_s3 + $0x110] sm:$0xff] }
 0x114   : > { %1207 = vmatpush1.msra.mxu0 %v1187_v43  ;;  %v690_v50 = vsel %vm689_vm5, %v686_v49, %v688_v48  ;;  %v691_v58 = vsel %vm689_vm5, %v688_v48, %v686_v49  ;;  %v7452_v43 = vld [vmem:[%s11709_s3 + $0x118] sm:$0xff] }
 0x115   : > { %7395 = vmatmul.mubr.msk.f32.gmra.mrb[4].mxu1 %vm482_vm0, %v7391_v45  ;;  %7431 = vmatmul.mubr.msk.f32.gmra.mrb[4].mxu0 %vm482_vm0, %v7427_v46  ;;  %v696_v51 = vmul.f32 %v694_v47, %v690_v50  ;;  %v695_v3 = vmul.f32 %v693_v57, %v691_v58 }
 0x116   : > { %577 = vmatprep.mubr.f32.mxu1 %v8756_v0  ;;  %1162 = vmatprep.mubr.f32.mxu0 %v8756_v0 }
 0x117   : > { %714 = vmatprep.subr.mxu1 %v696_v51  ;;  %v1306_v55 = vpop.permute.xlu1 %1305  ;;  %v1304_v56 = vpop.permute.xlu0 %1303 }
 0x118   : > { %v1308_v60 = vsel %vm1307_vm6, %v1304_v56, %v1306_v55  ;;  %v1309_v61 = vsel %vm1307_vm6, %v1306_v55, %v1304_v56 }
 0x119   : > { %7396 = vmatmul.mubr.msk.f32.gmra.mrb[6].mxu1 %vm482_vm0, %v7392_v52  ;;  %7432 = vmatmul.mubr.msk.f32.gmra.mrb[6].mxu0 %vm482_vm0, %v7428_v53  ;;  %v1314_v62 = vmul.f32 %v1312_v54, %v1309_v61  ;;  %v1313_v4 = vmul.f32 %v1311_v59, %v1308_v60 }
 0x11a   : > { %660 = vmatprep.mubr.f32.mxu1 %v8756_v0  ;;  %1270 = vmatprep.mubr.f32.mxu0 %v8756_v0 }
 0x11b   : > { %1332 = vmatprep.subr.mxu0 %v1314_v62  ;;  %v814_v5 = vpop.permute.xlu1 %813  ;;  %v812_v6 = vpop.permute.xlu0 %811 }
 0x11c   : > { %v816_v9 = vsel %vm815_vm7, %v812_v6, %v814_v5  ;;  %v817_v23 = vsel %vm815_vm7, %v814_v5, %v812_v6 }
 0x11d   : > { %7397 = vmatmul.mubr.msk.f32.vlgmr.msra.gmra.mrb[0].mxu1 %vm482_vm0, %v461_v63  ;;  %7437 = vmatmul.mubr.msk.f32.vlgmr.msra.gmra.mrb[0].mxu0 %vm482_vm0, %v7433_v1  ;;  %v822_v10 = vmul.f32 %v820_v2, %v816_v9  ;;  %v821_v28 = vmul.f32 %v819_v22, %v817_v23 }
 0x11e   : > { %666 = vmatprep.mubr.f32.mxu1 %v8756_v0  ;;  %1276 = vmatprep.mubr.f32.mxu0 %v8756_v0 }
 0x11f   : > { %715 = vmatpush1.msra.mxu1 %v695_v3  ;;  %1333 = vmatpush1.msra.mxu0 %v1313_v4  ;;  %v1432_v14 = vpop.permute.xlu1 %1431  ;;  %v1430_v15 = vpop.permute.xlu0 %1429 }
 0x120   : > { %840 = vmatprep.subr.mxu1 %v822_v10  ;;  %v1435_v16 = vsel %vm1433_vm8, %v1432_v14, %v1430_v15  ;;  %v1434_v25 = vsel %vm1433_vm8, %v1430_v15, %v1432_v14 }
 0x121   : > { %7398 = vmatmul.mubr.msk.f32.gmra.mrb[2].mxu1 %vm482_vm0, %v462_v11  ;;  %7438 = vmatmul.mubr.msk.f32.gmra.mrb[2].mxu0 %vm482_vm0, %v7434_v12  ;;  %v1440_v17 = vmul.f32 %v1438_v13, %v1435_v16  ;;  %v1439_v29 = vmul.f32 %v1437_v24, %v1434_v25 }
 0x122   : > { %672 = vmatprep.mubr.f32.mxu1 %v8756_v0  ;;  %1282 = vmatprep.mubr.f32.mxu0 %v8756_v0 }
 0x123   : > { %1458 = vmatprep.subr.mxu0 %v1440_v17 }
 0x125   : > { %7399 = vmatmul.mubr.msk.f32.gmra.mrb[4].mxu1 %vm482_vm0, %v463_v18  ;;  %7439 = vmatmul.mubr.msk.f32.gmra.mrb[4].mxu0 %vm482_vm0, %v7435_v19 }
 0x126   : > { %678 = vmatprep.mubr.f32.mxu1 %v8756_v0  ;;  %1288 = vmatprep.mubr.f32.mxu0 %v8756_v0 }
 0x129   : > { %7400 = vmatmul.mubr.msk.f32.gmra.mrb[6].mxu1 %vm482_vm0, %v464_v20  ;;  %7440 = vmatmul.mubr.msk.f32.gmra.mrb[6].mxu0 %vm482_vm0, %v7436_v21 }
 0x12a   : > { %778 = vmatprep.mubr.f32.mxu1 %v8756_v0  ;;  %1396 = vmatprep.mubr.f32.mxu0 %v8756_v0 }
 0x12d   : > { %7405 = vmatmul.mubr.msk.f32.vlgmr.msra.gmra.mrb[0].mxu1 %vm482_vm0, %v7401_v26  ;;  %7445 = vmatmul.mubr.msk.f32.vlgmr.msra.gmra.mrb[0].mxu0 %vm482_vm0, %v7441_v27 }
 0x12e   : > { %784 = vmatprep.mubr.f32.mxu1 %v8756_v0  ;;  %1402 = vmatprep.mubr.f32.mxu0 %v8756_v0 }
 0x12f   : > { %841 = vmatpush1.msra.mxu1 %v821_v28  ;;  %1459 = vmatpush1.msra.mxu0 %v1439_v29 }
 0x130   : > { %7961 = vmatprep.subr.mxu1 %v1440_v17 }
 0x131   : > { %7406 = vmatmul.mubr.msk.f32.gmra.mrb[2].mxu1 %vm482_vm0, %v7402_v30  ;;  %7446 = vmatmul.mubr.msk.f32.gmra.mrb[2].mxu0 %vm482_vm0, %v7442_v31 }
 0x132   : > { %790 = vmatprep.mubr.f32.mxu1 %v8756_v0  ;;  %1408 = vmatprep.mubr.f32.mxu0 %v8756_v0 }
 0x135   : > { %7407 = vmatmul.mubr.msk.f32.gmra.mrb[4].mxu1 %vm482_vm0, %v7403_v32  ;;  %7447 = vmatmul.mubr.msk.f32.gmra.mrb[4].mxu0 %vm482_vm0, %v7443_v33 }
 0x136   : > { %796 = vmatprep.mubr.f32.mxu1 %v8756_v0  ;;  %1414 = vmatprep.mubr.f32.mxu0 %v8756_v0 }
 0x139   : > { %7408 = vmatmul.mubr.msk.f32.gmra.mrb[6].mxu1 %vm482_vm0, %v7404_v34  ;;  %7448 = vmatmul.mubr.msk.f32.gmra.mrb[6].mxu0 %vm482_vm0, %v7444_v35 }
 0x13a   : > { %904 = vmatprep.mubr.f32.mxu1 %v8756_v0  ;;  %1522 = vmatprep.mubr.f32.mxu0 %v8756_v0 }
 0x13d   : > { %7413 = vmatmul.mubr.msk.f32.vlgmr.msra.gmra.mrb[0].mxu1 %vm482_vm0, %v7409_v36  ;;  %7453 = vmatmul.mubr.msk.f32.vlgmr.msra.gmra.mrb[0].mxu0 %vm482_vm0, %v7449_v37 }
 0x13e   : > { %7962 = vmatpush1.msra.mxu1 %v1439_v29  ;;  %910 = vmatprep.mubr.f32.mxu1 %v8756_v0 }
 0x13f   : > { %1528 = vmatprep.mubr.f32.mxu0 %v8756_v0 }
 0x141   : > { %7414 = vmatmul.mubr.msk.f32.gmra.mrb[2].mxu1 %vm482_vm0, %v7410_v38  ;;  %7454 = vmatmul.mubr.msk.f32.gmra.mrb[2].mxu0 %vm482_vm0, %v7450_v39 }
 0x142   : > { %916 = vmatprep.mubr.f32.mxu1 %v8756_v0  ;;  %3217 = vmatprep.mubr.f32.mxu0 %v8756_v0 }
 0x145   : > { %7415 = vmatmul.mubr.msk.f32.gmra.mrb[4].mxu1 %vm482_vm0, %v7411_v40 }
 0x146   : > { %922 = vmatprep.mubr.f32.mxu1 %v8756_v0 }
 0x149   : > { %7416 = vmatmul.mubr.msk.f32.gmra.mrb[6].mxu1 %vm482_vm0, %v7412_v41 }
 0x14a   : > { %1534 = vmatprep.mubr.f32.mxu1 %v8756_v0 }
 0x14d   : > { %7455 = vmatmul.mubr.msk.f32.vlgmr.msra.gmra.mrb[8].mxu1 %vm482_vm0, %v7451_v42 }
 0x14e   : > { %1540 = vmatprep.mubr.f32.mxu1 %v8756_v0 }
 0x151   : > { %7456 = vmatmul.mubr.msk.f32.gmra.mrb[10].mxu1 %vm482_vm0, %v7452_v43 }
 0x152   : > { %1818 = vmatprep.mubr.f32.mxu1 %v8756_v0 }
 0x208   : > { %v1410_v44 = vpop.f32.mrb[4].mxu0 }
 0x209   : > { %v1412_v45 = vpop.f32.mrb[5].mxu0 }
 0x20c   : > { %v1416_v46 = vpop.f32.mrb[6].mxu0 }
 0x20d   : > { %v1418_v47 = vpop.f32.mrb[7].mxu0 }
 0x210   : > { %v906_v48 = vpop.f32.mrb[0].mxu1  ;;  %v1524_v49 = vpop.f32.mrb[0].mxu0 }
 0x211   : > { %v9242_v50 = vadd.f32 %v1524_v49, %v906_v48  ;;  %v908_v51 = vpop.f32.mrb[1].mxu1  ;;  %v1526_v52 = vpop.f32.mrb[1].mxu0 }
 0x212   : > { %v9244_v53 = vadd.f32 %v1526_v52, %v908_v51 }
 0x213   : > { %v1571_v57 = vmul.f32 %v9242_v50, %v9242_v50 }
 0x214   : > { %v912_v54 = vpop.f32.mrb[2].mxu1  ;;  %v1530_v55 = vpop.f32.mrb[2].mxu0  ;;  %v1555_v56 = vadd.f32 %v9244_v53, %v9242_v50  ;;  %v1572_v58 = vmul.f32 %v9244_v53, %v9244_v53 }
 0x215   : > { %v9252_v59 = vadd.f32 %v1530_v55, %v912_v54  ;;  %v914_v60 = vpop.f32.mrb[3].mxu1  ;;  %v1532_v61 = vpop.f32.mrb[3].mxu0 }
 0x216   : > { %v9254_v62 = vadd.f32 %v1532_v61, %v914_v60  ;;  %1556 = vadd.xlane.f32.xlu0 %v1555_v56  ;;  %v1579_v1 = vadd.f32 %v1572_v58, %v1571_v57 }
 0x217   : > { %v1573_v3 = vmul.f32 %v9252_v59, %v9252_v59 }
 0x218   : > { %v918_v63 = vpop.f32.mrb[4].mxu1  ;;  %v1558_v2 = vadd.f32 %v9254_v62, %v9252_v59  ;;  %v1574_v4 = vmul.f32 %v9254_v62, %v9254_v62 }
 0x219   : > { %v7967_v5 = vadd.f32 %v1410_v44, %v918_v63  ;;  %v920_v6 = vpop.f32.mrb[5].mxu1 }
 0x21a   : > { %v7969_v9 = vadd.f32 %v1412_v45, %v920_v6  ;;  %1580 = vadd.xlane.f32.xlu0 %v1579_v1  ;;  %1559 = vadd.xlane.f32.xlu1 %v1558_v2  ;;  %v1582_v11 = vadd.f32 %v1574_v4, %v1573_v3 }
 0x21c   : > { %v924_v10 = vpop.f32.mrb[6].mxu1 }
 0x21d   : > { %v7971_v12 = vadd.f32 %v1416_v46, %v924_v10  ;;  %v926_v13 = vpop.f32.mrb[7].mxu1 }
 0x21e   : > { %v7973_v14 = vadd.f32 %v1418_v47, %v926_v13  ;;  %1583 = vadd.xlane.f32.xlu0 %v1582_v11 }
 0x220   : > { %v1536_v15 = vpop.f32.mrb[8].mxu1 }
 0x221   : > { %v9262_v16 = vadd.f32 %v7967_v5, %v1536_v15  ;;  %v1538_v17 = vpop.f32.mrb[9].mxu1 }
 0x222   : > { %v9264_v18 = vadd.f32 %v7969_v9, %v1538_v17 }
 0x223   : > { %v1575_v21 = vmul.f32 %v9262_v16, %v9262_v16 }
 0x224   : > { %v1542_v19 = vpop.f32.mrb[10].mxu1  ;;  %v1561_v20 = vadd.f32 %v9264_v18, %v9262_v16  ;;  %v1576_v22 = vmul.f32 %v9264_v18, %v9264_v18 }
 0x225   : > { %v9272_v23 = vadd.f32 %v7971_v12, %v1542_v19  ;;  %v1544_v24 = vpop.f32.mrb[11].mxu1 }
 0x226   : > { %v9274_v25 = vadd.f32 %v7973_v14, %v1544_v24  ;;  %1562 = vadd.xlane.f32.xlu1 %v1561_v20  ;;  %v1585_v27 = vadd.f32 %v1576_v22, %v1575_v21 }
 0x227   : > { %v1577_v28 = vmul.f32 %v9272_v23, %v9272_v23 }
 0x228   : > { %v1564_v26 = vadd.f32 %v9274_v25, %v9272_v23  ;;  %v1578_v29 = vmul.f32 %v9274_v25, %v9274_v25 }
 0x22a   : > { %1565 = vadd.xlane.f32.xlu0 %v1564_v26  ;;  %1586 = vadd.xlane.f32.xlu1 %v1585_v27  ;;  %v1588_v30 = vadd.f32 %v1578_v29, %v1577_v28 }
 0x22e   : > { %1589 = vadd.xlane.f32.xlu0 %v1588_v30 }
 0x2a3   : > { %v1557_v31 = vpop.xlane.xlu0 %1556 }
 0x2a4   : > { %v1567_v32 = vmul.f32 0.00390625, %v1557_v31 }
 0x2a6   : > { %v1595_v35 = vmul.f32 %v1567_v32, %v1567_v32  ;;  %v1603_v47 = vsub.f32 %v9242_v50, %v1567_v32  ;;  %v1604_v48 = vsub.f32 %v9244_v53, %v1567_v32 }
 0x2a7   : > { %v1581_v33 = vpop.xlane.xlu0 %1580  ;;  %v1560_v34 = vpop.xlane.xlu1 %1559 }
 0x2a8   : > { %v1591_v36 = vmul.f32 0.00390625, %v1581_v33  ;;  %v1568_v37 = vmul.f32 0.00390625, %v1560_v34 }
 0x2aa   : > { %v1599_v38 = vsub.f32 %v1591_v36, %v1595_v35  ;;  %v1596_v42 = vmul.f32 %v1568_v37, %v1568_v37  ;;  %v1605_v63 = vsub.f32 %v9252_v59, %v1568_v37  ;;  %v1606_v1 = vsub.f32 %v9254_v62, %v1568_v37  ;;  %v7457_v36 = vld [vmem:[%s11708_s2 + $0x40] sm:$0xff] }
 0x2ab   : > { %v1584_v39 = vpop.xlane.xlu0 %1583 }
 0x2ac   : > { %v1611_v40 = vadd.f32 1e-05, %v1599_v38  ;;  %v1592_v41 = vmul.f32 0.00390625, %v1584_v39  ;;  %v7458_v38 = vld [vmem:[%s11708_s2 + $0x48] sm:$0xff] }
 0x2ae   : > { %8355 = vrsqrt.f32 %v1611_v40  ;;  %v1600_v43 = vsub.f32 %v1592_v41, %v1596_v42  ;;  %v7459_v40 = vld [vmem:[%s11708_s2 + $0x50] sm:$0xff]  ;;  %v7460_v41 = vld [vmem:[%s11708_s2 + $0x58] sm:$0xff] }
 0x2b0   : > { %v1612_v44 = vadd.f32 1e-05, %v1600_v43 }
 0x2b2   : > { %8357 = vrsqrt.f32 %v1612_v44 }
 0x2b3   : > { %v1563_v45 = vpop.xlane.xlu1 %1562 }
 0x2b4   : > { %v1569_v46 = vmul.f32 0.00390625, %v1563_v45 }
 0x2b6   : > { %v1597_v55 = vmul.f32 %v1569_v46, %v1569_v46  ;;  %v1607_v17 = vsub.f32 %v9262_v16, %v1569_v46  ;;  %v1608_v19 = vsub.f32 %v9264_v18, %v1569_v46 }
 0x2b7   : > { %v1566_v49 = vpop.xlane.xlu0 %1565  ;;  %v1587_v51 = vpop.xlane.xlu1 %1586 }
 0x2b8   : > { %v8356_v52 = vpop.eup %8355  ;;  %v1570_v54 = vmul.f32 0.00390625, %v1566_v49  ;;  %v1593_v56 = vmul.f32 0.00390625, %v1587_v51 }
 0x2b9   : > { %v1619_v57 = vmul.f32 %v8356_v52, %v1603_v47  ;;  %v1620_v58 = vmul.f32 %v8356_v52, %v1604_v48 }
 0x2ba   : > { %v1601_v60 = vsub.f32 %v1593_v56, %v1597_v55  ;;  %v1598_v4 = vmul.f32 %v1570_v54, %v1570_v54  ;;  %v1609_v24 = vsub.f32 %v9272_v23, %v1570_v54  ;;  %v1610_v26 = vsub.f32 %v9274_v25, %v1570_v54 }
 0x2bb   : > { %vm1627_vm9 = vcmp.ge.f32.partialorder %v1619_v57, 0.0  ;;  %v1635_v61 = vmul.f32 0.2, %v1619_v57  ;;  %v1590_v2 = vpop.xlane.xlu0 %1589  ;;  %v1636_v5 = vmul.f32 0.2, %v1620_v58  ;;  %vm1628_vm10 = vcmp.ge.f32.partialorder %v1620_v58, 0.0 }
 0x2bc   : > { %v8358_v3 = vpop.eup %8357  ;;  %v1613_v50 = vadd.f32 1e-05, %v1601_v60  ;;  %v1594_v53 = vmul.f32 0.00390625, %v1590_v2 }
 0x2bd   : > { %v9286_v6 = vsel %vm1627_vm9, %v1619_v57, %v1635_v61  ;;  %v1621_v9 = vmul.f32 %v8358_v3, %v1605_v63  ;;  %v1622_v10 = vmul.f32 %v8358_v3, %v1606_v1  ;;  %v9290_v62 = vsel %vm1628_vm10, %v1620_v58, %v1636_v5  ;;  %v7461_v57 = vld [vmem:[%s11708_s2 + $0x60] sm:$0xff]  ;;  %v7462_v58 = vld [vmem:[%s11708_s2 + $0x68] sm:$0xff]  ;;  %v7463_v63 = vld [vmem:[%s11708_s2 + $0x70] sm:$0xff] }
 0x2be   : > { %8359 = vrsqrt.f32 %v1613_v50  ;;  %v1602_v11 = vsub.f32 %v1594_v53, %v1598_v4  ;;  %1695 = vrot.lane.b32.xlu1 %v9286_v6, %s8758_s12  ;;  %v7464_v1 = vld [vmem:[%s11708_s2 + $0x78] sm:$0xff]  ;;  %vm1741_vm9 = vcmask 261120  }
 0x2bf   : > { %vm1629_vm11 = vcmp.ge.f32.partialorder %v1621_v9, 0.0  ;;  %v1637_v59 = vmul.f32 0.2, %v1621_v9  ;;  %v1638_v13 = vmul.f32 0.2, %v1622_v10  ;;  %vm1630_vm12 = vcmp.ge.f32.partialorder %v1622_v10, 0.0 }
 0x2c0   : > { %v1614_v12 = vadd.f32 1e-05, %v1602_v11 }
 0x2c1   : > { %v9292_v14 = vsel %vm1629_vm11, %v1621_v9, %v1637_v59  ;;  %v9298_v15 = vsel %vm1630_vm12, %v1622_v10, %v1638_v13 }
 0x2c2   : > { %8361 = vrsqrt.f32 %v1614_v12  ;;  %1703 = vrot.lane.b32.xlu1 %v9290_v62, %s8758_s12  ;;  %1697 = vrot.lane.b32.xlu0 %v9292_v14, %s8758_s12 }
 0x2c6   : > { %1705 = vrot.lane.b32.xlu1 %v9298_v15, %s8758_s12 }
 0x2c8   : > { %v8360_v20 = vpop.eup %8359 }
 0x2c9   : > { %v1623_v21 = vmul.f32 %v8360_v20, %v1607_v17  ;;  %v1624_v22 = vmul.f32 %v8360_v20, %v1608_v19  ;;  %v1675_v17 = vld [vmem:[%s11708_s2] sm:$0xff]  ;;  %v1676_v19 = vld [vmem:[%s11708_s2 + $0x8] sm:$0xff] }
 0x2cb   : > { %vm1631_vm13 = vcmp.ge.f32.partialorder %v1623_v21, 0.0  ;;  %v1639_v27 = vmul.f32 0.2, %v1623_v21  ;;  %v1640_v29 = vmul.f32 0.2, %v1624_v22  ;;  %vm1632_vm14 = vcmp.ge.f32.partialorder %v1624_v22, 0.0 }
 0x2cc   : > { %v8362_v28 = vpop.eup %8361 }
 0x2cd   : > { %v9306_v30 = vsel %vm1631_vm13, %v1623_v21, %v1639_v27  ;;  %v1625_v31 = vmul.f32 %v8362_v28, %v1609_v24  ;;  %v1626_v32 = vmul.f32 %v8362_v28, %v1610_v26  ;;  %v9310_v18 = vsel %vm1632_vm14, %v1624_v22, %v1640_v29  ;;  %v1677_v22 = vld [vmem:[%s11708_s2 + $0x10] sm:$0xff]  ;;  %v1678_v24 = vld [vmem:[%s11708_s2 + $0x18] sm:$0xff] }
 0x2ce   : > { %1699 = vrot.lane.b32.xlu0 %v9306_v30, %s8758_s12  ;;  %v1737_v26 = vld [vmem:[#allocation4 + $0x20] sm:$0xff] }
 0x2cf   : > { %vm1633_vm15 = vcmp.ge.f32.partialorder %v1625_v31, 0.0  ;;  %v1641_v16 = vmul.f32 0.2, %v1625_v31  ;;  %v1642_v33 = vmul.f32 0.2, %v1626_v32  ;;  %vm1634_vm0 = vcmp.ge.f32.partialorder %v1626_v32, 0.0 }
 0x2d1   : > { %v9312_v23 = vsel %vm1633_vm15, %v1625_v31, %v1641_v16  ;;  %v9318_v25 = vsel %vm1634_vm0, %v1626_v32, %v1642_v33 }
 0x2d2   : > { %1701 = vrot.lane.b32.xlu1 %v9312_v23, %s8758_s12  ;;  %1707 = vrot.lane.b32.xlu0 %v9310_v18, %s8758_s12 }
 0x2d6   : > { %1709 = vrot.lane.b32.xlu1 %v9318_v25, %s8758_s12  ;;  %1651 = vrot.lane.b32.xlu0 %v9286_v6, %s8759_s26 }
 0x2da   : > { %1653 = vrot.lane.b32.xlu1 %v9292_v14, %s8759_s26  ;;  %1659 = vrot.lane.b32.xlu0 %v9290_v62, %s8759_s26 }
 0x2de   : > { %1661 = vrot.lane.b32.xlu1 %v9298_v15, %s8759_s26  ;;  %1655 = vrot.lane.b32.xlu0 %v9306_v30, %s8759_s26 }
 0x2e2   : > { %1657 = vrot.lane.b32.xlu1 %v9312_v23, %s8759_s26  ;;  %1663 = vrot.lane.b32.xlu0 %v9310_v18, %s8759_s26 }
 0x2e6   : > { %1665 = vrot.lane.b32.xlu1 %v9318_v25, %s8759_s26  ;;  %1944 = vrot.lane.b32.xlu0 %v9286_v6, %s8761_s22 }
 0x2ea   : > { %1946 = vrot.lane.b32.xlu1 %v9292_v14, %s8761_s22  ;;  %1952 = vrot.lane.b32.xlu0 %v9290_v62, %s8761_s22 }
 0x2ee   : > { %1954 = vrot.lane.b32.xlu1 %v9298_v15, %s8761_s22  ;;  %1948 = vrot.lane.b32.xlu0 %v9306_v30, %s8761_s22 }
 0x2f2   : > { %1950 = vrot.lane.b32.xlu1 %v9312_v23, %s8761_s22  ;;  %1956 = vrot.lane.b32.xlu0 %v9310_v18, %s8761_s22 }
 0x2f6   : > { %1958 = vrot.lane.b32.xlu1 %v9318_v25, %s8761_s22  ;;  %2099 = vrot.lane.b32.xlu0 %v9286_v6, %s8763_s17 }
 0x2fa   : > { %2101 = vrot.lane.b32.xlu1 %v9292_v14, %s8763_s17  ;;  %2107 = vrot.lane.b32.xlu0 %v9290_v62, %s8763_s17 }
 0x2fe   : > { %2109 = vrot.lane.b32.xlu1 %v9298_v15, %s8763_s17  ;;  %2103 = vrot.lane.b32.xlu0 %v9306_v30, %s8763_s17 }
 0x302   : > { %2105 = vrot.lane.b32.xlu1 %v9312_v23, %s8763_s17  ;;  %2111 = vrot.lane.b32.xlu0 %v9310_v18, %s8763_s17 }
 0x306   : > { %2113 = vrot.lane.b32.xlu1 %v9318_v25, %s8763_s17  ;;  %2368 = vrot.lane.b32.xlu0 %v9286_v6, %s8757_s25 }
 0x30a   : > { %2370 = vrot.lane.b32.xlu1 %v9292_v14, %s8757_s25  ;;  %2376 = vrot.lane.b32.xlu0 %v9290_v62, %s8757_s25 }
 0x30e   : > { %2378 = vrot.lane.b32.xlu1 %v9298_v15, %s8757_s25  ;;  %2372 = vrot.lane.b32.xlu0 %v9306_v30, %s8757_s25 }
 0x312   : > { %2374 = vrot.lane.b32.xlu1 %v9312_v23, %s8757_s25  ;;  %2380 = vrot.lane.b32.xlu0 %v9310_v18, %s8757_s25 }
 0x316   : > { %2382 = vrot.lane.b32.xlu1 %v9318_v25, %s8757_s25  ;;  %2523 = vrot.lane.b32.xlu0 %v9286_v6, %s8760_s19 }
 0x31a   : > { %2525 = vrot.lane.b32.xlu1 %v9292_v14, %s8760_s19  ;;  %2531 = vrot.lane.b32.xlu0 %v9290_v62, %s8760_s19 }
 0x31e   : > { %2533 = vrot.lane.b32.xlu1 %v9298_v15, %s8760_s19  ;;  %2527 = vrot.lane.b32.xlu0 %v9306_v30, %s8760_s19 }
 0x322   : > { %2529 = vrot.lane.b32.xlu1 %v9312_v23, %s8760_s19  ;;  %2535 = vrot.lane.b32.xlu0 %v9310_v18, %s8760_s19 }
 0x326   : > { %2537 = vrot.lane.b32.xlu1 %v9318_v25, %s8760_s19  ;;  %2678 = vrot.lane.b32.xlu0 %v9286_v6, %s8762_s30 }
 0x32a   : > { %2680 = vrot.lane.b32.xlu1 %v9292_v14, %s8762_s30  ;;  %2686 = vrot.lane.b32.xlu0 %v9290_v62, %s8762_s30 }
 0x32e   : > { %2688 = vrot.lane.b32.xlu1 %v9298_v15, %s8762_s30  ;;  %2682 = vrot.lane.b32.xlu0 %v9306_v30, %s8762_s30 }
 0x330   : > { %v1696_v34 = vpop.permute.xlu1 %1695 }
 0x332   : > { %2684 = vrot.lane.b32.xlu1 %v9312_v23, %s8762_s30  ;;  %2690 = vrot.lane.b32.xlu0 %v9310_v18, %s8762_s30 }
 0x334   : > { %v1704_v35 = vpop.permute.xlu1 %1703  ;;  %v1698_v42 = vpop.permute.xlu0 %1697 }
 0x335   : > { %v1715_v37 = vsel %vm469_vm2, %v1704_v35, %v1696_v34  ;;  %v1711_v39 = vsel %vm469_vm2, %v1696_v34, %v1704_v35  ;;  %v1738_v35 = vld [vmem:[#allocation4 + $0x28] sm:$0xff] }
 0x336   : > { %2692 = vrot.lane.b32.xlu1 %v9318_v25, %s8762_s30  ;;  %2833 = vrot.lane.b32.xlu0 %v9286_v6, %s8764_s20  ;;  %v1728_v44 = vmul.f32 %v7457_v36, %v1715_v37  ;;  %v1729_v47 = vmul.f32 %v7458_v38, %v1711_v39 }
 0x338   : > { %v1706_v43 = vpop.permute.xlu1 %1705 }
 0x339   : > { %v1712_v45 = vsel %vm469_vm2, %v1698_v42, %v1706_v43  ;;  %v1716_v46 = vsel %vm469_vm2, %v1706_v43, %v1698_v42 }
 0x33a   : > { %v1730_v48 = vmul.f32 %v7459_v40, %v1716_v46  ;;  %v1731_v49 = vmul.f32 %v7460_v41, %v1712_v45  ;;  %2835 = vrot.lane.b32.xlu1 %v9292_v14, %s8764_s20  ;;  %2841 = vrot.lane.b32.xlu0 %v9290_v62, %s8764_s20  ;;  %v1679_v40 = vld [vmem:[%s11708_s2 + $0x20] sm:$0xff]  ;;  %v1680_v41 = vld [vmem:[%s11708_s2 + $0x28] sm:$0xff] }
 0x33b   : > { %v1682_v45 = vld [vmem:[%s11708_s2 + $0x38] sm:$0xff]  ;;  %v1739_v46 = vld [vmem:[#allocation4 + $0x30] sm:$0xff] }
 0x33c   : > { %v7667_v51 = vpack.c.bf16 %v1730_v48, %v1728_v44  ;;  %v7665_v52 = vpack.c.bf16 %v1731_v49, %v1729_v47  ;;  %v1681_v44 = vld [vmem:[%s11708_s2 + $0x30] sm:$0xff] }
 0x33e   : > { %2843 = vrot.lane.b32.xlu1 %v9298_v15, %s8764_s20  ;;  %2837 = vrot.lane.b32.xlu0 %v9306_v30, %s8764_s20 }
 0x33f   : > { %7666 = vmatprep.subr.bf16.mxu1 %v7665_v52 }
 0x340   : > { %7668 = vmatpush1.bf16.msra.mxu1 %v7667_v51  ;;  %v1700_v54 = vpop.permute.xlu0 %1699 }
 0x342   : > { %2839 = vrot.lane.b32.xlu1 %v9312_v23, %s8764_s20  ;;  %2845 = vrot.lane.b32.xlu0 %v9310_v18, %s8764_s20 }
 0x344   : > { %v1708_v55 = vpop.permute.xlu0 %1707  ;;  %v1702_v56 = vpop.permute.xlu1 %1701 }
 0x345   : > { %v1713_v60 = vsel %vm469_vm2, %v1700_v54, %v1708_v55  ;;  %v1717_v61 = vsel %vm469_vm2, %v1708_v55, %v1700_v54 }
 0x346   : > { %2847 = vrot.lane.b32.xlu1 %v9318_v25, %s8764_s20  ;;  %v1732_v53 = vmul.f32 %v7461_v57, %v1717_v61  ;;  %v1733_v5 = vmul.f32 %v7462_v58, %v1713_v60  ;;  %v1740_v57 = vld [vmem:[#allocation4 + $0x38] sm:$0xff] }
 0x348   : > { %v1652_v2 = vpop.permute.xlu0 %1651  ;;  %v1710_v3 = vpop.permute.xlu1 %1709 }
 0x349   : > { %v1714_v50 = vsel %vm469_vm2, %v1702_v56, %v1710_v3  ;;  %v1718_v4 = vsel %vm469_vm2, %v1710_v3, %v1702_v56 }
 0x34a   : > { %v1734_v9 = vmul.f32 %v7463_v63, %v1718_v4  ;;  %v1735_v10 = vmul.f32 %v7464_v1, %v1714_v50  ;;  %v7473_v1 = vld [vmem:[%s11708_s2 + $0x80] sm:$0xff]  ;;  %v7475_v4 = vld [vmem:[%s11708_s2 + $0x90] sm:$0xff] }
 0x34c   : > { %v7671_v11 = vpack.c.bf16 %v1734_v9, %v1732_v53  ;;  %v1660_v59 = vpop.permute.xlu0 %1659  ;;  %v1654_v12 = vpop.permute.xlu1 %1653  ;;  %v7669_v13 = vpack.c.bf16 %v1735_v10, %v1733_v5  ;;  %v7476_v53 = vld [vmem:[%s11708_s2 + $0x98] sm:$0xff]  ;;  %v1691_v5 = vld [vmem:[#allocation4] sm:$0xff] }
 0x34d   : > { %v1667_v20 = vsel %vm454_vm3, %v1652_v2, %v1660_v59  ;;  %v1671_v21 = vsel %vm454_vm3, %v1660_v59, %v1652_v2  ;;  %v7474_v2 = vld [vmem:[%s11708_s2 + $0x88] sm:$0xff] }
 0x34e   : > { %7670 = vmatprep.subr.bf16.mxu1 %v7669_v13  ;;  %v1683_v32 = vmul.f32 %v1675_v17, %v1671_v21  ;;  %v1684_v16 = vmul.f32 %v1676_v19, %v1667_v20  ;;  %v1692_v20 = vld [vmem:[#allocation4 + $0x8] sm:$0xff] }
 0x34f   : > { %7672 = vmatpush1.bf16.msra.mxu1 %v7671_v11 }
 0x350   : > { %v1656_v27 = vpop.permute.xlu0 %1655  ;;  %v1662_v28 = vpop.permute.xlu1 %1661 }
 0x351   : > { %v1668_v29 = vsel %vm454_vm3, %v1654_v12, %v1662_v28  ;;  %v1672_v31 = vsel %vm454_vm3, %v1662_v28, %v1654_v12  ;;  %v7478_v28 = vld [vmem:[%s11708_s2 + $0xa8] sm:$0xff] }
 0x352   : > { %v1685_v33 = vmul.f32 %v1677_v22, %v1672_v31  ;;  %v1686_v34 = vmul.f32 %v1678_v24, %v1668_v29  ;;  %7465 = vmatmul.mubr.msk.f32.vlgmr.msra.gmra.mrb[12].mxu1 %vm1741_vm9, %v1737_v26 }
 0x353   : > { %1824 = vmatprep.mubr.f32.mxu1 %v8756_v0 }
 0x354   : > { %v7675_v36 = vpack.c.bf16 %v1685_v33, %v1683_v32  ;;  %v1664_v37 = vpop.permute.xlu0 %1663  ;;  %v1658_v38 = vpop.permute.xlu1 %1657  ;;  %v7673_v39 = vpack.c.bf16 %v1686_v34, %v1684_v16  ;;  %v7479_v32 = vld [vmem:[%s11708_s2 + $0xb0] sm:$0xff]  ;;  %v7480_v16 = vld [vmem:[%s11708_s2 + $0xb8] sm:$0xff]  ;;  %v1693_v33 = vld [vmem:[#allocation4 + $0x10] sm:$0xff] }
 0x355   : > { %v1669_v42 = vsel %vm454_vm3, %v1656_v27, %v1664_v37  ;;  %v1673_v43 = vsel %vm454_vm3, %v1664_v37, %v1656_v27  ;;  %v7477_v27 = vld [vmem:[%s11708_s2 + $0xa0] sm:$0xff] }
 0x356   : > { %7466 = vmatmul.mubr.msk.f32.gmra.mrb[14].mxu1 %vm1741_vm9, %v1738_v35  ;;  %7674 = vmatprep.subr.bf16.mxu1 %v7673_v39  ;;  %v1687_v52 = vmul.f32 %v1679_v40, %v1673_v43  ;;  %v1688_v54 = vmul.f32 %v1680_v41, %v1669_v42  ;;  %v1694_v42 = vld [vmem:[#allocation4 + $0x18] sm:$0xff] }
 0x357   : > { %7676 = vmatpush1.bf16.msra.mxu1 %v7675_v36  ;;  %1830 = vmatprep.mubr.f32.mxu1 %v8756_v0 }
 0x358   : > { %v1945_v47 = vpop.permute.xlu0 %1944  ;;  %v1666_v48 = vpop.permute.xlu1 %1665 }
 0x359   : > { %v1670_v49 = vsel %vm454_vm3, %v1658_v38, %v1666_v48  ;;  %v1674_v51 = vsel %vm454_vm3, %v1666_v48, %v1658_v38  ;;  %v7486_v48 = vld [vmem:[%s11708_s2 + $0xc8] sm:$0xff] }
 0x35a   : > { %v1689_v55 = vmul.f32 %v1681_v44, %v1674_v51  ;;  %v1690_v56 = vmul.f32 %v1682_v45, %v1670_v49  ;;  %7467 = vmatmul.mubr.msk.f32.gmra.mrb[16].mxu1 %vm1741_vm9, %v1739_v46 }
 0x35b   : > { %1836 = vmatprep.mubr.f32.mxu1 %v8756_v0 }
 0x35c   : > { %v7679_v58 = vpack.c.bf16 %v1689_v55, %v1687_v52  ;;  %v1953_v60 = vpop.permute.xlu0 %1952  ;;  %v1947_v61 = vpop.permute.xlu1 %1946  ;;  %v7677_v63 = vpack.c.bf16 %v1690_v56, %v1688_v54  ;;  %v7487_v52 = vld [vmem:[%s11708_s2 + $0xd0] sm:$0xff]  ;;  %v7488_v54 = vld [vmem:[%s11708_s2 + $0xd8] sm:$0xff] }
 0x35d   : > { %v1960_v3 = vsel %vm689_vm5, %v1945_v47, %v1953_v60  ;;  %v1964_v50 = vsel %vm689_vm5, %v1953_v60, %v1945_v47  ;;  %v7485_v47 = vld [vmem:[%s11708_s2 + $0xc0] sm:$0xff]  ;;  %v1986_v55 = vld [vmem:[#allocation4 + $0x40] sm:$0xff] }
 0x35e   : > { %7468 = vmatmul.mubr.msk.f32.gmra.mrb[18].mxu1 %vm1741_vm9, %v1740_v57  ;;  %7678 = vmatprep.subr.bf16.mxu1 %v7677_v63  ;;  %v1977_v12 = vmul.f32 %v7473_v1, %v1964_v50  ;;  %v1978_v13 = vmul.f32 %v7474_v2, %v1960_v3  ;;  %v1987_v3 = vld [vmem:[#allocation4 + $0x48] sm:$0xff] }
 0x35f   : > { %7680 = vmatpush1.bf16.msra.mxu1 %v7679_v58  ;;  %1919 = vmatprep.mubr.f32.mxu1 %v8756_v0 }
 0x360   : > { %v1949_v9 = vpop.permute.xlu0 %1948  ;;  %v1955_v10 = vpop.permute.xlu1 %1954 }
 0x361   : > { %v1961_v11 = vsel %vm689_vm5, %v1947_v61, %v1955_v10  ;;  %v1965_v59 = vsel %vm689_vm5, %v1955_v10, %v1947_v61  ;;  %v7490_v10 = vld [vmem:[%s11708_s2 + $0xe8] sm:$0xff] }
 0x362   : > { %v1979_v17 = vmul.f32 %v7475_v4, %v1965_v59  ;;  %v1980_v19 = vmul.f32 %v7476_v53, %v1961_v11  ;;  %7469 = vmatmul.mubr.msk.f32.vlgmr.msra.gmra.mrb[12].mxu1 %vm1741_vm9, %v1691_v5 }
 0x363   : > { %1925 = vmatprep.mubr.f32.mxu1 %v8756_v0 }
 0x364   : > { %v7683_v21 = vpack.c.bf16 %v1979_v17, %v1977_v12  ;;  %v1957_v22 = vpop.permute.xlu0 %1956  ;;  %v1951_v24 = vpop.permute.xlu1 %1950  ;;  %v7681_v26 = vpack.c.bf16 %v1980_v19, %v1978_v13  ;;  %v7491_v12 = vld [vmem:[%s11708_s2 + $0xf0] sm:$0xff]  ;;  %v7492_v13 = vld [vmem:[%s11708_s2 + $0xf8] sm:$0xff]  ;;  %v1988_v17 = vld [vmem:[#allocation4 + $0x50] sm:$0xff] }
 0x365   : > { %v1962_v29 = vsel %vm689_vm5, %v1949_v9, %v1957_v22  ;;  %v1966_v31 = vsel %vm689_vm5, %v1957_v22, %v1949_v9  ;;  %v7489_v9 = vld [vmem:[%s11708_s2 + $0xe0] sm:$0xff] }
 0x366   : > { %7470 = vmatmul.mubr.msk.f32.gmra.mrb[14].mxu1 %vm1741_vm9, %v1692_v20  ;;  %7682 = vmatprep.subr.bf16.mxu1 %v7681_v26  ;;  %v1981_v38 = vmul.f32 %v7477_v27, %v1966_v31  ;;  %v1982_v39 = vmul.f32 %v7478_v28, %v1962_v29  ;;  %v1989_v29 = vld [vmem:[#allocation4 + $0x58] sm:$0xff] }
 0x367   : > { %7684 = vmatpush1.bf16.msra.mxu1 %v7683_v21  ;;  %1931 = vmatprep.mubr.f32.mxu1 %v8756_v0 }
 0x368   : > { %v2100_v34 = vpop.permute.xlu0 %2099  ;;  %v1959_v35 = vpop.permute.xlu1 %1958 }
 0x369   : > { %v1963_v36 = vsel %vm689_vm5, %v1951_v24, %v1959_v35  ;;  %v1967_v37 = vsel %vm689_vm5, %v1959_v35, %v1951_v24  ;;  %v7504_v35 = vld [vmem:[%s11708_s2 + $0x158] sm:$0xff] }
 0x36a   : > { %v1983_v40 = vmul.f32 %v7479_v32, %v1967_v37  ;;  %v1984_v41 = vmul.f32 %v7480_v16, %v1963_v36  ;;  %7471 = vmatmul.mubr.msk.f32.gmra.mrb[16].mxu1 %vm1741_vm9, %v1693_v33  ;;  %v2141_v36 = vld [vmem:[#allocation4 + $0x60] sm:$0xff] }
 0x36b   : > { %1937 = vmatprep.mubr.f32.mxu1 %v8756_v0 }
 0x36c   : > { %v7687_v43 = vpack.c.bf16 %v1983_v40, %v1981_v38  ;;  %v2108_v44 = vpop.permute.xlu0 %2107  ;;  %v2102_v45 = vpop.permute.xlu1 %2101  ;;  %v7685_v46 = vpack.c.bf16 %v1984_v41, %v1982_v39  ;;  %v7502_v39 = vld [vmem:[%s11708_s2 + $0x148] sm:$0xff] }
 0x36d   : > { %v2115_v49 = vsel %vm815_vm7, %v2100_v34, %v2108_v44  ;;  %v2119_v51 = vsel %vm815_vm7, %v2108_v44, %v2100_v34  ;;  %v7697_v34 = vpack.c.bf16 %v9298_v15, %v9290_v62  ;;  %v7701_v44 = vpack.c.bf16 %v9318_v25, %v9310_v18 }
 0x36e   : > { %7472 = vmatmul.mubr.msk.f32.gmra.mrb[18].mxu1 %vm1741_vm9, %v1694_v42  ;;  %7686 = vmatprep.subr.bf16.mxu1 %v7685_v46  ;;  %v2132_v61 = vmul.f32 %v7485_v47, %v2119_v51  ;;  %v2133_v63 = vmul.f32 %v7486_v48, %v2115_v49  ;;  %v7699_v42 = vpack.c.bf16 %v9292_v14, %v9286_v6 }
 0x36f   : > { %7688 = vmatpush1.bf16.msra.mxu1 %v7687_v43  ;;  %2066 = vmatprep.mubr.f32.mxu1 %v8756_v0  ;;  %v7703_v49 = vpack.c.bf16 %v9312_v23, %v9306_v30 }
 0x370   : > { %v2104_v56 = vpop.permute.xlu0 %2103  ;;  %v2110_v57 = vpop.permute.xlu1 %2109 }
 0x371   : > { %v2116_v58 = vsel %vm815_vm7, %v2102_v45, %v2110_v57  ;;  %v2120_v60 = vsel %vm815_vm7, %v2110_v57, %v2102_v45  ;;  %v2142_v45 = vld [vmem:[#allocation4 + $0x68] sm:$0xff] }
 0x372   : > { %v2134_v1 = vmul.f32 %v7487_v52, %v2120_v60  ;;  %v2135_v2 = vmul.f32 %v7488_v54, %v2116_v58  ;;  %7481 = vmatmul.mubr.msk.f32.vlgmr.msra.gmra.mrb[12].mxu1 %vm1741_vm9, %v1986_v55  ;;  %v2143_v52 = vld [vmem:[#allocation4 + $0x70] sm:$0xff]  ;;  %v7508_v58 = vld [vmem:[%s11708_s2 + $0x178] sm:$0xff] }
 0x373   : > { %2072 = vmatprep.mubr.f32.mxu1 %v8756_v0 }
 0x374   : > { %v7691_v50 = vpack.c.bf16 %v2134_v1, %v2132_v61  ;;  %v2112_v4 = vpop.permute.xlu0 %2111  ;;  %v2106_v53 = vpop.permute.xlu1 %2105  ;;  %v7689_v5 = vpack.c.bf16 %v2135_v2, %v2133_v63  ;;  %v2144_v61 = vld [vmem:[#allocation4 + $0x78] sm:$0xff]  ;;  %v7501_v63 = vld [vmem:[%s11708_s2 + $0x140] sm:$0xff] }
 0x375   : > { %v2117_v11 = vsel %vm815_vm7, %v2104_v56, %v2112_v4  ;;  %v2121_v59 = vsel %vm815_vm7, %v2112_v4, %v2104_v56  ;;  %v7503_v56 = vld [vmem:[%s11708_s2 + $0x150] sm:$0xff]  ;;  %v7506_v4 = vld [vmem:[%s11708_s2 + $0x168] sm:$0xff] }
 0x376   : > { %7482 = vmatmul.mubr.msk.f32.gmra.mrb[14].mxu1 %vm1741_vm9, %v1987_v3  ;;  %7690 = vmatprep.subr.bf16.mxu1 %v7689_v5  ;;  %v2136_v24 = vmul.f32 %v7489_v9, %v2121_v59  ;;  %v2137_v26 = vmul.f32 %v7490_v10, %v2117_v11  ;;  %v7507_v5 = vld [vmem:[%s11708_s2 + $0x170] sm:$0xff]  ;;  %v7514_v59 = vld [vmem:[%s11708_s2 + $0x188] sm:$0xff] }
 0x377   : > { %7692 = vmatpush1.bf16.msra.mxu1 %v7691_v50  ;;  %2078 = vmatprep.mubr.f32.mxu1 %v8756_v0 }
 0x378   : > { %v2369_v19 = vpop.permute.xlu0 %2368  ;;  %v2114_v20 = vpop.permute.xlu1 %2113 }
 0x379   : > { %v2118_v21 = vsel %vm815_vm7, %v2106_v53, %v2114_v20  ;;  %v2122_v22 = vsel %vm815_vm7, %v2114_v20, %v2106_v53 }
 0x37a   : > { %v2138_v27 = vmul.f32 %v7491_v12, %v2122_v22  ;;  %v2139_v28 = vmul.f32 %v7492_v13, %v2118_v21  ;;  %7483 = vmatmul.mubr.msk.f32.gmra.mrb[16].mxu1 %vm1741_vm9, %v1988_v17  ;;  %v7516_v13 = vld [vmem:[%s11708_s2 + $0x198] sm:$0xff]  ;;  %v2255_v17 = vld [vmem:[#allocation4 + $0x80] sm:$0xff] }
 0x37b   : > { %2084 = vmatprep.mubr.f32.mxu1 %v8756_v0 }
 0x37c   : > { %v7695_v31 = vpack.c.bf16 %v2138_v27, %v2136_v24  ;;  %v2377_v32 = vpop.permute.xlu0 %2376  ;;  %v2371_v16 = vpop.permute.xlu1 %2370  ;;  %v7693_v33 = vpack.c.bf16 %v2139_v28, %v2137_v26 }
 0x37d   : > { %v2388_v40 = vsel %vm1055_vm1, %v2377_v32, %v2369_v19  ;;  %v2384_v1 = vsel %vm1055_vm1, %v2369_v19, %v2377_v32  ;;  %v7505_v19 = vld [vmem:[%s11708_s2 + $0x160] sm:$0xff] }
 0x37e   : > { %7484 = vmatmul.mubr.msk.f32.gmra.mrb[18].mxu1 %vm1741_vm9, %v1989_v29  ;;  %7694 = vmatprep.subr.bf16.mxu1 %v7693_v33  ;;  %v2402_v46 = vmul.f32 %v7502_v39, %v2388_v40  ;;  %v2401_v11 = vmul.f32 %v7501_v63, %v2384_v1  ;;  %v2256_v33 = vld [vmem:[#allocation4 + $0x88] sm:$0xff]  ;;  %v2410_v1 = vld [vmem:[#allocation4 + $0xa0] sm:$0xff] }
 0x37f   : > { %7696 = vmatpush1.bf16.msra.mxu1 %v7695_v31  ;;  %2221 = vmatprep.mubr.f32.mxu1 %v8756_v0  ;;  %v7528_v63 = vld [vmem:[%s11708_s2 + $0x1d8] sm:$0xff] }
 0x380   : > { %v2373_v37 = vpop.permute.xlu0 %2372  ;;  %7698 = vmatprep.subr.bf16.mxu1 %v7697_v34  ;;  %v2379_v38 = vpop.permute.xlu1 %2378 }
 0x381   : > { %v2389_v41 = vsel %vm1055_vm1, %v2379_v38, %v2371_v16  ;;  %v2385_v57 = vsel %vm1055_vm1, %v2371_v16, %v2379_v38  ;;  %v2257_v38 = vld [vmem:[#allocation4 + $0x90] sm:$0xff] }
 0x382   : > { %v2404_v43 = vmul.f32 %v7504_v35, %v2389_v41  ;;  %7493 = vmatmul.mubr.msk.f32.vlgmr.msra.gmra.mrb[12].mxu1 %vm1741_vm9, %v2141_v36  ;;  %v2403_v50 = vmul.f32 %v7503_v56, %v2385_v57  ;;  %v7515_v41 = vld [vmem:[%s11708_s2 + $0x190] sm:$0xff] }
 0x383   : > { %7700 = vmatpush1.bf16.msra.mxu1 %v7699_v42  ;;  %2227 = vmatprep.mubr.f32.mxu1 %v8756_v0  ;;  %v7519_v56 = vld [vmem:[%s11708_s2 + $0x1b0] sm:$0xff] }
 0x384   : > { %v2381_v47 = vpop.permute.xlu0 %2380  ;;  %7702 = vmatprep.subr.bf16.mxu1 %v7701_v44  ;;  %v2375_v48 = vpop.permute.xlu1 %2374  ;;  %v7705_v51 = vpack.c.bf16 %v2404_v43, %v2402_v46  ;;  %v7707_v26 = vpack.c.bf16 %v2403_v50, %v2401_v11  ;;  %v7520_v43 = vld [vmem:[%s11708_s2 + $0x1b8] sm:$0xff]  ;;  %v7513_v46 = vld [vmem:[%s11708_s2 + $0x180] sm:$0xff] }
 0x385   : > { %v2390_v53 = vsel %vm1055_vm1, %v2381_v47, %v2373_v37  ;;  %v2386_v20 = vsel %vm1055_vm1, %v2373_v37, %v2381_v47 }
 0x386   : > { %7494 = vmatmul.mubr.msk.f32.gmra.mrb[14].mxu1 %vm1741_vm9, %v2142_v45  ;;  %v2406_v21 = vmul.f32 %v7506_v4, %v2390_v53  ;;  %v2405_v16 = vmul.f32 %v7505_v19, %v2386_v20  ;;  %v2258_v45 = vld [vmem:[#allocation4 + $0x98] sm:$0xff] }
 0x387   : > { %7704 = vmatpush1.bf16.msra.mxu1 %v7703_v49  ;;  %2233 = vmatprep.mubr.f32.mxu1 %v8756_v0 }
 0x388   : > { %v9640_v54 = vpop.permute.xlu0 %2523  ;;  %7706 = vmatprep.subr.bf16.mxu1 %v7705_v51  ;;  %v2383_v55 = vpop.permute.xlu1 %2382 }
 0x389   : > { %v2391_v60 = vsel %vm1055_vm1, %v2383_v55, %v2375_v48  ;;  %v2387_v9 = vsel %vm1055_vm1, %v2375_v48, %v2383_v55 }
 0x38a   : > { %7495 = vmatmul.mubr.msk.f32.gmra.mrb[16].mxu1 %vm1741_vm9, %v2143_v52  ;;  %v2408_v10 = vmul.f32 %v7508_v58, %v2391_v60  ;;  %v2407_v27 = vmul.f32 %v7507_v5, %v2387_v9  ;;  %v7518_v52 = vld [vmem:[%s11708_s2 + $0x1a8] sm:$0xff] }
 0x38b   : > { %2239 = vmatprep.mubr.f32.mxu1 %v8756_v0  ;;  %v7526_v60 = vld [vmem:[%s11708_s2 + $0x1c8] sm:$0xff] }
 0x38c   : > { %v2532_v2 = vpop.permute.xlu0 %2531  ;;  %v2526_v3 = vpop.permute.xlu1 %2525  ;;  %v7709_v32 = vpack.c.bf16 %v2408_v10, %v2406_v21  ;;  %v7711_v37 = vpack.c.bf16 %v2407_v27, %v2405_v16  ;;  %v2413_v16 = vld [vmem:[#allocation4 + $0xb8] sm:$0xff] }
 0x38d   : > { %v2543_v12 = vsel %vm1181_vm4, %v2532_v2, %v9640_v54  ;;  %v2539_v47 = vsel %vm1181_vm4, %v9640_v54, %v2532_v2  ;;  %v7517_v2 = vld [vmem:[%s11708_s2 + $0x1a0] sm:$0xff] }
 0x38e   : > { %7496 = vmatmul.mubr.msk.f32.gmra.mrb[18].mxu1 %vm1741_vm9, %v2144_v61  ;;  %v2557_v29 = vmul.f32 %v7514_v59, %v2543_v12  ;;  %v2556_v54 = vmul.f32 %v7513_v46, %v2539_v47  ;;  %v7540_v46 = vld [vmem:[%s11708_s2 + $0x218] sm:$0xff]  ;;  %v2565_v47 = vld [vmem:[#allocation4 + $0xc0] sm:$0xff] }
 0x38f   : > { %2335 = vmatprep.mubr.f32.mxu1 %v8756_v0 }
 0x390   : > { %v2528_v22 = vpop.permute.xlu0 %2527  ;;  %v2534_v24 = vpop.permute.xlu1 %2533 }
 0x391   : > { %v2544_v28 = vsel %vm1181_vm4, %v2534_v24, %v2526_v3  ;;  %v2540_v42 = vsel %vm1181_vm4, %v2526_v3, %v2534_v24  ;;  %v2412_v24 = vld [vmem:[#allocation4 + $0xb0] sm:$0xff] }
 0x392   : > { %v2559_v31 = vmul.f32 %v7516_v13, %v2544_v28  ;;  %7497 = vmatmul.mubr.msk.f32.vlgmr.msra.gmra.mrb[12].mxu1 %vm1741_vm9, %v2255_v17  ;;  %v2558_v51 = vmul.f32 %v7515_v41, %v2540_v42  ;;  %v2411_v17 = vld [vmem:[#allocation4 + $0xa8] sm:$0xff]  ;;  %v7527_v28 = vld [vmem:[%s11708_s2 + $0x1d0] sm:$0xff] }
 0x393   : > { %7708 = vmatpush1.bf16.msra.mxu1 %v7707_v26  ;;  %2341 = vmatprep.mubr.f32.mxu1 %v8756_v0  ;;  %v7531_v41 = vld [vmem:[%s11708_s2 + $0x1f0] sm:$0xff] }
 0x394   : > { %7710 = vmatprep.subr.bf16.mxu1 %v7709_v32  ;;  %v2536_v34 = vpop.permute.xlu0 %2535  ;;  %v2530_v35 = vpop.permute.xlu1 %2529  ;;  %v7713_v36 = vpack.c.bf16 %v2559_v31, %v2557_v29  ;;  %v7715_v5 = vpack.c.bf16 %v2558_v51, %v2556_v54  ;;  %v7532_v31 = vld [vmem:[%s11708_s2 + $0x1f8] sm:$0xff] }
 0x395   : > { %v2545_v55 = vsel %vm1181_vm4, %v2536_v34, %v2528_v22  ;;  %v2541_v3 = vsel %vm1181_vm4, %v2528_v22, %v2536_v34 }
 0x396   : > { %7498 = vmatmul.mubr.msk.f32.gmra.mrb[14].mxu1 %vm1741_vm9, %v2256_v33  ;;  %v2561_v50 = vmul.f32 %v7518_v52, %v2545_v55  ;;  %v2560_v13 = vmul.f32 %v7517_v2, %v2541_v3  ;;  %v7525_v33 = vld [vmem:[%s11708_s2 + $0x1c0] sm:$0xff] }
 0x397   : > { %7712 = vmatpush1.bf16.msra.mxu1 %v7711_v37  ;;  %2347 = vmatprep.mubr.f32.mxu1 %v8756_v0 }
 0x398   : > { %7714 = vmatprep.subr.bf16.mxu1 %v7713_v36  ;;  %v9691_v39 = vpop.permute.xlu0 %2678  ;;  %v2538_v40 = vpop.permute.xlu1 %2537 }
 0x399   : > { %v2546_v44 = vsel %vm1181_vm4, %v2538_v40, %v2530_v35  ;;  %v2542_v57 = vsel %vm1181_vm4, %v2530_v35, %v2538_v40 }
 0x39a   : > { %7499 = vmatmul.mubr.msk.f32.gmra.mrb[16].mxu1 %vm1741_vm9, %v2257_v38  ;;  %v2563_v58 = vmul.f32 %v7520_v43, %v2546_v44  ;;  %v2562_v9 = vmul.f32 %v7519_v56, %v2542_v57  ;;  %v7530_v38 = vld [vmem:[%s11708_s2 + $0x1e8] sm:$0xff] }
 0x39b   : > { %2353 = vmatprep.mubr.f32.mxu1 %v8756_v0  ;;  %v7538_v44 = vld [vmem:[%s11708_s2 + $0x208] sm:$0xff] }
 0x39c   : > { %v2687_v48 = vpop.permute.xlu0 %2686  ;;  %v2681_v49 = vpop.permute.xlu1 %2680  ;;  %v7717_v12 = vpack.c.bf16 %v2563_v58, %v2561_v50  ;;  %v7719_v22 = vpack.c.bf16 %v2562_v9, %v2560_v13  ;;  %v7537_v13 = vld [vmem:[%s11708_s2 + $0x200] sm:$0xff] }
 0x39d   : > { %v2698_v61 = vsel %vm1307_vm6, %v2687_v48, %v9691_v39  ;;  %v2694_v34 = vsel %vm1307_vm6, %v9691_v39, %v2687_v48  ;;  %v7529_v48 = vld [vmem:[%s11708_s2 + $0x1e0] sm:$0xff] }
 0x39e   : > { %7500 = vmatmul.mubr.msk.f32.gmra.mrb[18].mxu1 %vm1741_vm9, %v2258_v45  ;;  %v2712_v11 = vmul.f32 %v7526_v60, %v2698_v61  ;;  %v2711_v39 = vmul.f32 %v7525_v33, %v2694_v34 }
 0x39f   : > { %2490 = vmatprep.mubr.f32.mxu1 %v8756_v0 }
 0x3a0   : > { %v2683_v4 = vpop.permute.xlu0 %2682  ;;  %v2689_v53 = vpop.permute.xlu1 %2688 }
 0x3a1   : > { %v2699_v10 = vsel %vm1307_vm6, %v2689_v53, %v2681_v49  ;;  %v2695_v29 = vsel %vm1307_vm6, %v2681_v49, %v2689_v53 }
 0x3a2   : > { %v2714_v59 = vmul.f32 %v7528_v63, %v2699_v10  ;;  %7509 = vmatmul.mubr.msk.f32.vlgmr.msra.gmra.mrb[12].mxu1 %vm1741_vm9, %v2410_v1  ;;  %v2713_v37 = vmul.f32 %v7527_v28, %v2695_v29  ;;  %v2566_v63 = vld [vmem:[#allocation4 + $0xc8] sm:$0xff]  ;;  %v7541_v29 = vld [vmem:[%s11708_s2 + $0x220] sm:$0xff] }
 0x3a3   : > { %7716 = vmatpush1.bf16.msra.mxu1 %v7715_v5  ;;  %2496 = vmatprep.mubr.f32.mxu1 %v8756_v0  ;;  %v7539_v5 = vld [vmem:[%s11708_s2 + $0x210] sm:$0xff] }
 0x3a4   : > { %7718 = vmatprep.subr.bf16.mxu1 %v7717_v12  ;;  %v2691_v19 = vpop.permute.xlu0 %2690  ;;  %v2685_v20 = vpop.permute.xlu1 %2684  ;;  %v7721_v21 = vpack.c.bf16 %v2714_v59, %v2712_v11  ;;  %v7723_v55 = vpack.c.bf16 %v2713_v37, %v2711_v39  ;;  %v7544_v11 = vld [vmem:[%s11708_s2 + $0x238] sm:$0xff]  ;;  %v2568_v12 = vld [vmem:[#allocation4 + $0xd8] sm:$0xff] }
 0x3a5   : > { %v2700_v40 = vsel %vm1307_vm6, %v2691_v19, %v2683_v4  ;;  %v2696_v49 = vsel %vm1307_vm6, %v2683_v4, %v2691_v19  ;;  %v2567_v4 = vld [vmem:[#allocation4 + $0xd0] sm:$0xff]  ;;  %v2878_v39 = vld [vmem:[#allocation4 + $0x118] sm:$0xff] }
 0x3a6   : > { %7510 = vmatmul.mubr.msk.f32.gmra.mrb[14].mxu1 %vm1741_vm9, %v2411_v17  ;;  %v2716_v51 = vmul.f32 %v7530_v38, %v2700_v40  ;;  %v2715_v61 = vmul.f32 %v7529_v48, %v2696_v49  ;;  %v2722_v38 = vld [vmem:[#allocation4 + $0xf0] sm:$0xff]  ;;  %v2723_v40 = vld [vmem:[#allocation4 + $0xf8] sm:$0xff] }
 0x3a7   : > { %7720 = vmatpush1.bf16.msra.mxu1 %v7719_v22  ;;  %2502 = vmatprep.mubr.f32.mxu1 %v8756_v0  ;;  %v7543_v22 = vld [vmem:[%s11708_s2 + $0x230] sm:$0xff] }
 0x3a8   : > { %7722 = vmatprep.subr.bf16.mxu1 %v7721_v21  ;;  %v2834_v26 = vpop.permute.xlu0 %2833  ;;  %v2693_v27 = vpop.permute.xlu1 %2692 }
 0x3a9   : > { %v2701_v32 = vsel %vm1307_vm6, %v2693_v27, %v2685_v20  ;;  %v2697_v42 = vsel %vm1307_vm6, %v2685_v20, %v2693_v27  ;;  %v7542_v20 = vld [vmem:[%s11708_s2 + $0x228] sm:$0xff] }
 0x3aa   : > { %7511 = vmatmul.mubr.msk.f32.gmra.mrb[16].mxu1 %vm1741_vm9, %v2412_v24  ;;  %v2718_v43 = vmul.f32 %v7532_v31, %v2701_v32  ;;  %v2717_v56 = vmul.f32 %v7531_v41, %v2697_v42  ;;  %v2875_v41 = vld [vmem:[#allocation4 + $0x100] sm:$0xff]  ;;  %v2876_v42 = vld [vmem:[#allocation4 + $0x108] sm:$0xff] }
 0x3ab   : > { %2508 = vmatprep.mubr.f32.mxu1 %v8756_v0 }
 0x3ac   : > { %v2842_v35 = vpop.permute.xlu0 %2841  ;;  %v2836_v36 = vpop.permute.xlu1 %2835  ;;  %v7725_v60 = vpack.c.bf16 %v2718_v43, %v2716_v51  ;;  %v7727_v50 = vpack.c.bf16 %v2717_v56, %v2715_v61  ;;  %v2877_v43 = vld [vmem:[#allocation4 + $0x110] sm:$0xff] }
 0x3ad   : > { %v2853_v45 = vsel %vm1433_vm8, %v2842_v35, %v2834_v26  ;;  %v2849_v17 = vsel %vm1433_vm8, %v2834_v26, %v2842_v35  ;;  %v2720_v26 = vld [vmem:[#allocation4 + $0xe0] sm:$0xff] }
 0x3ae   : > { %7512 = vmatmul.mubr.msk.f32.gmra.mrb[18].mxu1 %vm1741_vm9, %v2413_v16  ;;  %v2867_v58 = vmul.f32 %v7538_v44, %v2853_v45  ;;  %v2866_v28 = vmul.f32 %v7537_v13, %v2849_v17 }
 0x3af   : > { %2645 = vmatprep.mubr.f32.mxu1 %v8756_v0 }
 0x3b0   : > { %v2844_v52 = vpop.permute.xlu1 %2843  ;;  %v2838_v1 = vpop.permute.xlu0 %2837 }
 0x3b1   : > { %v2854_v57 = vsel %vm1433_vm8, %v2844_v52, %v2836_v36  ;;  %v2850_v9 = vsel %vm1433_vm8, %v2836_v36, %v2844_v52  ;;  %v2721_v36 = vld [vmem:[#allocation4 + $0xe8] sm:$0xff] }
 0x3b2   : > { %v2869_v54 = vmul.f32 %v7540_v46, %v2854_v57  ;;  %7521 = vmatmul.mubr.msk.f32.vlgmr.msra.gmra.mrb[12].mxu1 %vm1741_vm9, %v2565_v47  ;;  %v2868_v19 = vmul.f32 %v7539_v5, %v2850_v9 }
 0x3b3   : > { %7724 = vmatpush1.bf16.msra.mxu1 %v7723_v55  ;;  %2651 = vmatprep.mubr.f32.mxu1 %v8756_v0 }
 0x3b4   : > { %7726 = vmatprep.subr.bf16.mxu1 %v7725_v60  ;;  %v2840_v2 = vpop.permute.xlu1 %2839  ;;  %v7729_v3 = vpack.c.bf16 %v2869_v54, %v2867_v58  ;;  %v2846_v10 = vpop.permute.xlu0 %2845  ;;  %v7731_v16 = vpack.c.bf16 %v2868_v19, %v2866_v28 }
 0x3b5   : > { %v2855_v21 = vsel %vm1433_vm8, %v2846_v10, %v2838_v1  ;;  %v2851_v31 = vsel %vm1433_vm8, %v2838_v1, %v2846_v10 }
 0x3b6   : > { %7522 = vmatmul.mubr.msk.f32.gmra.mrb[14].mxu1 %vm1741_vm9, %v2566_v63  ;;  %v2871_v32 = vmul.f32 %v7542_v20, %v2855_v21  ;;  %v2870_v35 = vmul.f32 %v7541_v29, %v2851_v31 }
 0x3b7   : > { %7728 = vmatpush1.bf16.msra.mxu1 %v7727_v50  ;;  %2657 = vmatprep.mubr.f32.mxu1 %v8756_v0 }
 0x3b8   : > { %7730 = vmatprep.subr.bf16.mxu1 %v7729_v3  ;;  %v2848_v53 = vpop.permute.xlu1 %2847 }
 0x3b9   : > { %v2856_v59 = vsel %vm1433_vm8, %v2848_v53, %v2840_v2  ;;  %v2852_v24 = vsel %vm1433_vm8, %v2840_v2, %v2848_v53 }
 0x3ba   : > { %7523 = vmatmul.mubr.msk.f32.gmra.mrb[16].mxu1 %vm1741_vm9, %v2567_v4  ;;  %v2873_v27 = vmul.f32 %v7544_v11, %v2856_v59  ;;  %v2872_v33 = vmul.f32 %v7543_v22, %v2852_v24 }
 0x3bb   : > { %2663 = vmatprep.mubr.f32.mxu1 %v8756_v0 }
 0x3bc   : > { %v7733_v34 = vpack.c.bf16 %v2873_v27, %v2871_v32  ;;  %v7735_v37 = vpack.c.bf16 %v2872_v33, %v2870_v35 }
 0x3be   : > { %7524 = vmatmul.mubr.msk.f32.gmra.mrb[18].mxu1 %vm1741_vm9, %v2568_v12 }
 0x3bf   : > { %2800 = vmatprep.mubr.f32.mxu1 %v8756_v0 }
 0x3c2   : > { %7533 = vmatmul.mubr.msk.f32.vlgmr.msra.gmra.mrb[12].mxu1 %vm1741_vm9, %v2720_v26 }
 0x3c3   : > { %7732 = vmatpush1.bf16.msra.mxu1 %v7731_v16  ;;  %2806 = vmatprep.mubr.f32.mxu1 %v8756_v0 }
 0x3c4   : > { %7734 = vmatprep.subr.bf16.mxu1 %v7733_v34 }
 0x3c6   : > { %7534 = vmatmul.mubr.msk.f32.gmra.mrb[14].mxu1 %vm1741_vm9, %v2721_v36 }
 0x3c7   : > { %7736 = vmatpush1.bf16.msra.mxu1 %v7735_v37  ;;  %2812 = vmatprep.mubr.f32.mxu1 %v8756_v0 }
 0x3ca   : > { %7535 = vmatmul.mubr.msk.f32.gmra.mrb[16].mxu1 %vm1741_vm9, %v2722_v38 }
 0x3cb   : > { %2818 = vmatprep.mubr.f32.mxu1 %v8756_v0 }
 0x3ce   : > { %7536 = vmatmul.mubr.msk.f32.gmra.mrb[18].mxu1 %vm1741_vm9, %v2723_v40 }
 0x3cf   : > { %2955 = vmatprep.mubr.f32.mxu1 %v8756_v0 }
 0x3d2   : > { %7545 = vmatmul.mubr.msk.f32.vlgmr.msra.gmra.mrb[12].mxu1 %vm1741_vm9, %v2875_v41 }
 0x3d3   : > { %2961 = vmatprep.mubr.f32.mxu1 %v8756_v0 }
 0x3d6   : > { %7546 = vmatmul.mubr.msk.f32.gmra.mrb[14].mxu1 %vm1741_vm9, %v2876_v42 }
 0x3d7   : > { %2967 = vmatprep.mubr.f32.mxu1 %v8756_v0 }
 0x3da   : > { %7547 = vmatmul.mubr.msk.f32.gmra.mrb[16].mxu1 %vm1741_vm9, %v2877_v43 }
 0x3db   : > { %2973 = vmatprep.mubr.f32.mxu1 %v8756_v0 }
 0x3de   : > { %7548 = vmatmul.mubr.msk.f32.gmra.mrb[18].mxu1 %vm1741_vm9, %v2878_v39 }
 0x3df   : > { %4562 = vmatprep.mubr.f32.mxu1 %v8756_v0 }
 0x4a5   : > { %v9842_v44 = vpop.f32.mrb[12].mxu1 }
 0x4a6   : > { %v9844_v45 = vpop.f32.mrb[13].mxu1  ;;  %v3004_v46 = vmul.f32 %v9842_v44, %v9842_v44 }
 0x4a7   : > { %v2988_v47 = vadd.f32 %v9844_v45, %v9842_v44  ;;  %v3005_v48 = vmul.f32 %v9844_v45, %v9844_v45 }
 0x4a9   : > { %2989 = vadd.xlane.f32.xlu0 %v2988_v47  ;;  %v9852_v49 = vpop.f32.mrb[14].mxu1  ;;  %v3012_v51 = vadd.f32 %v3005_v48, %v3004_v46 }
 0x4aa   : > { %v9854_v52 = vpop.f32.mrb[15].mxu1  ;;  %v3006_v55 = vmul.f32 %v9852_v49, %v9852_v49 }
 0x4ab   : > { %v2991_v56 = vadd.f32 %v9854_v52, %v9852_v49  ;;  %v3007_v57 = vmul.f32 %v9854_v52, %v9854_v52 }
 0x4ad   : > { %3013 = vadd.xlane.f32.xlu0 %v3012_v51  ;;  %2992 = vadd.xlane.f32.xlu1 %v2991_v56  ;;  %v9862_v58 = vpop.f32.mrb[16].mxu1  ;;  %v3015_v54 = vadd.f32 %v3007_v57, %v3006_v55 }
 0x4ae   : > { %v9864_v60 = vpop.f32.mrb[17].mxu1  ;;  %v3008_v61 = vmul.f32 %v9862_v58, %v9862_v58 }
 0x4af   : > { %v2994_v63 = vadd.f32 %v9864_v60, %v9862_v58  ;;  %v3009_v1 = vmul.f32 %v9864_v60, %v9864_v60 }
 0x4b1   : > { %3016 = vadd.xlane.f32.xlu0 %v3015_v54  ;;  %2995 = vadd.xlane.f32.xlu1 %v2994_v63  ;;  %v9872_v2 = vpop.f32.mrb[18].mxu1  ;;  %v3018_v3 = vadd.f32 %v3009_v1, %v3008_v61 }
 0x4b2   : > { %v9874_v50 = vpop.f32.mrb[19].mxu1  ;;  %v3010_v4 = vmul.f32 %v9872_v2, %v9872_v2 }
 0x4b3   : > { %v2997_v53 = vadd.f32 %v9874_v50, %v9872_v2  ;;  %v3011_v5 = vmul.f32 %v9874_v50, %v9874_v50 }
 0x4b5   : > { %3019 = vadd.xlane.f32.xlu1 %v3018_v3  ;;  %2998 = vadd.xlane.f32.xlu0 %v2997_v53  ;;  %v3021_v9 = vadd.f32 %v3011_v5, %v3010_v4 }
 0x4b9   : > { %3022 = vadd.xlane.f32.xlu0 %v3021_v9 }
 0x536   : > { %v2990_v10 = vpop.xlane.xlu0 %2989 }
 0x537   : > { %v3000_v11 = vmul.f32 0.00390625, %v2990_v10 }
 0x539   : > { %v3028_v13 = vmul.f32 %v3000_v11, %v3000_v11  ;;  %v3036_v43 = vsub.f32 %v9842_v44, %v3000_v11  ;;  %v3037_v47 = vsub.f32 %v9844_v45, %v3000_v11 }
 0x53a   : > { %v3014_v59 = vpop.xlane.xlu0 %3013  ;;  %v2993_v12 = vpop.xlane.xlu1 %2992 }
 0x53b   : > { %v3024_v17 = vmul.f32 0.00390625, %v3014_v59  ;;  %v3001_v19 = vmul.f32 0.00390625, %v2993_v12 }
 0x53d   : > { %v3032_v20 = vsub.f32 %v3024_v17, %v3028_v13  ;;  %v3029_v28 = vmul.f32 %v3001_v19, %v3001_v19  ;;  %v3038_v56 = vsub.f32 %v9852_v49, %v3001_v19  ;;  %v3039_v54 = vsub.f32 %v9854_v52, %v3001_v19 }
 0x53e   : > { %v3017_v21 = vpop.xlane.xlu0 %3016  ;;  %v2996_v22 = vpop.xlane.xlu1 %2995 }
 0x53f   : > { %v3044_v24 = vadd.f32 1e-05, %v3032_v20  ;;  %v3025_v27 = vmul.f32 0.00390625, %v3017_v21  ;;  %v3002_v26 = vmul.f32 0.00390625, %v2996_v22 }
 0x541   : > { %8363 = vrsqrt.f32 %v3044_v24  ;;  %v3033_v29 = vsub.f32 %v3025_v27, %v3029_v28  ;;  %v3030_v33 = vmul.f32 %v3002_v26, %v3002_v26  ;;  %v3040_v45 = vsub.f32 %v9862_v58, %v3002_v26  ;;  %v8395_v24 = vld [vmem:[%s11708_s2 + $0x40] sm:$0xff] }
 0x542   : > { %v3020_v31 = vpop.xlane.xlu1 %3019  ;;  %v2999_v32 = vpop.xlane.xlu0 %2998  ;;  %v3041_v4 = vsub.f32 %v9864_v60, %v3002_v26 }
 0x543   : > { %v3045_v16 = vadd.f32 1e-05, %v3033_v29  ;;  %v3026_v34 = vmul.f32 0.00390625, %v3020_v31  ;;  %v3003_v35 = vmul.f32 0.00390625, %v2999_v32  ;;  %v8396_v29 = vld [vmem:[%s11708_s2 + $0x48] sm:$0xff]  ;;  %v8397_v32 = vld [vmem:[%s11708_s2 + $0x50] sm:$0xff] }
 0x545   : > { %8365 = vrsqrt.f32 %v3045_v16  ;;  %v3034_v36 = vsub.f32 %v3026_v34, %v3030_v33  ;;  %v3031_v40 = vmul.f32 %v3003_v35, %v3003_v35  ;;  %v3042_v9 = vsub.f32 %v9872_v2, %v3003_v35  ;;  %v8398_v33 = vld [vmem:[%s11708_s2 + $0x58] sm:$0xff] }
 0x546   : > { %v3023_v37 = vpop.xlane.xlu0 %3022  ;;  %v3043_v58 = vsub.f32 %v9874_v50, %v3003_v35 }
 0x547   : > { %v3046_v38 = vadd.f32 1e-05, %v3034_v36  ;;  %v3027_v41 = vmul.f32 0.00390625, %v3023_v37 }
 0x549   : > { %8367 = vrsqrt.f32 %v3046_v38  ;;  %v3035_v42 = vsub.f32 %v3027_v41, %v3031_v40 }
 0x54b   : > { %v8364_v39 = vpop.eup %8363  ;;  %v3047_v46 = vadd.f32 1e-05, %v3035_v42 }
 0x54c   : > { %v3052_v48 = vmul.f32 %v8364_v39, %v3036_v43  ;;  %v3053_v51 = vmul.f32 %v8364_v39, %v3037_v47  ;;  %v8399_v47 = vld [vmem:[%s11708_s2 + $0x60] sm:$0xff] }
 0x54d   : > { %8369 = vrsqrt.f32 %v3047_v46 }
 0x54e   : > { %v9884_v55 = vmax.f32 %v3052_v48, 0.0  ;;  %v9890_v63 = vmax.f32 %v3053_v51, 0.0  ;;  %v8400_v51 = vld [vmem:[%s11708_s2 + $0x68] sm:$0xff] }
 0x54f   : > { %v8366_v57 = vpop.eup %8365 }
 0x550   : > { %v3054_v61 = vmul.f32 %v8366_v57, %v3038_v56  ;;  %3104 = vrot.lane.b32.xlu1 %v9884_v55, %s8758_s12  ;;  %v3055_v44 = vmul.f32 %v8366_v57, %v3039_v54  ;;  %v8401_v57 = vld [vmem:[%s11708_s2 + $0x70] sm:$0xff] }
 0x552   : > { %v9892_v1 = vmax.f32 %v3054_v61, 0.0  ;;  %v9900_v49 = vmax.f32 %v3055_v44, 0.0  ;;  %v8402_v61 = vld [vmem:[%s11708_s2 + $0x78] sm:$0xff] }
 0x553   : > { %v8368_v3 = vpop.eup %8367 }
 0x554   : > { %v3056_v53 = vmul.f32 %v8368_v3, %v3040_v45  ;;  %3112 = vrot.lane.b32.xlu1 %v9890_v63, %s8758_s12  ;;  %3106 = vrot.lane.b32.xlu0 %v9892_v1, %s8758_s12  ;;  %v3057_v52 = vmul.f32 %v8368_v3, %v3041_v4 }
 0x556   : > { %v9902_v5 = vmax.f32 %v3056_v53, 0.0  ;;  %v9910_v60 = vmax.f32 %v3057_v52, 0.0 }
 0x557   : > { %v8370_v10 = vpop.eup %8369 }
 0x558   : > { %v3058_v11 = vmul.f32 %v8370_v10, %v3042_v9  ;;  %3114 = vrot.lane.b32.xlu1 %v9900_v49, %s8758_s12  ;;  %3108 = vrot.lane.b32.xlu0 %v9902_v5, %s8758_s12  ;;  %v3059_v59 = vmul.f32 %v8370_v10, %v3043_v58  ;;  %v3137_v10 = vld [vmem:[#allocation6 + $0x20] sm:$0xff] }
 0x55a   : > { %v9912_v12 = vmax.f32 %v3058_v11, 0.0  ;;  %v9918_v2 = vmax.f32 %v3059_v59, 0.0 }
 0x55c   : > { %3116 = vrot.lane.b32.xlu0 %v9910_v60, %s8758_s12  ;;  %3110 = vrot.lane.b32.xlu1 %v9912_v12, %s8758_s12 }
 0x560   : > { %3068 = vrot.lane.b32.xlu0 %v9884_v55, %s8759_s26  ;;  %3118 = vrot.lane.b32.xlu1 %v9918_v2, %s8758_s12 }
 0x564   : > { %3076 = vrot.lane.b32.xlu0 %v9890_v63, %s8759_s26  ;;  %3070 = vrot.lane.b32.xlu1 %v9892_v1, %s8759_s26 }
 0x568   : > { %3072 = vrot.lane.b32.xlu0 %v9902_v5, %s8759_s26  ;;  %3078 = vrot.lane.b32.xlu1 %v9900_v49, %s8759_s26 }
 0x56c   : > { %3080 = vrot.lane.b32.xlu0 %v9910_v60, %s8759_s26  ;;  %3074 = vrot.lane.b32.xlu1 %v9912_v12, %s8759_s26 }
 0x570   : > { %3343 = vrot.lane.b32.xlu0 %v9884_v55, %s8761_s22  ;;  %3082 = vrot.lane.b32.xlu1 %v9918_v2, %s8759_s26 }
 0x574   : > { %3351 = vrot.lane.b32.xlu0 %v9890_v63, %s8761_s22  ;;  %3345 = vrot.lane.b32.xlu1 %v9892_v1, %s8761_s22 }
 0x578   : > { %3347 = vrot.lane.b32.xlu0 %v9902_v5, %s8761_s22  ;;  %3353 = vrot.lane.b32.xlu1 %v9900_v49, %s8761_s22 }
 0x57c   : > { %3355 = vrot.lane.b32.xlu0 %v9910_v60, %s8761_s22  ;;  %3349 = vrot.lane.b32.xlu1 %v9912_v12, %s8761_s22 }
 0x580   : > { %3489 = vrot.lane.b32.xlu0 %v9884_v55, %s8763_s17  ;;  %3357 = vrot.lane.b32.xlu1 %v9918_v2, %s8761_s22 }
 0x584   : > { %3497 = vrot.lane.b32.xlu0 %v9890_v63, %s8763_s17  ;;  %3491 = vrot.lane.b32.xlu1 %v9892_v1, %s8763_s17 }
 0x588   : > { %3493 = vrot.lane.b32.xlu0 %v9902_v5, %s8763_s17  ;;  %3499 = vrot.lane.b32.xlu1 %v9900_v49, %s8763_s17 }
 0x58c   : > { %3501 = vrot.lane.b32.xlu0 %v9910_v60, %s8763_s17  ;;  %3495 = vrot.lane.b32.xlu1 %v9912_v12, %s8763_s17 }
 0x590   : > { %3749 = vrot.lane.b32.xlu0 %v9884_v55, %s8757_s25  ;;  %3503 = vrot.lane.b32.xlu1 %v9918_v2, %s8763_s17 }
 0x594   : > { %3757 = vrot.lane.b32.xlu0 %v9890_v63, %s8757_s25  ;;  %3751 = vrot.lane.b32.xlu1 %v9892_v1, %s8757_s25 }
 0x598   : > { %3753 = vrot.lane.b32.xlu0 %v9902_v5, %s8757_s25  ;;  %3759 = vrot.lane.b32.xlu1 %v9900_v49, %s8757_s25 }
 0x59c   : > { %3761 = vrot.lane.b32.xlu0 %v9910_v60, %s8757_s25  ;;  %3755 = vrot.lane.b32.xlu1 %v9912_v12, %s8757_s25 }
 0x5a0   : > { %3895 = vrot.lane.b32.xlu0 %v9884_v55, %s8760_s19  ;;  %3763 = vrot.lane.b32.xlu1 %v9918_v2, %s8757_s25 }
 0x5a4   : > { %3903 = vrot.lane.b32.xlu0 %v9890_v63, %s8760_s19  ;;  %3897 = vrot.lane.b32.xlu1 %v9892_v1, %s8760_s19 }
 0x5a8   : > { %3899 = vrot.lane.b32.xlu0 %v9902_v5, %s8760_s19  ;;  %3905 = vrot.lane.b32.xlu1 %v9900_v49, %s8760_s19 }
 0x5ac   : > { %3907 = vrot.lane.b32.xlu0 %v9910_v60, %s8760_s19  ;;  %3901 = vrot.lane.b32.xlu1 %v9912_v12, %s8760_s19 }
 0x5b0   : > { %4041 = vrot.lane.b32.xlu0 %v9884_v55, %s8762_s30  ;;  %3909 = vrot.lane.b32.xlu1 %v9918_v2, %s8760_s19 }
 0x5b4   : > { %4049 = vrot.lane.b32.xlu0 %v9890_v63, %s8762_s30  ;;  %4043 = vrot.lane.b32.xlu1 %v9892_v1, %s8762_s30 }
 0x5b8   : > { %4045 = vrot.lane.b32.xlu0 %v9902_v5, %s8762_s30  ;;  %4051 = vrot.lane.b32.xlu1 %v9900_v49, %s8762_s30 }
 0x5bc   : > { %4053 = vrot.lane.b32.xlu0 %v9910_v60, %s8762_s30  ;;  %4047 = vrot.lane.b32.xlu1 %v9912_v12, %s8762_s30 }
 0x5c0   : > { %4187 = vrot.lane.b32.xlu0 %v9884_v55, %s8764_s20  ;;  %4055 = vrot.lane.b32.xlu1 %v9918_v2, %s8762_s30 }
 0x5c2   : > { %v3105_v50 = vpop.permute.xlu1 %3104 }
 0x5c4   : > { %4195 = vrot.lane.b32.xlu0 %v9890_v63, %s8764_s20  ;;  %4189 = vrot.lane.b32.xlu1 %v9892_v1, %s8764_s20 }
 0x5c6   : > { %v3113_v13 = vpop.permute.xlu1 %3112  ;;  %v3107_v17 = vpop.permute.xlu0 %3106 }
 0x5c7   : > { %v3124_v19 = vsel %vm469_vm2, %v3113_v13, %v3105_v50  ;;  %v3120_v20 = vsel %vm469_vm2, %v3105_v50, %v3113_v13  ;;  %v8403_v13 = vld [vmem:[%s11708_s2] sm:$0xff] }
 0x5c8   : > { %4191 = vrot.lane.b32.xlu0 %v9902_v5, %s8764_s20  ;;  %4197 = vrot.lane.b32.xlu1 %v9900_v49, %s8764_s20  ;;  %v3128_v27 = vmul.f32 %v8395_v24, %v3124_v19  ;;  %v3129_v31 = vmul.f32 %v8396_v29, %v3120_v20  ;;  %v8404_v19 = vld [vmem:[%s11708_s2 + $0x8] sm:$0xff]  ;;  %v8406_v24 = vld [vmem:[%s11708_s2 + $0x18] sm:$0xff] }
 0x5ca   : > { %v3115_v21 = vpop.permute.xlu1 %3114  ;;  %v3109_v22 = vpop.permute.xlu0 %3108 }
 0x5cb   : > { %v3121_v28 = vsel %vm469_vm2, %v3107_v17, %v3115_v21  ;;  %v3125_v26 = vsel %vm469_vm2, %v3115_v21, %v3107_v17  ;;  %v8405_v21 = vld [vmem:[%s11708_s2 + $0x10] sm:$0xff] }
 0x5cc   : > { %v3130_v16 = vmul.f32 %v8397_v32, %v3125_v26  ;;  %v3131_v34 = vmul.f32 %v8398_v33, %v3121_v28  ;;  %4199 = vrot.lane.b32.xlu0 %v9910_v60, %s8764_s20  ;;  %4193 = vrot.lane.b32.xlu1 %v9912_v12, %s8764_s20  ;;  %v3138_v28 = vld [vmem:[#allocation6 + $0x28] sm:$0xff] }
 0x5ce   : > { %v7739_v35 = vpack.c.bf16 %v3130_v16, %v3128_v27  ;;  %v3111_v36 = vpop.permute.xlu1 %3110  ;;  %v3117_v37 = vpop.permute.xlu0 %3116  ;;  %v7737_v38 = vpack.c.bf16 %v3131_v34, %v3129_v31  ;;  %v3139_v34 = vld [vmem:[#allocation6 + $0x30] sm:$0xff] }
 0x5cf   : > { %v3122_v40 = vsel %vm469_vm2, %v3109_v22, %v3117_v37  ;;  %v3126_v41 = vsel %vm469_vm2, %v3117_v37, %v3109_v22 }
 0x5d0   : > { %4201 = vrot.lane.b32.xlu1 %v9918_v2, %s8764_s20  ;;  %7738 = vmatprep.subr.bf16.mxu0 %v7737_v38  ;;  %v3132_v48 = vmul.f32 %v8399_v47, %v3126_v41  ;;  %v3133_v56 = vmul.f32 %v8400_v51, %v3122_v40  ;;  %v8407_v40 = vld [vmem:[%s11708_s2 + $0x20] sm:$0xff]  ;;  %v8410_v47 = vld [vmem:[%s11708_s2 + $0x38] sm:$0xff]  ;;  %v3140_v51 = vld [vmem:[#allocation6 + $0x38] sm:$0xff] }
 0x5d1   : > { %7740 = vmatpush1.bf16.msra.mxu0 %v7739_v35 }
 0x5d2   : > { %v3119_v42 = vpop.permute.xlu1 %3118  ;;  %v3069_v43 = vpop.permute.xlu0 %3068 }
 0x5d3   : > { %v3123_v39 = vsel %vm469_vm2, %v3111_v36, %v3119_v42  ;;  %v3127_v46 = vsel %vm469_vm2, %v3119_v42, %v3111_v36  ;;  %v8408_v42 = vld [vmem:[%s11708_s2 + $0x28] sm:$0xff] }
 0x5d4   : > { %v3134_v54 = vmul.f32 %v8401_v57, %v3127_v46  ;;  %v3135_v44 = vmul.f32 %v8402_v61, %v3123_v39  ;;  %v8409_v39 = vld [vmem:[%s11708_s2 + $0x30] sm:$0xff] }
 0x5d6   : > { %v7743_v45 = vpack.c.bf16 %v3134_v54, %v3132_v48  ;;  %v3071_v3 = vpop.permute.xlu1 %3070  ;;  %v3077_v4 = vpop.permute.xlu0 %3076  ;;  %v7741_v53 = vpack.c.bf16 %v3135_v44, %v3133_v56 }
 0x5d7   : > { %v3084_v52 = vsel %vm454_vm3, %v3069_v43, %v3077_v4  ;;  %v3088_v9 = vsel %vm454_vm3, %v3077_v4, %v3069_v43 }
 0x5d8   : > { %7742 = vmatprep.subr.bf16.mxu0 %v7741_v53  ;;  %v3092_v17 = vmul.f32 %v8403_v13, %v3088_v9  ;;  %v3093_v20 = vmul.f32 %v8404_v19, %v3084_v52 }
 0x5d9   : > { %7744 = vmatpush1.bf16.msra.mxu0 %v7743_v45 }
 0x5da   : > { %v3079_v58 = vpop.permute.xlu1 %3078  ;;  %v3073_v11 = vpop.permute.xlu0 %3072 }
 0x5db   : > { %v3085_v59 = vsel %vm454_vm3, %v3071_v3, %v3079_v58  ;;  %v3089_v50 = vsel %vm454_vm3, %v3079_v58, %v3071_v3  ;;  %v3100_v3 = vld [vmem:[#allocation6] sm:$0xff] }
 0x5dc   : > { %v3094_v22 = vmul.f32 %v8405_v21, %v3089_v50  ;;  %v3095_v27 = vmul.f32 %v8406_v24, %v3085_v59  ;;  %7549 = vmatmul.mubr.msk.f32.vlgmr.msra.gmra.mrb[8].mxu0 %vm1741_vm9, %v3137_v10  ;;  %v8411_v10 = vld [vmem:[%s11708_s2 + $0x80] sm:$0xff]  ;;  %v8413_v50 = vld [vmem:[%s11708_s2 + $0x90] sm:$0xff] }
 0x5dd   : > { %3223 = vmatprep.mubr.f32.mxu0 %v8756_v0 }
 0x5de   : > { %v7747_v26 = vpack.c.bf16 %v3094_v22, %v3092_v17  ;;  %v3075_v29 = vpop.permute.xlu1 %3074  ;;  %v3081_v31 = vpop.permute.xlu0 %3080  ;;  %v7745_v32 = vpack.c.bf16 %v3095_v27, %v3093_v20  ;;  %v8414_v17 = vld [vmem:[%s11708_s2 + $0x98] sm:$0xff] }
 0x5df   : > { %v3086_v16 = vsel %vm454_vm3, %v3073_v11, %v3081_v31  ;;  %v3090_v33 = vsel %vm454_vm3, %v3081_v31, %v3073_v11  ;;  %v8412_v11 = vld [vmem:[%s11708_s2 + $0x88] sm:$0xff]  ;;  %v3101_v20 = vld [vmem:[#allocation6 + $0x8] sm:$0xff] }
 0x5e0   : > { %7550 = vmatmul.mubr.msk.f32.gmra.mrb[10].mxu0 %vm1741_vm9, %v3138_v28  ;;  %7746 = vmatprep.subr.bf16.mxu0 %v7745_v32  ;;  %v3096_v41 = vmul.f32 %v8407_v40, %v3090_v33  ;;  %v3097_v43 = vmul.f32 %v8408_v42, %v3086_v16 }
 0x5e1   : > { %7748 = vmatpush1.bf16.msra.mxu0 %v7747_v26  ;;  %3229 = vmatprep.mubr.f32.mxu0 %v8756_v0 }
 0x5e2   : > { %v3083_v35 = vpop.permute.xlu1 %3082  ;;  %v3344_v36 = vpop.permute.xlu0 %3343 }
 0x5e3   : > { %v3087_v37 = vsel %vm454_vm3, %v3075_v29, %v3083_v35  ;;  %v3091_v38 = vsel %vm454_vm3, %v3083_v35, %v3075_v29  ;;  %v3102_v29 = vld [vmem:[#allocation6 + $0x10] sm:$0xff] }
 0x5e4   : > { %v3098_v46 = vmul.f32 %v8409_v39, %v3091_v38  ;;  %v3099_v48 = vmul.f32 %v8410_v47, %v3087_v37  ;;  %7551 = vmatmul.mubr.msk.f32.gmra.mrb[12].mxu0 %vm1741_vm9, %v3139_v34  ;;  %v8415_v34 = vld [vmem:[%s11708_s2 + $0xa0] sm:$0xff]  ;;  %v8417_v38 = vld [vmem:[%s11708_s2 + $0xb0] sm:$0xff] }
 0x5e5   : > { %3235 = vmatprep.mubr.f32.mxu0 %v8756_v0 }
 0x5e6   : > { %v7751_v56 = vpack.c.bf16 %v3098_v46, %v3096_v41  ;;  %v3346_v57 = vpop.permute.xlu1 %3345  ;;  %v3352_v54 = vpop.permute.xlu0 %3351  ;;  %v7749_v61 = vpack.c.bf16 %v3099_v48, %v3097_v43  ;;  %v8418_v41 = vld [vmem:[%s11708_s2 + $0xb8] sm:$0xff]  ;;  %v3103_v43 = vld [vmem:[#allocation6 + $0x18] sm:$0xff] }
 0x5e7   : > { %v3359_v44 = vsel %vm689_vm5, %v3344_v36, %v3352_v54  ;;  %v3363_v45 = vsel %vm689_vm5, %v3352_v54, %v3344_v36  ;;  %v8416_v36 = vld [vmem:[%s11708_s2 + $0xa8] sm:$0xff] }
 0x5e8   : > { %7552 = vmatmul.mubr.msk.f32.gmra.mrb[14].mxu0 %vm1741_vm9, %v3140_v51  ;;  %7750 = vmatprep.subr.bf16.mxu0 %v7749_v61  ;;  %v3367_v58 = vmul.f32 %v8411_v10, %v3363_v45  ;;  %v3368_v59 = vmul.f32 %v8412_v11, %v3359_v44 }
 0x5e9   : > { %7752 = vmatpush1.bf16.msra.mxu0 %v7751_v56  ;;  %3318 = vmatprep.mubr.f32.mxu0 %v8756_v0 }
 0x5ea   : > { %v3354_v4 = vpop.permute.xlu1 %3353  ;;  %v3348_v53 = vpop.permute.xlu0 %3347 }
 0x5eb   : > { %v3360_v52 = vsel %vm689_vm5, %v3346_v57, %v3354_v4  ;;  %v3364_v9 = vsel %vm689_vm5, %v3354_v4, %v3346_v57  ;;  %v3376_v57 = vld [vmem:[#allocation6 + $0x40] sm:$0xff] }
 0x5ec   : > { %v3369_v13 = vmul.f32 %v8413_v50, %v3364_v9  ;;  %v3370_v19 = vmul.f32 %v8414_v17, %v3360_v52  ;;  %7553 = vmatmul.mubr.msk.f32.vlgmr.msra.gmra.mrb[8].mxu0 %vm1741_vm9, %v3100_v3  ;;  %v8419_v3 = vld [vmem:[%s11708_s2 + $0xc0] sm:$0xff]  ;;  %v8421_v9 = vld [vmem:[%s11708_s2 + $0xd0] sm:$0xff] }
 0x5ed   : > { %3324 = vmatprep.mubr.f32.mxu0 %v8756_v0 }
 0x5ee   : > { %v7755_v21 = vpack.c.bf16 %v3369_v13, %v3367_v58  ;;  %v3350_v22 = vpop.permute.xlu1 %3349  ;;  %v3356_v24 = vpop.permute.xlu0 %3355  ;;  %v7753_v27 = vpack.c.bf16 %v3370_v19, %v3368_v59  ;;  %v8422_v58 = vld [vmem:[%s11708_s2 + $0xd8] sm:$0xff] }
 0x5ef   : > { %v3361_v28 = vsel %vm689_vm5, %v3348_v53, %v3356_v24  ;;  %v3365_v26 = vsel %vm689_vm5, %v3356_v24, %v3348_v53  ;;  %v8420_v53 = vld [vmem:[%s11708_s2 + $0xc8] sm:$0xff]  ;;  %v3377_v59 = vld [vmem:[#allocation6 + $0x48] sm:$0xff] }
 0x5f0   : > { %7554 = vmatmul.mubr.msk.f32.gmra.mrb[10].mxu0 %vm1741_vm9, %v3101_v20  ;;  %7754 = vmatprep.subr.bf16.mxu0 %v7753_v27  ;;  %v3371_v35 = vmul.f32 %v8415_v34, %v3365_v26  ;;  %v3372_v37 = vmul.f32 %v8416_v36, %v3361_v28 }
 0x5f1   : > { %7756 = vmatpush1.bf16.msra.mxu0 %v7755_v21  ;;  %3330 = vmatprep.mubr.f32.mxu0 %v8756_v0 }
 0x5f2   : > { %v3358_v31 = vpop.permute.xlu1 %3357  ;;  %v3490_v32 = vpop.permute.xlu0 %3489 }
 0x5f3   : > { %v3362_v16 = vsel %vm689_vm5, %v3350_v22, %v3358_v31  ;;  %v3366_v33 = vsel %vm689_vm5, %v3358_v31, %v3350_v22  ;;  %v3378_v22 = vld [vmem:[#allocation6 + $0x50] sm:$0xff] }
 0x5f4   : > { %v3373_v40 = vmul.f32 %v8417_v38, %v3366_v33  ;;  %v3374_v42 = vmul.f32 %v8418_v41, %v3362_v16  ;;  %7555 = vmatmul.mubr.msk.f32.gmra.mrb[12].mxu0 %vm1741_vm9, %v3102_v29  ;;  %v8423_v29 = vld [vmem:[%s11708_s2 + $0xe0] sm:$0xff]  ;;  %v8425_v33 = vld [vmem:[%s11708_s2 + $0xf0] sm:$0xff] }
 0x5f5   : > { %3336 = vmatprep.mubr.f32.mxu0 %v8756_v0 }
 0x5f6   : > { %v7759_v39 = vpack.c.bf16 %v3373_v40, %v3371_v35  ;;  %v3492_v46 = vpop.permute.xlu1 %3491  ;;  %v3498_v47 = vpop.permute.xlu0 %3497  ;;  %v7757_v48 = vpack.c.bf16 %v3374_v42, %v3372_v37  ;;  %v8426_v35 = vld [vmem:[%s11708_s2 + $0xf8] sm:$0xff]  ;;  %v3379_v37 = vld [vmem:[#allocation6 + $0x58] sm:$0xff] }
 0x5f7   : > { %v3505_v51 = vsel %vm815_vm7, %v3490_v32, %v3498_v47  ;;  %v3509_v56 = vsel %vm815_vm7, %v3498_v47, %v3490_v32  ;;  %v8424_v32 = vld [vmem:[%s11708_s2 + $0xe8] sm:$0xff] }
 0x5f8   : > { %7556 = vmatmul.mubr.msk.f32.gmra.mrb[14].mxu0 %vm1741_vm9, %v3103_v43  ;;  %7758 = vmatprep.subr.bf16.mxu0 %v7757_v48  ;;  %v3513_v4 = vmul.f32 %v8419_v3, %v3509_v56  ;;  %v3514_v52 = vmul.f32 %v8420_v53, %v3505_v51  ;;  %v7769_v43 = vpack.c.bf16 %v9900_v49, %v9890_v63  ;;  %v8427_v63 = vld [vmem:[%s11708_s2 + $0x158] sm:$0xff] }
 0x5f9   : > { %7760 = vmatpush1.bf16.msra.mxu0 %v7759_v39  ;;  %3456 = vmatprep.mubr.f32.mxu0 %v8756_v0  ;;  %v3522_v39 = vld [vmem:[#allocation6 + $0x60] sm:$0xff]  ;;  %v7771_v56 = vpack.c.bf16 %v9892_v1, %v9884_v55 }
 0x5fa   : > { %v3500_v54 = vpop.permute.xlu1 %3499  ;;  %v3494_v61 = vpop.permute.xlu0 %3493 }
 0x5fb   : > { %v3506_v44 = vsel %vm815_vm7, %v3492_v46, %v3500_v54  ;;  %v3510_v45 = vsel %vm815_vm7, %v3500_v54, %v3492_v46  ;;  %v3523_v54 = vld [vmem:[#allocation6 + $0x68] sm:$0xff] }
 0x5fc   : > { %v3515_v10 = vmul.f32 %v8421_v9, %v3510_v45  ;;  %v3516_v11 = vmul.f32 %v8422_v58, %v3506_v44  ;;  %7557 = vmatmul.mubr.msk.f32.vlgmr.msra.gmra.mrb[8].mxu0 %vm1741_vm9, %v3376_v57  ;;  %v7773_v57 = vpack.c.bf16 %v9918_v2, %v9910_v60  ;;  %v7775_v45 = vpack.c.bf16 %v9912_v12, %v9902_v5  ;;  %v3524_v60 = vld [vmem:[#allocation6 + $0x70] sm:$0xff]  ;;  %v3525_v5 = vld [vmem:[#allocation6 + $0x78] sm:$0xff]  ;;  %v8429_v58 = vld [vmem:[%s11708_s2 + $0x150] sm:$0xff] }
 0x5fd   : > { %3462 = vmatprep.mubr.f32.mxu0 %v8756_v0 }
 0x5fe   : > { %v7763_v50 = vpack.c.bf16 %v3515_v10, %v3513_v4  ;;  %v3496_v13 = vpop.permute.xlu1 %3495  ;;  %v3502_v17 = vpop.permute.xlu0 %3501  ;;  %v7761_v19 = vpack.c.bf16 %v3516_v11, %v3514_v52 }
 0x5ff   : > { %v3507_v20 = vsel %vm815_vm7, %v3494_v61, %v3502_v17  ;;  %v3511_v21 = vsel %vm815_vm7, %v3502_v17, %v3494_v61  ;;  %v8428_v61 = vld [vmem:[%s11708_s2 + $0x148] sm:$0xff] }
 0x600   : > { %7558 = vmatmul.mubr.msk.f32.gmra.mrb[10].mxu0 %vm1741_vm9, %v3377_v59  ;;  %7762 = vmatprep.subr.bf16.mxu0 %v7761_v19  ;;  %v3517_v31 = vmul.f32 %v8423_v29, %v3511_v21  ;;  %v3518_v16 = vmul.f32 %v8424_v32, %v3507_v20  ;;  %v8431_v19 = vld [vmem:[%s11708_s2 + $0x140] sm:$0xff]  ;;  %v8433_v32 = vld [vmem:[%s11708_s2 + $0x170] sm:$0xff] }
 0x601   : > { %7764 = vmatpush1.bf16.msra.mxu0 %v7763_v50  ;;  %3468 = vmatprep.mubr.f32.mxu0 %v8756_v0 }
 0x602   : > { %v3504_v24 = vpop.permute.xlu1 %3503  ;;  %v3750_v27 = vpop.permute.xlu0 %3749 }
 0x603   : > { %v3508_v28 = vsel %vm815_vm7, %v3496_v13, %v3504_v24  ;;  %v3512_v26 = vsel %vm815_vm7, %v3504_v24, %v3496_v13  ;;  %v8430_v13 = vld [vmem:[%s11708_s2 + $0x178] sm:$0xff] }
 0x604   : > { %v3519_v34 = vmul.f32 %v8425_v33, %v3512_v26  ;;  %v3520_v36 = vmul.f32 %v8426_v35, %v3508_v28  ;;  %7559 = vmatmul.mubr.msk.f32.gmra.mrb[12].mxu0 %vm1741_vm9, %v3378_v22  ;;  %v3636_v22 = vld [vmem:[#allocation6 + $0x80] sm:$0xff] }
 0x605   : > { %3474 = vmatprep.mubr.f32.mxu0 %v8756_v0 }
 0x606   : > { %v7767_v38 = vpack.c.bf16 %v3519_v34, %v3517_v31  ;;  %v3752_v40 = vpop.permute.xlu1 %3751  ;;  %v3758_v41 = vpop.permute.xlu0 %3757  ;;  %v7765_v42 = vpack.c.bf16 %v3520_v36, %v3518_v16  ;;  %v8434_v34 = vld [vmem:[%s11708_s2 + $0x188] sm:$0xff]  ;;  %v8435_v36 = vld [vmem:[%s11708_s2 + $0x198] sm:$0xff] }
 0x607   : > { %v3769_v48 = vsel %vm1055_vm1, %v3758_v41, %v3750_v27  ;;  %v3765_v12 = vsel %vm1055_vm1, %v3750_v27, %v3758_v41  ;;  %v8432_v27 = vld [vmem:[%s11708_s2 + $0x168] sm:$0xff] }
 0x608   : > { %7560 = vmatmul.mubr.msk.f32.gmra.mrb[14].mxu0 %vm1741_vm9, %v3379_v37  ;;  %7766 = vmatprep.subr.bf16.mxu0 %v7765_v42  ;;  %v3774_v44 = vmul.f32 %v8428_v61, %v3769_v48  ;;  %v3773_v20 = vmul.f32 %v8431_v19, %v3765_v12  ;;  %v3637_v42 = vld [vmem:[#allocation6 + $0x88] sm:$0xff]  ;;  %v3638_v48 = vld [vmem:[#allocation6 + $0x90] sm:$0xff]  ;;  %v8442_v19 = vld [vmem:[%s11708_s2 + $0x1c8] sm:$0xff] }
 0x609   : > { %7768 = vmatpush1.bf16.msra.mxu0 %v7767_v38  ;;  %3602 = vmatprep.mubr.f32.mxu0 %v8756_v0 }
 0x60a   : > { %v3760_v46 = vpop.permute.xlu1 %3759  ;;  %7770 = vmatprep.subr.bf16.mxu0 %v7769_v43  ;;  %v3754_v47 = vpop.permute.xlu0 %3753 }
 0x60b   : > { %v3770_v51 = vsel %vm1055_vm1, %v3760_v46, %v3752_v40  ;;  %v3766_v53 = vsel %vm1055_vm1, %v3752_v40, %v3760_v46  ;;  %v8436_v40 = vld [vmem:[%s11708_s2 + $0x160] sm:$0xff] }
 0x60c   : > { %v3776_v49 = vmul.f32 %v8427_v63, %v3770_v51  ;;  %7561 = vmatmul.mubr.msk.f32.vlgmr.msra.gmra.mrb[8].mxu0 %vm1741_vm9, %v3522_v39  ;;  %v3775_v11 = vmul.f32 %v8429_v58, %v3766_v53 }
 0x60d   : > { %7772 = vmatpush1.bf16.msra.mxu0 %v7771_v56  ;;  %3608 = vmatprep.mubr.f32.mxu0 %v8756_v0 }
 0x60e   : > { %v3756_v55 = vpop.permute.xlu1 %3755  ;;  %7774 = vmatprep.subr.bf16.mxu0 %v7773_v57  ;;  %v3762_v1 = vpop.permute.xlu0 %3761  ;;  %v7777_v3 = vpack.c.bf16 %v3776_v49, %v3774_v44  ;;  %v7779_v31 = vpack.c.bf16 %v3775_v11, %v3773_v20  ;;  %v3639_v57 = vld [vmem:[#allocation6 + $0x98] sm:$0xff] }
 0x60f   : > { %v3771_v59 = vsel %vm1055_vm1, %v3762_v1, %v3754_v47  ;;  %v3767_v24 = vsel %vm1055_vm1, %v3754_v47, %v3762_v1 }
 0x610   : > { %7562 = vmatmul.mubr.msk.f32.gmra.mrb[10].mxu0 %vm1741_vm9, %v3523_v54  ;;  %v3778_v28 = vmul.f32 %v8432_v27, %v3771_v59  ;;  %v3777_v41 = vmul.f32 %v8436_v40, %v3767_v24  ;;  %v8444_v27 = vld [vmem:[%s11708_s2 + $0x1a0] sm:$0xff] }
 0x611   : > { %7776 = vmatpush1.bf16.msra.mxu0 %v7775_v45  ;;  %3614 = vmatprep.mubr.f32.mxu0 %v8756_v0 }
 0x612   : > { %v3764_v2 = vpop.permute.xlu1 %3763  ;;  %7778 = vmatprep.subr.bf16.mxu0 %v7777_v3  ;;  %v3896_v4 = vpop.permute.xlu0 %3895 }
 0x613   : > { %v3772_v52 = vsel %vm1055_vm1, %v3764_v2, %v3756_v55  ;;  %v3768_v50 = vsel %vm1055_vm1, %v3756_v55, %v3764_v2  ;;  %v8437_v55 = vld [vmem:[%s11708_s2 + $0x190] sm:$0xff] }
 0x614   : > { %7563 = vmatmul.mubr.msk.f32.gmra.mrb[12].mxu0 %vm1741_vm9, %v3524_v60  ;;  %v3780_v17 = vmul.f32 %v8430_v13, %v3772_v52  ;;  %v3779_v16 = vmul.f32 %v8433_v32, %v3768_v50  ;;  %v8438_v60 = vld [vmem:[%s11708_s2 + $0x1b8] sm:$0xff]  ;;  %v8441_v50 = vld [vmem:[%s11708_s2 + $0x1b0] sm:$0xff] }
 0x615   : > { %3620 = vmatprep.mubr.f32.mxu0 %v8756_v0 }
 0x616   : > { %v3898_v9 = vpop.permute.xlu1 %3897  ;;  %v3904_v10 = vpop.permute.xlu0 %3903  ;;  %v7781_v38 = vpack.c.bf16 %v3780_v17, %v3778_v28  ;;  %v7783_v47 = vpack.c.bf16 %v3779_v16, %v3777_v41 }
 0x617   : > { %v3915_v21 = vsel %vm1181_vm4, %v3904_v10, %v3896_v4  ;;  %v3911_v54 = vsel %vm1181_vm4, %v3896_v4, %v3904_v10  ;;  %v8439_v4 = vld [vmem:[%s11708_s2 + $0x180] sm:$0xff] }
 0x618   : > { %7564 = vmatmul.mubr.msk.f32.gmra.mrb[14].mxu0 %vm1741_vm9, %v3525_v5  ;;  %v3920_v35 = vmul.f32 %v8434_v34, %v3915_v21  ;;  %v3919_v53 = vmul.f32 %v8439_v4, %v3911_v54  ;;  %v3782_v5 = vld [vmem:[#allocation6 + $0xa0] sm:$0xff]  ;;  %v8443_v21 = vld [vmem:[%s11708_s2 + $0x1d8] sm:$0xff] }
 0x619   : > { %3716 = vmatprep.mubr.f32.mxu0 %v8756_v0 }
 0x61a   : > { %v3906_v26 = vpop.permute.xlu1 %3905  ;;  %v3900_v29 = vpop.permute.xlu0 %3899 }
 0x61b   : > { %v3916_v33 = vsel %vm1181_vm4, %v3906_v26, %v3898_v9  ;;  %v3912_v63 = vsel %vm1181_vm4, %v3898_v9, %v3906_v26  ;;  %v8440_v9 = vld [vmem:[%s11708_s2 + $0x1a8] sm:$0xff]  ;;  %v3783_v26 = vld [vmem:[#allocation6 + $0xa8] sm:$0xff] }
 0x61c   : > { %v3922_v37 = vmul.f32 %v8435_v36, %v3916_v33  ;;  %7565 = vmatmul.mubr.msk.f32.vlgmr.msra.gmra.mrb[8].mxu0 %vm1741_vm9, %v3636_v22  ;;  %v3921_v1 = vmul.f32 %v8437_v55, %v3912_v63  ;;  %v3784_v33 = vld [vmem:[#allocation6 + $0xb0] sm:$0xff] }
 0x61d   : > { %7780 = vmatpush1.bf16.msra.mxu0 %v7779_v31  ;;  %3722 = vmatprep.mubr.f32.mxu0 %v8756_v0 }
 0x61e   : > { %7782 = vmatprep.subr.bf16.mxu0 %v7781_v38  ;;  %v3902_v43 = vpop.permute.xlu1 %3901  ;;  %v3908_v39 = vpop.permute.xlu0 %3907  ;;  %v7785_v46 = vpack.c.bf16 %v3922_v37, %v3920_v35  ;;  %v7787_v59 = vpack.c.bf16 %v3921_v1, %v3919_v53  ;;  %v3785_v38 = vld [vmem:[#allocation6 + $0xb8] sm:$0xff]  ;;  %v8451_v53 = vld [vmem:[%s11708_s2 + $0x218] sm:$0xff] }
 0x61f   : > { %v3917_v45 = vsel %vm1181_vm4, %v3908_v39, %v3900_v29  ;;  %v3913_v12 = vsel %vm1181_vm4, %v3900_v29, %v3908_v39 }
 0x620   : > { %7566 = vmatmul.mubr.msk.f32.gmra.mrb[10].mxu0 %vm1741_vm9, %v3637_v42  ;;  %v3924_v10 = vmul.f32 %v8440_v9, %v3917_v45  ;;  %v3923_v28 = vmul.f32 %v8444_v27, %v3913_v12  ;;  %v8449_v45 = vld [vmem:[%s11708_s2 + $0x1f0] sm:$0xff]  ;;  %v8452_v12 = vld [vmem:[%s11708_s2 + $0x1e0] sm:$0xff] }
 0x621   : > { %7784 = vmatpush1.bf16.msra.mxu0 %v7783_v47  ;;  %3728 = vmatprep.mubr.f32.mxu0 %v8756_v0  ;;  %v8453_v27 = vld [vmem:[%s11708_s2 + $0x210] sm:$0xff] }
 0x622   : > { %7786 = vmatprep.subr.bf16.mxu0 %v7785_v46  ;;  %v3910_v51 = vpop.permute.xlu1 %3909  ;;  %v4042_v56 = vpop.permute.xlu0 %4041 }
 0x623   : > { %v3918_v49 = vsel %vm1181_vm4, %v3910_v51, %v3902_v43  ;;  %v3914_v3 = vsel %vm1181_vm4, %v3902_v43, %v3910_v51  ;;  %v8445_v43 = vld [vmem:[%s11708_s2 + $0x1d0] sm:$0xff] }
 0x624   : > { %7567 = vmatmul.mubr.msk.f32.gmra.mrb[12].mxu0 %vm1741_vm9, %v3638_v48  ;;  %v3926_v2 = vmul.f32 %v8438_v60, %v3918_v49  ;;  %v3925_v13 = vmul.f32 %v8441_v50, %v3914_v3  ;;  %v8446_v48 = vld [vmem:[%s11708_s2 + $0x1f8] sm:$0xff] }
 0x625   : > { %3734 = vmatprep.mubr.f32.mxu0 %v8756_v0 }
 0x626   : > { %v4044_v61 = vpop.permute.xlu1 %4043  ;;  %v4050_v44 = vpop.permute.xlu0 %4049  ;;  %v7789_v24 = vpack.c.bf16 %v3926_v2, %v3924_v10  ;;  %v7791_v16 = vpack.c.bf16 %v3925_v13, %v3923_v28  ;;  %v8450_v2 = vld [vmem:[%s11708_s2 + $0x208] sm:$0xff]  ;;  %v3929_v10 = vld [vmem:[#allocation6 + $0xc8] sm:$0xff]  ;;  %v3930_v13 = vld [vmem:[#allocation6 + $0xd0] sm:$0xff] }
 0x627   : > { %v4061_v52 = vsel %vm1307_vm6, %v4050_v44, %v4042_v56  ;;  %v4057_v40 = vsel %vm1307_vm6, %v4042_v56, %v4050_v44  ;;  %v8447_v56 = vld [vmem:[%s11708_s2 + $0x1c0] sm:$0xff] }
 0x628   : > { %7568 = vmatmul.mubr.msk.f32.gmra.mrb[14].mxu0 %vm1741_vm9, %v3639_v57  ;;  %v4066_v20 = vmul.f32 %v8442_v19, %v4061_v52  ;;  %v4065_v63 = vmul.f32 %v8447_v56, %v4057_v40  ;;  %v3928_v57 = vld [vmem:[#allocation6 + $0xc0] sm:$0xff] }
 0x629   : > { %3862 = vmatprep.mubr.f32.mxu0 %v8756_v0  ;;  %v8457_v40 = vld [vmem:[%s11708_s2 + $0x230] sm:$0xff] }
 0x62a   : > { %v4052_v58 = vpop.permute.xlu1 %4051  ;;  %v4046_v11 = vpop.permute.xlu0 %4045  ;;  %v4220_v56 = vld [vmem:[#allocation6 + $0x100] sm:$0xff] }
 0x62b   : > { %v4062_v17 = vsel %vm1307_vm6, %v4052_v58, %v4044_v61  ;;  %v4058_v36 = vsel %vm1307_vm6, %v4044_v61, %v4052_v58  ;;  %v8448_v61 = vld [vmem:[%s11708_s2 + $0x1e8] sm:$0xff] }
 0x62c   : > { %v4068_v22 = vmul.f32 %v8443_v21, %v4062_v17  ;;  %7569 = vmatmul.mubr.msk.f32.vlgmr.msra.gmra.mrb[8].mxu0 %vm1741_vm9, %v3782_v5  ;;  %v4067_v39 = vmul.f32 %v8445_v43, %v4058_v36  ;;  %v8456_v36 = vld [vmem:[%s11708_s2 + $0x228] sm:$0xff]  ;;  %v8458_v43 = vld [vmem:[%s11708_s2 + $0x220] sm:$0xff] }
 0x62d   : > { %7788 = vmatpush1.bf16.msra.mxu0 %v7787_v59  ;;  %3868 = vmatprep.mubr.f32.mxu0 %v8756_v0 }
 0x62e   : > { %7790 = vmatprep.subr.bf16.mxu0 %v7789_v24  ;;  %v4048_v29 = vpop.permute.xlu1 %4047  ;;  %v4054_v31 = vpop.permute.xlu0 %4053  ;;  %v7793_v32 = vpack.c.bf16 %v4068_v22, %v4066_v20  ;;  %v7795_v1 = vpack.c.bf16 %v4067_v39, %v4065_v63  ;;  %v3931_v22 = vld [vmem:[#allocation6 + $0xd8] sm:$0xff]  ;;  %v4221_v63 = vld [vmem:[#allocation6 + $0x108] sm:$0xff] }
 0x62f   : > { %v4063_v46 = vsel %vm1307_vm6, %v4054_v31, %v4046_v11  ;;  %v4059_v54 = vsel %vm1307_vm6, %v4046_v11, %v4054_v31  ;;  %v8454_v31 = vld [vmem:[%s11708_s2 + $0x238] sm:$0xff] }
 0x630   : > { %7570 = vmatmul.mubr.msk.f32.gmra.mrb[10].mxu0 %vm1741_vm9, %v3783_v26  ;;  %v4070_v44 = vmul.f32 %v8448_v61, %v4063_v46  ;;  %v4069_v9 = vmul.f32 %v8452_v12, %v4059_v54  ;;  %v4075_v46 = vld [vmem:[#allocation6 + $0xe8] sm:$0xff] }
 0x631   : > { %7792 = vmatpush1.bf16.msra.mxu0 %v7791_v16  ;;  %3874 = vmatprep.mubr.f32.mxu0 %v8756_v0  ;;  %v8455_v16 = vld [vmem:[%s11708_s2 + $0x200] sm:$0xff] }
 0x632   : > { %7794 = vmatprep.subr.bf16.mxu0 %v7793_v32  ;;  %v4056_v34 = vpop.permute.xlu1 %4055  ;;  %v4188_v35 = vpop.permute.xlu0 %4187 }
 0x633   : > { %v4064_v37 = vsel %vm1307_vm6, %v4056_v34, %v4048_v29  ;;  %v4060_v47 = vsel %vm1307_vm6, %v4048_v29, %v4056_v34  ;;  %v4074_v34 = vld [vmem:[#allocation6 + $0xe0] sm:$0xff] }
 0x634   : > { %7571 = vmatmul.mubr.msk.f32.gmra.mrb[12].mxu0 %vm1741_vm9, %v3784_v33  ;;  %v4072_v51 = vmul.f32 %v8446_v48, %v4064_v37  ;;  %v4071_v3 = vmul.f32 %v8449_v45, %v4060_v47  ;;  %v4076_v48 = vld [vmem:[#allocation6 + $0xf0] sm:$0xff] }
 0x635   : > { %3880 = vmatprep.mubr.f32.mxu0 %v8756_v0 }
 0x636   : > { %v4190_v41 = vpop.permute.xlu1 %4189  ;;  %v4196_v42 = vpop.permute.xlu0 %4195  ;;  %v7797_v5 = vpack.c.bf16 %v4072_v51, %v4070_v44  ;;  %v7799_v50 = vpack.c.bf16 %v4071_v3, %v4069_v9  ;;  %v4077_v51 = vld [vmem:[#allocation6 + $0xf8] sm:$0xff] }
 0x637   : > { %v4207_v49 = vsel %vm1433_vm8, %v4196_v42, %v4188_v35  ;;  %v4203_v24 = vsel %vm1433_vm8, %v4188_v35, %v4196_v42 }
 0x638   : > { %7572 = vmatmul.mubr.msk.f32.gmra.mrb[14].mxu0 %vm1741_vm9, %v3785_v38  ;;  %v4212_v4 = vmul.f32 %v8450_v2, %v4207_v49  ;;  %v4211_v33 = vmul.f32 %v8455_v16, %v4203_v24  ;;  %v4222_v49 = vld [vmem:[#allocation6 + $0x110] sm:$0xff] }
 0x639   : > { %4008 = vmatprep.mubr.f32.mxu0 %v8756_v0 }
 0x63a   : > { %v4198_v55 = vpop.permute.xlu1 %4197  ;;  %v4192_v58 = vpop.permute.xlu0 %4191 }
 0x63b   : > { %v4208_v60 = vsel %vm1433_vm8, %v4198_v55, %v4190_v41  ;;  %v4204_v19 = vsel %vm1433_vm8, %v4190_v41, %v4198_v55 }
 0x63c   : > { %v4214_v52 = vmul.f32 %v8451_v53, %v4208_v60  ;;  %7573 = vmatmul.mubr.msk.f32.vlgmr.msra.gmra.mrb[8].mxu0 %vm1741_vm9, %v3928_v57  ;;  %v4213_v28 = vmul.f32 %v8453_v27, %v4204_v19  ;;  %v4223_v57 = vld [vmem:[#allocation6 + $0x118] sm:$0xff] }
 0x63d   : > { %7796 = vmatpush1.bf16.msra.mxu0 %v7795_v1  ;;  %4014 = vmatprep.mubr.f32.mxu0 %v8756_v0 }
 0x63e   : > { %7798 = vmatprep.subr.bf16.mxu0 %v7797_v5  ;;  %v4194_v11 = vpop.permute.xlu1 %4193  ;;  %v7801_v59 = vpack.c.bf16 %v4214_v52, %v4212_v4  ;;  %v4200_v20 = vpop.permute.xlu0 %4199  ;;  %v7803_v38 = vpack.c.bf16 %v4213_v28, %v4211_v33 }
 0x63f   : > { %v4209_v26 = vsel %vm1433_vm8, %v4200_v20, %v4192_v58  ;;  %v4205_v35 = vsel %vm1433_vm8, %v4192_v58, %v4200_v20 }
 0x640   : > { %7574 = vmatmul.mubr.msk.f32.gmra.mrb[10].mxu0 %vm1741_vm9, %v3929_v10  ;;  %v4216_v37 = vmul.f32 %v8456_v36, %v4209_v26  ;;  %v4215_v39 = vmul.f32 %v8458_v43, %v4205_v35 }
 0x641   : > { %7800 = vmatpush1.bf16.msra.mxu0 %v7799_v50  ;;  %4020 = vmatprep.mubr.f32.mxu0 %v8756_v0 }
 0x642   : > { %7802 = vmatprep.subr.bf16.mxu0 %v7801_v59  ;;  %v4202_v17 = vpop.permute.xlu1 %4201 }
 0x643   : > { %v4210_v21 = vsel %vm1433_vm8, %v4202_v17, %v4194_v11  ;;  %v4206_v29 = vsel %vm1433_vm8, %v4194_v11, %v4202_v17 }
 0x644   : > { %7575 = vmatmul.mubr.msk.f32.gmra.mrb[12].mxu0 %vm1741_vm9, %v3930_v13  ;;  %v4218_v32 = vmul.f32 %v8454_v31, %v4210_v21  ;;  %v4217_v41 = vmul.f32 %v8457_v40, %v4206_v29 }
 0x645   : > { %4026 = vmatprep.mubr.f32.mxu0 %v8756_v0 }
 0x646   : > { %v7805_v42 = vpack.c.bf16 %v4218_v32, %v4216_v37  ;;  %v7807_v47 = vpack.c.bf16 %v4217_v41, %v4215_v39 }
 0x648   : > { %7576 = vmatmul.mubr.msk.f32.gmra.mrb[14].mxu0 %vm1741_vm9, %v3931_v22 }
 0x649   : > { %4154 = vmatprep.mubr.f32.mxu0 %v8756_v0 }
 0x64c   : > { %7577 = vmatmul.mubr.msk.f32.vlgmr.msra.gmra.mrb[8].mxu0 %vm1741_vm9, %v4074_v34 }
 0x64d   : > { %7804 = vmatpush1.bf16.msra.mxu0 %v7803_v38  ;;  %4160 = vmatprep.mubr.f32.mxu0 %v8756_v0 }
 0x64e   : > { %7806 = vmatprep.subr.bf16.mxu0 %v7805_v42 }
 0x650   : > { %7578 = vmatmul.mubr.msk.f32.gmra.mrb[10].mxu0 %vm1741_vm9, %v4075_v46 }
 0x651   : > { %7808 = vmatpush1.bf16.msra.mxu0 %v7807_v47  ;;  %4166 = vmatprep.mubr.f32.mxu0 %v8756_v0 }
 0x654   : > { %7579 = vmatmul.mubr.msk.f32.gmra.mrb[12].mxu0 %vm1741_vm9, %v4076_v48 }
 0x655   : > { %4172 = vmatprep.mubr.f32.mxu0 %v8756_v0 }
 0x658   : > { %7580 = vmatmul.mubr.msk.f32.gmra.mrb[14].mxu0 %vm1741_vm9, %v4077_v51 }
 0x659   : > { %4300 = vmatprep.mubr.f32.mxu0 %v8756_v0 }
 0x65c   : > { %7581 = vmatmul.mubr.msk.f32.vlgmr.msra.gmra.mrb[8].mxu0 %vm1741_vm9, %v4220_v56 }
 0x65d   : > { %4306 = vmatprep.mubr.f32.mxu0 %v8756_v0 }
 0x660   : > { %7582 = vmatmul.mubr.msk.f32.gmra.mrb[10].mxu0 %vm1741_vm9, %v4221_v63 }
 0x661   : > { %4312 = vmatprep.mubr.f32.mxu0 %v8756_v0 }
 0x664   : > { %7583 = vmatmul.mubr.msk.f32.gmra.mrb[12].mxu0 %vm1741_vm9, %v4222_v49 }
 0x665   : > { %4318 = vmatprep.mubr.f32.mxu0 %v8756_v0 }
 0x668   : > { %7584 = vmatmul.mubr.msk.f32.gmra.mrb[14].mxu0 %vm1741_vm9, %v4223_v57 }
 0x669   : > { %5907 = vmatprep.mubr.f32.mxu0 %v8756_v0 }
 0x72f   : > { %v10434_v54 = vpop.f32.mrb[8].mxu0 }
 0x730   : > { %v4349_v61 = vmul.f32 %v10434_v54, %v10434_v54  ;;  %v10438_v44 = vpop.f32.mrb[9].mxu0 }
 0x731   : > { %v4333_v55 = vadd.f32 %v10438_v44, %v10434_v54  ;;  %v4350_v1 = vmul.f32 %v10438_v44, %v10438_v44 }
 0x733   : > { %4334 = vadd.xlane.f32.xlu0 %v4333_v55  ;;  %v10444_v45 = vpop.f32.mrb[10].mxu0  ;;  %v4357_v3 = vadd.f32 %v4350_v1, %v4349_v61 }
 0x734   : > { %v4351_v60 = vmul.f32 %v10444_v45, %v10444_v45  ;;  %v10448_v2 = vpop.f32.mrb[11].mxu0 }
 0x735   : > { %v4336_v4 = vadd.f32 %v10448_v2, %v10444_v45  ;;  %v4352_v53 = vmul.f32 %v10448_v2, %v10448_v2 }
 0x737   : > { %4358 = vadd.xlane.f32.xlu0 %v4357_v3  ;;  %4337 = vadd.xlane.f32.xlu1 %v4336_v4  ;;  %v10454_v52 = vpop.f32.mrb[12].mxu0  ;;  %v4360_v5 = vadd.f32 %v4352_v53, %v4351_v60 }
 0x738   : > { %v4353_v12 = vmul.f32 %v10454_v52, %v10454_v52  ;;  %v10458_v9 = vpop.f32.mrb[13].mxu0 }
 0x739   : > { %v4339_v10 = vadd.f32 %v10458_v9, %v10454_v52  ;;  %v4354_v58 = vmul.f32 %v10458_v9, %v10458_v9 }
 0x73b   : > { %4361 = vadd.xlane.f32.xlu0 %v4360_v5  ;;  %4340 = vadd.xlane.f32.xlu1 %v4339_v10  ;;  %v10464_v11 = vpop.f32.mrb[14].mxu0  ;;  %v4363_v59 = vadd.f32 %v4354_v58, %v4353_v12 }
 0x73c   : > { %v4355_v50 = vmul.f32 %v10464_v11, %v10464_v11  ;;  %v10468_v13 = vpop.f32.mrb[15].mxu0 }
 0x73d   : > { %v4342_v17 = vadd.f32 %v10468_v13, %v10464_v11  ;;  %v4356_v19 = vmul.f32 %v10468_v13, %v10468_v13 }
 0x73f   : > { %4364 = vadd.xlane.f32.xlu1 %v4363_v59  ;;  %4343 = vadd.xlane.f32.xlu0 %v4342_v17  ;;  %v4366_v20 = vadd.f32 %v4356_v19, %v4355_v50 }
 0x743   : > { %4367 = vadd.xlane.f32.xlu0 %v4366_v20 }
 0x7c0   : > { %v4335_v21 = vpop.xlane.xlu0 %4334 }
 0x7c1   : > { %v4345_v22 = vmul.f32 0.00390625, %v4335_v21 }
 0x7c3   : > { %v4373_v28 = vmul.f32 %v4345_v22, %v4345_v22  ;;  %v4381_v49 = vsub.f32 %v10434_v54, %v4345_v22  ;;  %v4382_v55 = vsub.f32 %v10438_v44, %v4345_v22 }
 0x7c4   : > { %v4359_v24 = vpop.xlane.xlu0 %4358  ;;  %v4338_v27 = vpop.xlane.xlu1 %4337 }
 0x7c5   : > { %v4369_v26 = vmul.f32 0.00390625, %v4359_v24  ;;  %v4346_v29 = vmul.f32 0.00390625, %v4338_v27  ;;  %v8459_v24 = vld [vmem:[%s11708_s2 + $0x40] sm:$0xff] }
 0x7c7   : > { %v4377_v31 = vsub.f32 %v4369_v26, %v4373_v28  ;;  %v4374_v35 = vmul.f32 %v4346_v29, %v4346_v29  ;;  %v4383_v4 = vsub.f32 %v10444_v45, %v4346_v29  ;;  %v4384_v5 = vsub.f32 %v10448_v2, %v4346_v29  ;;  %v8460_v29 = vld [vmem:[%s11708_s2 + $0x48] sm:$0xff] }
 0x7c8   : > { %v4362_v32 = vpop.xlane.xlu0 %4361  ;;  %v4341_v16 = vpop.xlane.xlu1 %4340 }
 0x7c9   : > { %v4389_v33 = vadd.f32 1e-05, %v4377_v31  ;;  %v4370_v34 = vmul.f32 0.00390625, %v4362_v32  ;;  %v4347_v36 = vmul.f32 0.00390625, %v4341_v16  ;;  %v8461_v32 = vld [vmem:[%s11708_s2 + $0x50] sm:$0xff] }
 0x7cb   : > { %8371 = vrsqrt.f32 %v4389_v33  ;;  %v4378_v37 = vsub.f32 %v4370_v34, %v4374_v35  ;;  %v4375_v42 = vmul.f32 %v4347_v36, %v4347_v36  ;;  %v4385_v58 = vsub.f32 %v10454_v52, %v4347_v36  ;;  %v8462_v33 = vld [vmem:[%s11708_s2 + $0x58] sm:$0xff] }
 0x7cc   : > { %v4365_v38 = vpop.xlane.xlu1 %4364  ;;  %v4344_v40 = vpop.xlane.xlu0 %4343  ;;  %v4386_v59 = vsub.f32 %v10458_v9, %v4347_v36 }
 0x7cd   : > { %v4390_v41 = vadd.f32 1e-05, %v4378_v37  ;;  %v4371_v43 = vmul.f32 0.00390625, %v4365_v38  ;;  %v4348_v39 = vmul.f32 0.00390625, %v4344_v40 }
 0x7cf   : > { %8373 = vrsqrt.f32 %v4390_v41  ;;  %v4379_v46 = vsub.f32 %v4371_v43, %v4375_v42  ;;  %v4376_v51 = vmul.f32 %v4348_v39, %v4348_v39  ;;  %v4388_v17 = vsub.f32 %v10468_v13, %v4348_v39 }
 0x7d0   : > { %v4368_v47 = vpop.xlane.xlu0 %4367 }
 0x7d1   : > { %v4391_v48 = vadd.f32 1e-05, %v4379_v46  ;;  %v4372_v56 = vmul.f32 0.00390625, %v4368_v47  ;;  %v8463_v47 = vld [vmem:[%s11708_s2 + $0x60] sm:$0xff] }
 0x7d3   : > { %8375 = vrsqrt.f32 %v4391_v48  ;;  %v4380_v63 = vsub.f32 %v4372_v56, %v4376_v51  ;;  %v8464_v51 = vld [vmem:[%s11708_s2 + $0x68] sm:$0xff] }
 0x7d5   : > { %v8372_v57 = vpop.eup %8371  ;;  %v4392_v61 = vadd.f32 1e-05, %v4380_v63  ;;  %v8465_v63 = vld [vmem:[%s11708_s2 + $0x70] sm:$0xff] }
 0x7d6   : > { %v4397_v1 = vmul.f32 %v8372_v57, %v4381_v49  ;;  %v4398_v3 = vmul.f32 %v8372_v57, %v4382_v55  ;;  %v8466_v57 = vld [vmem:[%s11708_s2 + $0x78] sm:$0xff] }
 0x7d7   : > { %8377 = vrsqrt.f32 %v4392_v61 }
 0x7d8   : > { %v10477_v60 = vadd.f32 %v4397_v1, %v9286_v6  ;;  %v10484_v54 = vadd.f32 %v4398_v3, %v9290_v62 }
 0x7d9   : > { %v8374_v53 = vpop.eup %8373 }
 0x7da   : > { %v4399_v12 = vmul.f32 %v8374_v53, %v4383_v4  ;;  %4449 = vrot.lane.b32.xlu1 %v10477_v60, %s8758_s12  ;;  %v4400_v10 = vmul.f32 %v8374_v53, %v4384_v5 }
 0x7dc   : > { %v10487_v44 = vadd.f32 %v4399_v12, %v9292_v14  ;;  %v10496_v2 = vadd.f32 %v4400_v10, %v9298_v15  ;;  %v4387_v14 = vsub.f32 %v10464_v11, %v4348_v39  ;;  %v4482_v12 = vld [vmem:[#allocation7 + $0x20] sm:$0xff] }
 0x7dd   : > { %v8376_v6 = vpop.eup %8375 }
 0x7de   : > { %v4401_v45 = vmul.f32 %v8376_v6, %v4385_v58  ;;  %4457 = vrot.lane.b32.xlu1 %v10484_v54, %s8758_s12  ;;  %4451 = vrot.lane.b32.xlu0 %v10487_v44, %s8758_s12  ;;  %v4402_v62 = vmul.f32 %v8376_v6, %v4386_v59 }
 0x7e0   : > { %v10499_v50 = vadd.f32 %v4401_v45, %v9306_v30  ;;  %v10508_v19 = vadd.f32 %v4402_v62, %v9310_v18  ;;  %v8467_v45 = vld [vmem:[%s11708_s2] sm:$0xff] }
 0x7e1   : > { %v8378_v52 = vpop.eup %8377 }
 0x7e2   : > { %v4403_v9 = vmul.f32 %v8378_v52, %v4387_v14  ;;  %4459 = vrot.lane.b32.xlu1 %v10496_v2, %s8758_s12  ;;  %4453 = vrot.lane.b32.xlu0 %v10499_v50, %s8758_s12  ;;  %v4404_v15 = vmul.f32 %v8378_v52, %v4388_v17  ;;  %v8468_v14 = vld [vmem:[%s11708_s2 + $0x8] sm:$0xff]  ;;  %v8469_v17 = vld [vmem:[%s11708_s2 + $0x10] sm:$0xff] }
 0x7e4   : > { %v10511_v20 = vadd.f32 %v4403_v9, %v9312_v23  ;;  %v10518_v30 = vadd.f32 %v4404_v15, %v9318_v25  ;;  %v8470_v15 = vld [vmem:[%s11708_s2 + $0x18] sm:$0xff] }
 0x7e6   : > { %4461 = vrot.lane.b32.xlu0 %v10508_v19, %s8758_s12  ;;  %4455 = vrot.lane.b32.xlu1 %v10511_v20, %s8758_s12 }
 0x7ea   : > { %4413 = vrot.lane.b32.xlu0 %v10477_v60, %s8759_s26  ;;  %4463 = vrot.lane.b32.xlu1 %v10518_v30, %s8758_s12 }
 0x7ee   : > { %4421 = vrot.lane.b32.xlu0 %v10484_v54, %s8759_s26  ;;  %4415 = vrot.lane.b32.xlu1 %v10487_v44, %s8759_s26 }
 0x7f2   : > { %4417 = vrot.lane.b32.xlu0 %v10499_v50, %s8759_s26  ;;  %4423 = vrot.lane.b32.xlu1 %v10496_v2, %s8759_s26 }
 0x7f6   : > { %4425 = vrot.lane.b32.xlu0 %v10508_v19, %s8759_s26  ;;  %4419 = vrot.lane.b32.xlu1 %v10511_v20, %s8759_s26 }
 0x7fa   : > { %4688 = vrot.lane.b32.xlu0 %v10477_v60, %s8761_s22  ;;  %4427 = vrot.lane.b32.xlu1 %v10518_v30, %s8759_s26 }
 0x7fe   : > { %4696 = vrot.lane.b32.xlu0 %v10484_v54, %s8761_s22  ;;  %4690 = vrot.lane.b32.xlu1 %v10487_v44, %s8761_s22 }
 0x802   : > { %4692 = vrot.lane.b32.xlu0 %v10499_v50, %s8761_s22  ;;  %4698 = vrot.lane.b32.xlu1 %v10496_v2, %s8761_s22 }
 0x806   : > { %4700 = vrot.lane.b32.xlu0 %v10508_v19, %s8761_s22  ;;  %4694 = vrot.lane.b32.xlu1 %v10511_v20, %s8761_s22 }
 0x80a   : > { %4834 = vrot.lane.b32.xlu0 %v10477_v60, %s8763_s17  ;;  %4702 = vrot.lane.b32.xlu1 %v10518_v30, %s8761_s22 }
 0x80e   : > { %4842 = vrot.lane.b32.xlu0 %v10484_v54, %s8763_s17  ;;  %4836 = vrot.lane.b32.xlu1 %v10487_v44, %s8763_s17 }
 0x812   : > { %4838 = vrot.lane.b32.xlu0 %v10499_v50, %s8763_s17  ;;  %4844 = vrot.lane.b32.xlu1 %v10496_v2, %s8763_s17 }
 0x816   : > { %4846 = vrot.lane.b32.xlu0 %v10508_v19, %s8763_s17  ;;  %4840 = vrot.lane.b32.xlu1 %v10511_v20, %s8763_s17 }
 0x81a   : > { %5094 = vrot.lane.b32.xlu0 %v10477_v60, %s8757_s25  ;;  %4848 = vrot.lane.b32.xlu1 %v10518_v30, %s8763_s17 }
 0x81e   : > { %5102 = vrot.lane.b32.xlu0 %v10484_v54, %s8757_s25  ;;  %5096 = vrot.lane.b32.xlu1 %v10487_v44, %s8757_s25 }
 0x822   : > { %5098 = vrot.lane.b32.xlu0 %v10499_v50, %s8757_s25  ;;  %5104 = vrot.lane.b32.xlu1 %v10496_v2, %s8757_s25 }
 0x826   : > { %5106 = vrot.lane.b32.xlu0 %v10508_v19, %s8757_s25  ;;  %5100 = vrot.lane.b32.xlu1 %v10511_v20, %s8757_s25 }
 0x82a   : > { %5240 = vrot.lane.b32.xlu0 %v10477_v60, %s8760_s19  ;;  %5108 = vrot.lane.b32.xlu1 %v10518_v30, %s8757_s25 }
 0x82e   : > { %5248 = vrot.lane.b32.xlu0 %v10484_v54, %s8760_s19  ;;  %5242 = vrot.lane.b32.xlu1 %v10487_v44, %s8760_s19 }
 0x832   : > { %5244 = vrot.lane.b32.xlu0 %v10499_v50, %s8760_s19  ;;  %5250 = vrot.lane.b32.xlu1 %v10496_v2, %s8760_s19 }
 0x836   : > { %5252 = vrot.lane.b32.xlu0 %v10508_v19, %s8760_s19  ;;  %5246 = vrot.lane.b32.xlu1 %v10511_v20, %s8760_s19 }
 0x83a   : > { %5386 = vrot.lane.b32.xlu0 %v10477_v60, %s8762_s30  ;;  %5254 = vrot.lane.b32.xlu1 %v10518_v30, %s8760_s19 }
 0x83e   : > { %5394 = vrot.lane.b32.xlu0 %v10484_v54, %s8762_s30  ;;  %5388 = vrot.lane.b32.xlu1 %v10487_v44, %s8762_s30 }
 0x842   : > { %5390 = vrot.lane.b32.xlu0 %v10499_v50, %s8762_s30  ;;  %5396 = vrot.lane.b32.xlu1 %v10496_v2, %s8762_s30 }
 0x846   : > { %5398 = vrot.lane.b32.xlu0 %v10508_v19, %s8762_s30  ;;  %5392 = vrot.lane.b32.xlu1 %v10511_v20, %s8762_s30 }
 0x84a   : > { %5532 = vrot.lane.b32.xlu0 %v10477_v60, %s8764_s20  ;;  %5400 = vrot.lane.b32.xlu1 %v10518_v30, %s8762_s30 }
 0x84c   : > { %v4450_v18 = vpop.permute.xlu1 %4449 }
 0x84e   : > { %5540 = vrot.lane.b32.xlu0 %v10484_v54, %s8764_s20  ;;  %5534 = vrot.lane.b32.xlu1 %v10487_v44, %s8764_s20 }
 0x850   : > { %v4458_v23 = vpop.permute.xlu1 %4457  ;;  %v4452_v25 = vpop.permute.xlu0 %4451 }
 0x851   : > { %v4469_v11 = vsel %vm469_vm2, %v4458_v23, %v4450_v18  ;;  %v4465_v13 = vsel %vm469_vm2, %v4450_v18, %v4458_v23  ;;  %v4483_v23 = vld [vmem:[#allocation7 + $0x28] sm:$0xff] }
 0x852   : > { %5536 = vrot.lane.b32.xlu0 %v10499_v50, %s8764_s20  ;;  %5542 = vrot.lane.b32.xlu1 %v10496_v2, %s8764_s20  ;;  %v4473_v27 = vmul.f32 %v8459_v24, %v4469_v11  ;;  %v4474_v31 = vmul.f32 %v8460_v29, %v4465_v13 }
 0x854   : > { %v4460_v21 = vpop.permute.xlu1 %4459  ;;  %v4454_v22 = vpop.permute.xlu0 %4453 }
 0x855   : > { %v4466_v28 = vsel %vm469_vm2, %v4452_v25, %v4460_v21  ;;  %v4470_v26 = vsel %vm469_vm2, %v4460_v21, %v4452_v25 }
 0x856   : > { %v4475_v16 = vmul.f32 %v8461_v32, %v4470_v26  ;;  %v4476_v34 = vmul.f32 %v8462_v33, %v4466_v28  ;;  %5544 = vrot.lane.b32.xlu0 %v10508_v19, %s8764_s20  ;;  %5538 = vrot.lane.b32.xlu1 %v10511_v20, %s8764_s20  ;;  %v8471_v32 = vld [vmem:[%s11708_s2 + $0x20] sm:$0xff]  ;;  %v8472_v33 = vld [vmem:[%s11708_s2 + $0x28] sm:$0xff] }
 0x858   : > { %v7811_v35 = vpack.c.bf16 %v4475_v16, %v4473_v27  ;;  %v4456_v36 = vpop.permute.xlu1 %4455  ;;  %v4462_v37 = vpop.permute.xlu0 %4461  ;;  %v7809_v38 = vpack.c.bf16 %v4476_v34, %v4474_v31  ;;  %v4484_v27 = vld [vmem:[#allocation7 + $0x30] sm:$0xff] }
 0x859   : > { %v4467_v40 = vsel %vm469_vm2, %v4454_v22, %v4462_v37  ;;  %v4471_v41 = vsel %vm469_vm2, %v4462_v37, %v4454_v22  ;;  %v8474_v37 = vld [vmem:[%s11708_s2 + $0x38] sm:$0xff] }
 0x85a   : > { %5546 = vrot.lane.b32.xlu1 %v10518_v30, %s8764_s20  ;;  %7810 = vmatprep.subr.bf16.mxu1 %v7809_v38  ;;  %v4477_v48 = vmul.f32 %v8463_v47, %v4471_v41  ;;  %v4478_v56 = vmul.f32 %v8464_v51, %v4467_v40  ;;  %v4485_v40 = vld [vmem:[#allocation7 + $0x38] sm:$0xff] }
 0x85b   : > { %7812 = vmatpush1.bf16.msra.mxu1 %v7811_v35  ;;  %v8473_v35 = vld [vmem:[%s11708_s2 + $0x30] sm:$0xff] }
 0x85c   : > { %v4464_v42 = vpop.permute.xlu1 %4463  ;;  %v4414_v43 = vpop.permute.xlu0 %4413 }
 0x85d   : > { %v4468_v39 = vsel %vm469_vm2, %v4456_v36, %v4464_v42  ;;  %v4472_v46 = vsel %vm469_vm2, %v4464_v42, %v4456_v36 }
 0x85e   : > { %v4479_v49 = vmul.f32 %v8465_v63, %v4472_v46  ;;  %v4480_v61 = vmul.f32 %v8466_v57, %v4468_v39  ;;  %v8475_v57 = vld [vmem:[%s11708_s2 + $0x80] sm:$0xff] }
 0x860   : > { %v7815_v55 = vpack.c.bf16 %v4479_v49, %v4477_v48  ;;  %v4416_v1 = vpop.permute.xlu1 %4415  ;;  %v4422_v3 = vpop.permute.xlu0 %4421  ;;  %v7813_v4 = vpack.c.bf16 %v4480_v61, %v4478_v56  ;;  %v4445_v48 = vld [vmem:[#allocation7] sm:$0xff] }
 0x861   : > { %v4429_v53 = vsel %vm454_vm3, %v4414_v43, %v4422_v3  ;;  %v4433_v5 = vsel %vm454_vm3, %v4422_v3, %v4414_v43  ;;  %v8477_v3 = vld [vmem:[%s11708_s2 + $0x90] sm:$0xff] }
 0x862   : > { %7814 = vmatprep.subr.bf16.mxu1 %v7813_v4  ;;  %v4437_v62 = vmul.f32 %v8467_v45, %v4433_v5  ;;  %v4438_v52 = vmul.f32 %v8468_v14, %v4429_v53  ;;  %v8478_v53 = vld [vmem:[%s11708_s2 + $0x98] sm:$0xff]  ;;  %v4447_v14 = vld [vmem:[#allocation7 + $0x10] sm:$0xff] }
 0x863   : > { %7816 = vmatpush1.bf16.msra.mxu1 %v7815_v55  ;;  %v8476_v55 = vld [vmem:[%s11708_s2 + $0x88] sm:$0xff] }
 0x864   : > { %v4424_v10 = vpop.permute.xlu1 %4423  ;;  %v4418_v58 = vpop.permute.xlu0 %4417 }
 0x865   : > { %v4430_v6 = vsel %vm454_vm3, %v4416_v1, %v4424_v10  ;;  %v4434_v59 = vsel %vm454_vm3, %v4424_v10, %v4416_v1 }
 0x866   : > { %v4439_v9 = vmul.f32 %v8469_v17, %v4434_v59  ;;  %v4440_v18 = vmul.f32 %v8470_v15, %v4430_v6  ;;  %7585 = vmatmul.mubr.msk.f32.vlgmr.msra.gmra.mrb[20].mxu1 %vm1741_vm9, %v4482_v12  ;;  %v4446_v12 = vld [vmem:[#allocation7 + $0x8] sm:$0xff] }
 0x867   : > { %4568 = vmatprep.mubr.f32.mxu1 %v8756_v0 }
 0x868   : > { %v7819_v25 = vpack.c.bf16 %v4439_v9, %v4437_v62  ;;  %v4420_v11 = vpop.permute.xlu1 %4419  ;;  %v4426_v13 = vpop.permute.xlu0 %4425  ;;  %v7817_v21 = vpack.c.bf16 %v4440_v18, %v4438_v52  ;;  %v8479_v18 = vld [vmem:[%s11708_s2 + $0xa0] sm:$0xff] }
 0x869   : > { %v4431_v22 = vsel %vm454_vm3, %v4418_v58, %v4426_v13  ;;  %v4435_v24 = vsel %vm454_vm3, %v4426_v13, %v4418_v58  ;;  %v8481_v13 = vld [vmem:[%s11708_s2 + $0xb0] sm:$0xff] }
 0x86a   : > { %7586 = vmatmul.mubr.msk.f32.gmra.mrb[22].mxu1 %vm1741_vm9, %v4483_v23  ;;  %7818 = vmatprep.subr.bf16.mxu1 %v7817_v21  ;;  %v4441_v16 = vmul.f32 %v8471_v32, %v4435_v24  ;;  %v4442_v34 = vmul.f32 %v8472_v33, %v4431_v22  ;;  %v8482_v22 = vld [vmem:[%s11708_s2 + $0xb8] sm:$0xff]  ;;  %v4721_v33 = vld [vmem:[#allocation7 + $0x40] sm:$0xff] }
 0x86b   : > { %7820 = vmatpush1.bf16.msra.mxu1 %v7819_v25  ;;  %4574 = vmatprep.mubr.f32.mxu1 %v8756_v0  ;;  %v8480_v25 = vld [vmem:[%s11708_s2 + $0xa8] sm:$0xff] }
 0x86c   : > { %v4428_v28 = vpop.permute.xlu1 %4427  ;;  %v4689_v26 = vpop.permute.xlu0 %4688 }
 0x86d   : > { %v4432_v29 = vsel %vm454_vm3, %v4420_v11, %v4428_v28  ;;  %v4436_v31 = vsel %vm454_vm3, %v4428_v28, %v4420_v11 }
 0x86e   : > { %v4443_v36 = vmul.f32 %v8473_v35, %v4436_v31  ;;  %v4444_v38 = vmul.f32 %v8474_v37, %v4432_v29  ;;  %7587 = vmatmul.mubr.msk.f32.gmra.mrb[24].mxu1 %vm1741_vm9, %v4484_v27  ;;  %v4448_v27 = vld [vmem:[#allocation7 + $0x18] sm:$0xff] }
 0x86f   : > { %4580 = vmatprep.mubr.f32.mxu1 %v8756_v0 }
 0x870   : > { %v7823_v41 = vpack.c.bf16 %v4443_v36, %v4441_v16  ;;  %v4691_v42 = vpop.permute.xlu1 %4690  ;;  %v4697_v43 = vpop.permute.xlu0 %4696  ;;  %v7821_v39 = vpack.c.bf16 %v4444_v38, %v4442_v34  ;;  %v8483_v38 = vld [vmem:[%s11708_s2 + $0xc0] sm:$0xff] }
 0x871   : > { %v4704_v46 = vsel %vm689_vm5, %v4689_v26, %v4697_v43  ;;  %v4708_v47 = vsel %vm689_vm5, %v4697_v43, %v4689_v26  ;;  %v8485_v43 = vld [vmem:[%s11708_s2 + $0xd0] sm:$0xff] }
 0x872   : > { %7588 = vmatmul.mubr.msk.f32.gmra.mrb[26].mxu1 %vm1741_vm9, %v4485_v40  ;;  %7822 = vmatprep.subr.bf16.mxu1 %v7821_v39  ;;  %v4712_v61 = vmul.f32 %v8475_v57, %v4708_v47  ;;  %v4713_v1 = vmul.f32 %v8476_v55, %v4704_v46  ;;  %v8486_v46 = vld [vmem:[%s11708_s2 + $0xd8] sm:$0xff]  ;;  %v4723_v55 = vld [vmem:[#allocation7 + $0x50] sm:$0xff] }
 0x873   : > { %7824 = vmatpush1.bf16.msra.mxu1 %v7823_v41  ;;  %4663 = vmatprep.mubr.f32.mxu1 %v8756_v0  ;;  %v8484_v41 = vld [vmem:[%s11708_s2 + $0xc8] sm:$0xff] }
 0x874   : > { %v4699_v51 = vpop.permute.xlu1 %4698  ;;  %v4693_v56 = vpop.permute.xlu0 %4692 }
 0x875   : > { %v4705_v63 = vsel %vm689_vm5, %v4691_v42, %v4699_v51  ;;  %v4709_v49 = vsel %vm689_vm5, %v4699_v51, %v4691_v42 }
 0x876   : > { %v4714_v4 = vmul.f32 %v8477_v3, %v4709_v49  ;;  %v4715_v5 = vmul.f32 %v8478_v53, %v4705_v63  ;;  %7589 = vmatmul.mubr.msk.f32.vlgmr.msra.gmra.mrb[20].mxu1 %vm1741_vm9, %v4445_v48  ;;  %v4722_v48 = vld [vmem:[#allocation7 + $0x48] sm:$0xff] }
 0x877   : > { %4669 = vmatprep.mubr.f32.mxu1 %v8756_v0 }
 0x878   : > { %v7827_v10 = vpack.c.bf16 %v4714_v4, %v4712_v61  ;;  %v4695_v58 = vpop.permute.xlu1 %4694  ;;  %v4701_v6 = vpop.permute.xlu0 %4700  ;;  %v7825_v59 = vpack.c.bf16 %v4715_v5, %v4713_v1  ;;  %v8487_v5 = vld [vmem:[%s11708_s2 + $0xe0] sm:$0xff] }
 0x879   : > { %v4706_v45 = vsel %vm689_vm5, %v4693_v56, %v4701_v6  ;;  %v4710_v62 = vsel %vm689_vm5, %v4701_v6, %v4693_v56  ;;  %v8489_v6 = vld [vmem:[%s11708_s2 + $0xf0] sm:$0xff] }
 0x87a   : > { %7590 = vmatmul.mubr.msk.f32.gmra.mrb[22].mxu1 %vm1741_vm9, %v4446_v12  ;;  %7826 = vmatprep.subr.bf16.mxu1 %v7825_v59  ;;  %v4716_v23 = vmul.f32 %v8479_v18, %v4710_v62  ;;  %v4717_v11 = vmul.f32 %v8480_v25, %v4706_v45  ;;  %v8490_v45 = vld [vmem:[%s11708_s2 + $0xf8] sm:$0xff]  ;;  %v7841_v18 = vpack.c.bf16 %v10496_v2, %v10484_v54 }
 0x87b   : > { %7828 = vmatpush1.bf16.msra.mxu1 %v7827_v10  ;;  %4675 = vmatprep.mubr.f32.mxu1 %v8756_v0  ;;  %v8488_v10 = vld [vmem:[%s11708_s2 + $0xe8] sm:$0xff] }
 0x87c   : > { %v4703_v52 = vpop.permute.xlu1 %4702  ;;  %v4835_v17 = vpop.permute.xlu0 %4834 }
 0x87d   : > { %v4707_v9 = vsel %vm689_vm5, %v4695_v58, %v4703_v52  ;;  %v4711_v15 = vsel %vm689_vm5, %v4703_v52, %v4695_v58 }
 0x87e   : > { %v4718_v21 = vmul.f32 %v8481_v13, %v4711_v15  ;;  %v4719_v24 = vmul.f32 %v8482_v22, %v4707_v9  ;;  %7591 = vmatmul.mubr.msk.f32.gmra.mrb[24].mxu1 %vm1741_vm9, %v4447_v14  ;;  %v4724_v14 = vld [vmem:[#allocation7 + $0x58] sm:$0xff]  ;;  %v7843_v22 = vpack.c.bf16 %v10487_v44, %v10477_v60 }
 0x87f   : > { %4681 = vmatprep.mubr.f32.mxu1 %v8756_v0 }
 0x880   : > { %v7831_v28 = vpack.c.bf16 %v4718_v21, %v4716_v23  ;;  %v4837_v26 = vpop.permute.xlu1 %4836  ;;  %v4843_v29 = vpop.permute.xlu0 %4842  ;;  %v7829_v31 = vpack.c.bf16 %v4719_v24, %v4717_v11  ;;  %v4867_v23 = vld [vmem:[#allocation7 + $0x60] sm:$0xff]  ;;  %v8491_v24 = vld [vmem:[%s11708_s2 + $0x158] sm:$0xff] }
 0x881   : > { %v4850_v32 = vsel %vm815_vm7, %v4835_v17, %v4843_v29  ;;  %v4854_v16 = vsel %vm815_vm7, %v4843_v29, %v4835_v17  ;;  %v8492_v29 = vld [vmem:[%s11708_s2 + $0x148] sm:$0xff] }
 0x882   : > { %7592 = vmatmul.mubr.msk.f32.gmra.mrb[26].mxu1 %vm1741_vm9, %v4448_v27  ;;  %7830 = vmatprep.subr.bf16.mxu1 %v7829_v31  ;;  %v4858_v40 = vmul.f32 %v8483_v38, %v4854_v16  ;;  %v4859_v42 = vmul.f32 %v8484_v41, %v4850_v32  ;;  %v4870_v41 = vld [vmem:[#allocation7 + $0x78] sm:$0xff] }
 0x883   : > { %7832 = vmatpush1.bf16.msra.mxu1 %v7831_v28  ;;  %4801 = vmatprep.mubr.f32.mxu1 %v8756_v0  ;;  %v7845_v28 = vpack.c.bf16 %v10518_v30, %v10508_v19 }
 0x884   : > { %v4845_v34 = vpop.permute.xlu1 %4844  ;;  %v4839_v35 = vpop.permute.xlu0 %4838 }
 0x885   : > { %v4851_v36 = vsel %vm815_vm7, %v4837_v26, %v4845_v34  ;;  %v4855_v37 = vsel %vm815_vm7, %v4845_v34, %v4837_v26  ;;  %v4868_v26 = vld [vmem:[#allocation7 + $0x68] sm:$0xff] }
 0x886   : > { %v4860_v39 = vmul.f32 %v8485_v43, %v4855_v37  ;;  %v4861_v47 = vmul.f32 %v8486_v46, %v4851_v36  ;;  %7593 = vmatmul.mubr.msk.f32.vlgmr.msra.gmra.mrb[20].mxu1 %vm1741_vm9, %v4721_v33  ;;  %v7847_v33 = vpack.c.bf16 %v10511_v20, %v10499_v50  ;;  %v8493_v46 = vld [vmem:[%s11708_s2 + $0x150] sm:$0xff] }
 0x887   : > { %4807 = vmatprep.mubr.f32.mxu1 %v8756_v0 }
 0x888   : > { %v7835_v51 = vpack.c.bf16 %v4860_v39, %v4858_v40  ;;  %v4841_v56 = vpop.permute.xlu1 %4840  ;;  %v4847_v63 = vpop.permute.xlu0 %4846  ;;  %v7833_v49 = vpack.c.bf16 %v4861_v47, %v4859_v42 }
 0x889   : > { %v4852_v57 = vsel %vm815_vm7, %v4839_v35, %v4847_v63  ;;  %v4856_v61 = vsel %vm815_vm7, %v4847_v63, %v4839_v35  ;;  %v4869_v35 = vld [vmem:[#allocation7 + $0x70] sm:$0xff] }
 0x88a   : > { %7594 = vmatmul.mubr.msk.f32.gmra.mrb[22].mxu1 %vm1741_vm9, %v4722_v48  ;;  %7834 = vmatprep.subr.bf16.mxu1 %v7833_v49  ;;  %v4862_v12 = vmul.f32 %v8487_v5, %v4856_v61  ;;  %v4863_v58 = vmul.f32 %v8488_v10, %v4852_v57  ;;  %v8495_v49 = vld [vmem:[%s11708_s2 + $0x140] sm:$0xff]  ;;  %v8497_v10 = vld [vmem:[%s11708_s2 + $0x170] sm:$0xff] }
 0x88b   : > { %7836 = vmatpush1.bf16.msra.mxu1 %v7835_v51  ;;  %4813 = vmatprep.mubr.f32.mxu1 %v8756_v0 }
 0x88c   : > { %v4849_v1 = vpop.permute.xlu1 %4848  ;;  %v5095_v3 = vpop.permute.xlu0 %5094 }
 0x88d   : > { %v4853_v4 = vsel %vm815_vm7, %v4841_v56, %v4849_v1  ;;  %v4857_v53 = vsel %vm815_vm7, %v4849_v1, %v4841_v56  ;;  %v8494_v56 = vld [vmem:[%s11708_s2 + $0x178] sm:$0xff] }
 0x88e   : > { %v4864_v59 = vmul.f32 %v8489_v6, %v4857_v53  ;;  %v4865_v62 = vmul.f32 %v8490_v45, %v4853_v4  ;;  %7595 = vmatmul.mubr.msk.f32.gmra.mrb[24].mxu1 %vm1741_vm9, %v4723_v55  ;;  %v4981_v55 = vld [vmem:[#allocation7 + $0x80] sm:$0xff] }
 0x88f   : > { %4819 = vmatprep.mubr.f32.mxu1 %v8756_v0 }
 0x890   : > { %v7839_v52 = vpack.c.bf16 %v4864_v59, %v4862_v12  ;;  %v5097_v17 = vpop.permute.xlu1 %5096  ;;  %v5103_v9 = vpop.permute.xlu0 %5102  ;;  %v7837_v15 = vpack.c.bf16 %v4865_v62, %v4863_v58  ;;  %v8498_v59 = vld [vmem:[%s11708_s2 + $0x188] sm:$0xff]  ;;  %v8499_v62 = vld [vmem:[%s11708_s2 + $0x198] sm:$0xff] }
 0x891   : > { %v5114_v13 = vsel %vm1055_vm1, %v5103_v9, %v5095_v3  ;;  %v5110_v42 = vsel %vm1055_vm1, %v5095_v3, %v5103_v9  ;;  %v8496_v3 = vld [vmem:[%s11708_s2 + $0x168] sm:$0xff] }
 0x892   : > { %7596 = vmatmul.mubr.msk.f32.gmra.mrb[26].mxu1 %vm1741_vm9, %v4724_v14  ;;  %7838 = vmatprep.subr.bf16.mxu1 %v7837_v15  ;;  %v5119_v31 = vmul.f32 %v8492_v29, %v5114_v13  ;;  %v5118_v57 = vmul.f32 %v8495_v49, %v5110_v42  ;;  %v4982_v15 = vld [vmem:[#allocation7 + $0x88] sm:$0xff]  ;;  %v4983_v13 = vld [vmem:[#allocation7 + $0x90] sm:$0xff]  ;;  %v8506_v49 = vld [vmem:[%s11708_s2 + $0x1c8] sm:$0xff] }
 0x893   : > { %7840 = vmatpush1.bf16.msra.mxu1 %v7839_v52  ;;  %4947 = vmatprep.mubr.f32.mxu1 %v8756_v0 }
 0x894   : > { %v5105_v25 = vpop.permute.xlu1 %5104  ;;  %7842 = vmatprep.subr.bf16.mxu1 %v7841_v18  ;;  %v5099_v11 = vpop.permute.xlu0 %5098 }
 0x895   : > { %v5115_v21 = vsel %vm1055_vm1, %v5105_v25, %v5097_v17  ;;  %v5111_v38 = vsel %vm1055_vm1, %v5097_v17, %v5105_v25  ;;  %v8500_v17 = vld [vmem:[%s11708_s2 + $0x160] sm:$0xff] }
 0x896   : > { %v5121_v27 = vmul.f32 %v8491_v24, %v5115_v21  ;;  %7597 = vmatmul.mubr.msk.f32.vlgmr.msra.gmra.mrb[20].mxu1 %vm1741_vm9, %v4867_v23  ;;  %v5120_v47 = vmul.f32 %v8493_v46, %v5111_v38 }
 0x897   : > { %7844 = vmatpush1.bf16.msra.mxu1 %v7843_v22  ;;  %4953 = vmatprep.mubr.f32.mxu1 %v8756_v0 }
 0x898   : > { %v5101_v32 = vpop.permute.xlu1 %5100  ;;  %7846 = vmatprep.subr.bf16.mxu1 %v7845_v28  ;;  %v5107_v16 = vpop.permute.xlu0 %5106  ;;  %v7849_v34 = vpack.c.bf16 %v5121_v27, %v5119_v31  ;;  %v7851_v12 = vpack.c.bf16 %v5120_v47, %v5118_v57  ;;  %v4984_v28 = vld [vmem:[#allocation7 + $0x98] sm:$0xff] }
 0x899   : > { %v5116_v48 = vsel %vm1055_vm1, %v5107_v16, %v5099_v11  ;;  %v5112_v1 = vsel %vm1055_vm1, %v5099_v11, %v5107_v16 }
 0x89a   : > { %7598 = vmatmul.mubr.msk.f32.gmra.mrb[22].mxu1 %vm1741_vm9, %v4868_v26  ;;  %v5123_v4 = vmul.f32 %v8496_v3, %v5116_v48  ;;  %v5122_v9 = vmul.f32 %v8500_v17, %v5112_v1  ;;  %v8508_v3 = vld [vmem:[%s11708_s2 + $0x1a0] sm:$0xff] }
 0x89b   : > { %7848 = vmatpush1.bf16.msra.mxu1 %v7847_v33  ;;  %4959 = vmatprep.mubr.f32.mxu1 %v8756_v0 }
 0x89c   : > { %v5109_v36 = vpop.permute.xlu1 %5108  ;;  %7850 = vmatprep.subr.bf16.mxu1 %v7849_v34  ;;  %v5241_v37 = vpop.permute.xlu0 %5240 }
 0x89d   : > { %v5117_v40 = vsel %vm1055_vm1, %v5109_v36, %v5101_v32  ;;  %v5113_v51 = vsel %vm1055_vm1, %v5101_v32, %v5109_v36  ;;  %v8501_v32 = vld [vmem:[%s11708_s2 + $0x190] sm:$0xff] }
 0x89e   : > { %7599 = vmatmul.mubr.msk.f32.gmra.mrb[24].mxu1 %vm1741_vm9, %v4869_v35  ;;  %v5125_v63 = vmul.f32 %v8494_v56, %v5117_v40  ;;  %v5124_v58 = vmul.f32 %v8497_v10, %v5113_v51  ;;  %v8502_v35 = vld [vmem:[%s11708_s2 + $0x1b8] sm:$0xff]  ;;  %v8505_v51 = vld [vmem:[%s11708_s2 + $0x1b0] sm:$0xff] }
 0x89f   : > { %4965 = vmatprep.mubr.f32.mxu1 %v8756_v0 }
 0x8a0   : > { %v5243_v43 = vpop.permute.xlu1 %5242  ;;  %v5249_v39 = vpop.permute.xlu0 %5248  ;;  %v7853_v52 = vpack.c.bf16 %v5125_v63, %v5123_v4  ;;  %v7855_v11 = vpack.c.bf16 %v5124_v58, %v5122_v9 }
 0x8a1   : > { %v5260_v61 = vsel %vm1181_vm4, %v5249_v39, %v5241_v37  ;;  %v5256_v26 = vsel %vm1181_vm4, %v5241_v37, %v5249_v39  ;;  %v8503_v37 = vld [vmem:[%s11708_s2 + $0x180] sm:$0xff] }
 0x8a2   : > { %7600 = vmatmul.mubr.msk.f32.gmra.mrb[26].mxu1 %vm1741_vm9, %v4870_v41  ;;  %v5265_v45 = vmul.f32 %v8498_v59, %v5260_v61  ;;  %v5264_v38 = vmul.f32 %v8503_v37, %v5256_v26  ;;  %v5127_v41 = vld [vmem:[#allocation7 + $0xa0] sm:$0xff]  ;;  %v8507_v61 = vld [vmem:[%s11708_s2 + $0x1d8] sm:$0xff] }
 0x8a3   : > { %5061 = vmatprep.mubr.f32.mxu1 %v8756_v0 }
 0x8a4   : > { %v5251_v53 = vpop.permute.xlu1 %5250  ;;  %v5245_v5 = vpop.permute.xlu0 %5244 }
 0x8a5   : > { %v5261_v6 = vsel %vm1181_vm4, %v5251_v53, %v5243_v43  ;;  %v5257_v24 = vsel %vm1181_vm4, %v5243_v43, %v5251_v53  ;;  %v8504_v43 = vld [vmem:[%s11708_s2 + $0x1a8] sm:$0xff]  ;;  %v5128_v53 = vld [vmem:[#allocation7 + $0xa8] sm:$0xff] }
 0x8a6   : > { %v5267_v14 = vmul.f32 %v8499_v62, %v5261_v6  ;;  %7601 = vmatmul.mubr.msk.f32.vlgmr.msra.gmra.mrb[20].mxu1 %vm1741_vm9, %v4981_v55  ;;  %v5266_v16 = vmul.f32 %v8501_v32, %v5257_v24  ;;  %v5129_v6 = vld [vmem:[#allocation7 + $0xb0] sm:$0xff] }
 0x8a7   : > { %7852 = vmatpush1.bf16.msra.mxu1 %v7851_v12  ;;  %5067 = vmatprep.mubr.f32.mxu1 %v8756_v0 }
 0x8a8   : > { %7854 = vmatprep.subr.bf16.mxu1 %v7853_v52  ;;  %v5247_v18 = vpop.permute.xlu1 %5246  ;;  %v5253_v23 = vpop.permute.xlu0 %5252  ;;  %v7857_v25 = vpack.c.bf16 %v5267_v14, %v5265_v45  ;;  %v7859_v48 = vpack.c.bf16 %v5266_v16, %v5264_v38  ;;  %v5130_v52 = vld [vmem:[#allocation7 + $0xb8] sm:$0xff]  ;;  %v8515_v38 = vld [vmem:[%s11708_s2 + $0x218] sm:$0xff] }
 0x8a9   : > { %v5262_v33 = vsel %vm1181_vm4, %v5253_v23, %v5245_v5  ;;  %v5258_v42 = vsel %vm1181_vm4, %v5245_v5, %v5253_v23 }
 0x8aa   : > { %7602 = vmatmul.mubr.msk.f32.gmra.mrb[22].mxu1 %vm1741_vm9, %v4982_v15  ;;  %v5269_v39 = vmul.f32 %v8504_v43, %v5262_v33  ;;  %v5268_v4 = vmul.f32 %v8508_v3, %v5258_v42  ;;  %v8513_v33 = vld [vmem:[%s11708_s2 + $0x1f0] sm:$0xff]  ;;  %v8516_v42 = vld [vmem:[%s11708_s2 + $0x1e0] sm:$0xff] }
 0x8ab   : > { %7856 = vmatpush1.bf16.msra.mxu1 %v7855_v11  ;;  %5073 = vmatprep.mubr.f32.mxu1 %v8756_v0  ;;  %v8517_v3 = vld [vmem:[%s11708_s2 + $0x210] sm:$0xff] }
 0x8ac   : > { %7858 = vmatprep.subr.bf16.mxu1 %v7857_v25  ;;  %v5255_v21 = vpop.permute.xlu1 %5254  ;;  %v5387_v22 = vpop.permute.xlu0 %5386 }
 0x8ad   : > { %v5263_v27 = vsel %vm1181_vm4, %v5255_v21, %v5247_v18  ;;  %v5259_v34 = vsel %vm1181_vm4, %v5247_v18, %v5255_v21  ;;  %v8509_v18 = vld [vmem:[%s11708_s2 + $0x1d0] sm:$0xff] }
 0x8ae   : > { %7603 = vmatmul.mubr.msk.f32.gmra.mrb[24].mxu1 %vm1741_vm9, %v4983_v13  ;;  %v5271_v36 = vmul.f32 %v8502_v35, %v5263_v27  ;;  %v5270_v56 = vmul.f32 %v8505_v51, %v5259_v34  ;;  %v8510_v13 = vld [vmem:[%s11708_s2 + $0x1f8] sm:$0xff] }
 0x8af   : > { %5079 = vmatprep.mubr.f32.mxu1 %v8756_v0 }
 0x8b0   : > { %v5389_v29 = vpop.permute.xlu1 %5388  ;;  %v5395_v31 = vpop.permute.xlu0 %5394  ;;  %v7861_v1 = vpack.c.bf16 %v5271_v36, %v5269_v39  ;;  %v7863_v58 = vpack.c.bf16 %v5270_v56, %v5268_v4  ;;  %v8514_v36 = vld [vmem:[%s11708_s2 + $0x208] sm:$0xff]  ;;  %v5274_v39 = vld [vmem:[#allocation7 + $0xc8] sm:$0xff]  ;;  %v5275_v56 = vld [vmem:[#allocation7 + $0xd0] sm:$0xff] }
 0x8b1   : > { %v5406_v40 = vsel %vm1307_vm6, %v5395_v31, %v5387_v22  ;;  %v5402_v17 = vsel %vm1307_vm6, %v5387_v22, %v5395_v31  ;;  %v8511_v22 = vld [vmem:[%s11708_s2 + $0x1c0] sm:$0xff] }
 0x8b2   : > { %7604 = vmatmul.mubr.msk.f32.gmra.mrb[26].mxu1 %vm1741_vm9, %v4984_v28  ;;  %v5411_v57 = vmul.f32 %v8506_v49, %v5406_v40  ;;  %v5410_v24 = vmul.f32 %v8511_v22, %v5402_v17  ;;  %v5273_v28 = vld [vmem:[#allocation7 + $0xc0] sm:$0xff] }
 0x8b3   : > { %5207 = vmatprep.mubr.f32.mxu1 %v8756_v0  ;;  %v8521_v17 = vld [vmem:[%s11708_s2 + $0x230] sm:$0xff] }
 0x8b4   : > { %v5397_v46 = vpop.permute.xlu1 %5396  ;;  %v5391_v47 = vpop.permute.xlu0 %5390  ;;  %v5565_v22 = vld [vmem:[#allocation7 + $0x100] sm:$0xff] }
 0x8b5   : > { %v5407_v63 = vsel %vm1307_vm6, %v5397_v46, %v5389_v29  ;;  %v5403_v62 = vsel %vm1307_vm6, %v5389_v29, %v5397_v46  ;;  %v8512_v29 = vld [vmem:[%s11708_s2 + $0x1e8] sm:$0xff] }
 0x8b6   : > { %v5413_v55 = vmul.f32 %v8507_v61, %v5407_v63  ;;  %7605 = vmatmul.mubr.msk.f32.vlgmr.msra.gmra.mrb[20].mxu1 %vm1741_vm9, %v5127_v41  ;;  %v5412_v23 = vmul.f32 %v8509_v18, %v5403_v62  ;;  %v8520_v62 = vld [vmem:[%s11708_s2 + $0x228] sm:$0xff]  ;;  %v8522_v18 = vld [vmem:[%s11708_s2 + $0x220] sm:$0xff] }
 0x8b7   : > { %7860 = vmatpush1.bf16.msra.mxu1 %v7859_v48  ;;  %5213 = vmatprep.mubr.f32.mxu1 %v8756_v0 }
 0x8b8   : > { %7862 = vmatprep.subr.bf16.mxu1 %v7861_v1  ;;  %v5393_v5 = vpop.permute.xlu1 %5392  ;;  %v5399_v12 = vpop.permute.xlu0 %5398  ;;  %v7865_v10 = vpack.c.bf16 %v5413_v55, %v5411_v57  ;;  %v7867_v16 = vpack.c.bf16 %v5412_v23, %v5410_v24  ;;  %v5276_v55 = vld [vmem:[#allocation7 + $0xd8] sm:$0xff]  ;;  %v5566_v24 = vld [vmem:[#allocation7 + $0x108] sm:$0xff] }
 0x8b9   : > { %v5408_v25 = vsel %vm1307_vm6, %v5399_v12, %v5391_v47  ;;  %v5404_v26 = vsel %vm1307_vm6, %v5391_v47, %v5399_v12  ;;  %v8518_v12 = vld [vmem:[%s11708_s2 + $0x238] sm:$0xff] }
 0x8ba   : > { %7606 = vmatmul.mubr.msk.f32.gmra.mrb[22].mxu1 %vm1741_vm9, %v5128_v53  ;;  %v5415_v31 = vmul.f32 %v8512_v29, %v5408_v25  ;;  %v5414_v43 = vmul.f32 %v8516_v42, %v5404_v26  ;;  %v5420_v25 = vld [vmem:[#allocation7 + $0xe8] sm:$0xff] }
 0x8bb   : > { %7864 = vmatpush1.bf16.msra.mxu1 %v7863_v58  ;;  %5219 = vmatprep.mubr.f32.mxu1 %v8756_v0  ;;  %v8519_v58 = vld [vmem:[%s11708_s2 + $0x200] sm:$0xff] }
 0x8bc   : > { %7866 = vmatprep.subr.bf16.mxu1 %v7865_v10  ;;  %v5401_v59 = vpop.permute.xlu1 %5400  ;;  %v5533_v45 = vpop.permute.xlu0 %5532 }
 0x8bd   : > { %v5409_v14 = vsel %vm1307_vm6, %v5401_v59, %v5393_v5  ;;  %v5405_v11 = vsel %vm1307_vm6, %v5393_v5, %v5401_v59  ;;  %v5419_v59 = vld [vmem:[#allocation7 + $0xe0] sm:$0xff] }
 0x8be   : > { %7607 = vmatmul.mubr.msk.f32.gmra.mrb[24].mxu1 %vm1741_vm9, %v5129_v6  ;;  %v5417_v21 = vmul.f32 %v8510_v13, %v5409_v14  ;;  %v5416_v34 = vmul.f32 %v8513_v33, %v5405_v11  ;;  %v5421_v13 = vld [vmem:[#allocation7 + $0xf0] sm:$0xff] }
 0x8bf   : > { %5225 = vmatprep.mubr.f32.mxu1 %v8756_v0 }
 0x8c0   : > { %v5535_v9 = vpop.permute.xlu1 %5534  ;;  %v5541_v15 = vpop.permute.xlu0 %5540  ;;  %v7869_v41 = vpack.c.bf16 %v5417_v21, %v5415_v31  ;;  %v7871_v51 = vpack.c.bf16 %v5416_v34, %v5414_v43  ;;  %v5422_v21 = vld [vmem:[#allocation7 + $0xf8] sm:$0xff] }
 0x8c1   : > { %v5552_v27 = vsel %vm1433_vm8, %v5541_v15, %v5533_v45  ;;  %v5548_v1 = vsel %vm1433_vm8, %v5533_v45, %v5541_v15 }
 0x8c2   : > { %7608 = vmatmul.mubr.msk.f32.gmra.mrb[26].mxu1 %vm1741_vm9, %v5130_v52  ;;  %v5557_v37 = vmul.f32 %v8514_v36, %v5552_v27  ;;  %v5556_v6 = vmul.f32 %v8519_v58, %v5548_v1  ;;  %v5567_v27 = vld [vmem:[#allocation7 + $0x110] sm:$0xff] }
 0x8c3   : > { %5353 = vmatprep.mubr.f32.mxu1 %v8756_v0 }
 0x8c4   : > { %v5543_v32 = vpop.permute.xlu1 %5542  ;;  %v5537_v46 = vpop.permute.xlu0 %5536 }
 0x8c5   : > { %v5553_v35 = vsel %vm1433_vm8, %v5543_v32, %v5535_v9  ;;  %v5549_v49 = vsel %vm1433_vm8, %v5535_v9, %v5543_v32 }
 0x8c6   : > { %v5559_v40 = vmul.f32 %v8515_v38, %v5553_v35  ;;  %7609 = vmatmul.mubr.msk.f32.vlgmr.msra.gmra.mrb[20].mxu1 %vm1741_vm9, %v5273_v28  ;;  %v5558_v4 = vmul.f32 %v8517_v3, %v5549_v49  ;;  %v5568_v28 = vld [vmem:[#allocation7 + $0x118] sm:$0xff] }
 0x8c7   : > { %7868 = vmatpush1.bf16.msra.mxu1 %v7867_v16  ;;  %5359 = vmatprep.mubr.f32.mxu1 %v8756_v0 }
 0x8c8   : > { %7870 = vmatprep.subr.bf16.mxu1 %v7869_v41  ;;  %v5539_v47 = vpop.permute.xlu1 %5538  ;;  %v7873_v48 = vpack.c.bf16 %v5559_v40, %v5557_v37  ;;  %v5545_v57 = vpop.permute.xlu0 %5544  ;;  %v7875_v52 = vpack.c.bf16 %v5558_v4, %v5556_v6 }
 0x8c9   : > { %v5554_v53 = vsel %vm1433_vm8, %v5545_v57, %v5537_v46  ;;  %v5550_v45 = vsel %vm1433_vm8, %v5537_v46, %v5545_v57 }
 0x8ca   : > { %7610 = vmatmul.mubr.msk.f32.gmra.mrb[22].mxu1 %vm1741_vm9, %v5274_v39  ;;  %v5561_v14 = vmul.f32 %v8520_v62, %v5554_v53  ;;  %v5560_v23 = vmul.f32 %v8522_v18, %v5550_v45 }
 0x8cb   : > { %7872 = vmatpush1.bf16.msra.mxu1 %v7871_v51  ;;  %5365 = vmatprep.mubr.f32.mxu1 %v8756_v0 }
 0x8cc   : > { %7874 = vmatprep.subr.bf16.mxu1 %v7873_v48  ;;  %v5547_v63 = vpop.permute.xlu1 %5546 }
 0x8cd   : > { %v5555_v61 = vsel %vm1433_vm8, %v5547_v63, %v5539_v47  ;;  %v5551_v5 = vsel %vm1433_vm8, %v5539_v47, %v5547_v63 }
 0x8ce   : > { %7611 = vmatmul.mubr.msk.f32.gmra.mrb[24].mxu1 %vm1741_vm9, %v5275_v56  ;;  %v5563_v10 = vmul.f32 %v8518_v12, %v5555_v61  ;;  %v5562_v9 = vmul.f32 %v8521_v17, %v5551_v5 }
 0x8cf   : > { %5371 = vmatprep.mubr.f32.mxu1 %v8756_v0 }
 0x8d0   : > { %v7877_v15 = vpack.c.bf16 %v5563_v10, %v5561_v14  ;;  %v7879_v11 = vpack.c.bf16 %v5562_v9, %v5560_v23 }
 0x8d2   : > { %7612 = vmatmul.mubr.msk.f32.gmra.mrb[26].mxu1 %vm1741_vm9, %v5276_v55 }
 0x8d3   : > { %5499 = vmatprep.mubr.f32.mxu1 %v8756_v0 }
 0x8d6   : > { %7613 = vmatmul.mubr.msk.f32.vlgmr.msra.gmra.mrb[20].mxu1 %vm1741_vm9, %v5419_v59 }
 0x8d7   : > { %7876 = vmatpush1.bf16.msra.mxu1 %v7875_v52  ;;  %5505 = vmatprep.mubr.f32.mxu1 %v8756_v0 }
 0x8d8   : > { %7878 = vmatprep.subr.bf16.mxu1 %v7877_v15 }
 0x8da   : > { %7614 = vmatmul.mubr.msk.f32.gmra.mrb[22].mxu1 %vm1741_vm9, %v5420_v25 }
 0x8db   : > { %7880 = vmatpush1.bf16.msra.mxu1 %v7879_v11  ;;  %5511 = vmatprep.mubr.f32.mxu1 %v8756_v0 }
 0x8de   : > { %7615 = vmatmul.mubr.msk.f32.gmra.mrb[24].mxu1 %vm1741_vm9, %v5421_v13 }
 0x8df   : > { %5517 = vmatprep.mubr.f32.mxu1 %v8756_v0 }
 0x8e2   : > { %7616 = vmatmul.mubr.msk.f32.gmra.mrb[26].mxu1 %vm1741_vm9, %v5422_v21 }
 0x8e3   : > { %5645 = vmatprep.mubr.f32.mxu1 %v8756_v0 }
 0x8e6   : > { %7617 = vmatmul.mubr.msk.f32.vlgmr.msra.gmra.mrb[20].mxu1 %vm1741_vm9, %v5565_v22 }
 0x8e7   : > { %5651 = vmatprep.mubr.f32.mxu1 %v8756_v0 }
 0x8ea   : > { %7618 = vmatmul.mubr.msk.f32.gmra.mrb[22].mxu1 %vm1741_vm9, %v5566_v24 }
 0x8eb   : > { %5657 = vmatprep.mubr.f32.mxu1 %v8756_v0 }
 0x8ee   : > { %7619 = vmatmul.mubr.msk.f32.gmra.mrb[24].mxu1 %vm1741_vm9, %v5567_v27 }
 0x8ef   : > { %5663 = vmatprep.mubr.f32.mxu1 %v8756_v0 }
 0x8f2   : > { %7620 = vmatmul.mubr.msk.f32.gmra.mrb[26].mxu1 %vm1741_vm9, %v5568_v28 }
 0x8f3   : > { %7171 = vmatprep.mubr.f32.mxu1 %v8756_v0 }
 0x9b9   : > { %v11034_v26 = vpop.f32.mrb[20].mxu1 }
 0x9ba   : > { %v5694_v29 = vmul.f32 %v11034_v26, %v11034_v26  ;;  %v11038_v31 = vpop.f32.mrb[21].mxu1 }
 0x9bb   : > { %v5678_v32 = vadd.f32 %v11038_v31, %v11034_v26  ;;  %v5695_v16 = vmul.f32 %v11038_v31, %v11038_v31 }
 0x9bd   : > { %5679 = vadd.xlane.f32.xlu0 %v5678_v32  ;;  %v11044_v33 = vpop.f32.mrb[22].mxu1  ;;  %v5702_v34 = vadd.f32 %v5695_v16, %v5694_v29 }
 0x9be   : > { %v5696_v35 = vmul.f32 %v11044_v33, %v11044_v33  ;;  %v11048_v36 = vpop.f32.mrb[23].mxu1 }
 0x9bf   : > { %v5681_v37 = vadd.f32 %v11048_v36, %v11044_v33  ;;  %v5697_v38 = vmul.f32 %v11048_v36, %v11048_v36 }
 0x9c1   : > { %5703 = vadd.xlane.f32.xlu0 %v5702_v34  ;;  %5682 = vadd.xlane.f32.xlu1 %v5681_v37  ;;  %v11054_v40 = vpop.f32.mrb[24].mxu1  ;;  %v5705_v41 = vadd.f32 %v5697_v38, %v5696_v35 }
 0x9c2   : > { %v5698_v42 = vmul.f32 %v11054_v40, %v11054_v40  ;;  %v11058_v43 = vpop.f32.mrb[25].mxu1 }
 0x9c3   : > { %v5684_v39 = vadd.f32 %v11058_v43, %v11054_v40  ;;  %v5699_v46 = vmul.f32 %v11058_v43, %v11058_v43 }
 0x9c5   : > { %5706 = vadd.xlane.f32.xlu0 %v5705_v41  ;;  %5685 = vadd.xlane.f32.xlu1 %v5684_v39  ;;  %v11064_v47 = vpop.f32.mrb[26].mxu1  ;;  %v5708_v48 = vadd.f32 %v5699_v46, %v5698_v42 }
 0x9c6   : > { %v5700_v51 = vmul.f32 %v11064_v47, %v11064_v47  ;;  %v11068_v56 = vpop.f32.mrb[27].mxu1 }
 0x9c7   : > { %v5687_v63 = vadd.f32 %v11068_v56, %v11064_v47  ;;  %v5701_v49 = vmul.f32 %v11068_v56, %v11068_v56 }
 0x9c9   : > { %5709 = vadd.xlane.f32.xlu1 %v5708_v48  ;;  %5688 = vadd.xlane.f32.xlu0 %v5687_v63  ;;  %v5711_v57 = vadd.f32 %v5701_v49, %v5700_v51 }
 0x9cd   : > { %5712 = vadd.xlane.f32.xlu0 %v5711_v57 }
 0xa4a   : > { %v5680_v61 = vpop.xlane.xlu0 %5679 }
 0xa4b   : > { %v5690_v55 = vmul.f32 0.00390625, %v5680_v61 }
 0xa4d   : > { %v5718_v4 = vmul.f32 %v5690_v55, %v5690_v55  ;;  %v5726_v27 = vsub.f32 %v11034_v26, %v5690_v55  ;;  %v5727_v32 = vsub.f32 %v11038_v31, %v5690_v55 }
 0xa4e   : > { %v5704_v1 = vpop.xlane.xlu0 %5703  ;;  %v5683_v3 = vpop.xlane.xlu1 %5682 }
 0xa4f   : > { %v5714_v53 = vmul.f32 0.00390625, %v5704_v1  ;;  %v5691_v5 = vmul.f32 0.00390625, %v5683_v3 }
 0xa51   : > { %v5722_v12 = vsub.f32 %v5714_v53, %v5718_v4  ;;  %v5719_v45 = vmul.f32 %v5691_v5, %v5691_v5  ;;  %v5728_v37 = vsub.f32 %v11044_v33, %v5691_v5  ;;  %v5729_v41 = vsub.f32 %v11048_v36, %v5691_v5 }
 0xa52   : > { %v5707_v10 = vpop.xlane.xlu0 %5706  ;;  %v5686_v58 = vpop.xlane.xlu1 %5685 }
 0xa53   : > { %v5734_v6 = vadd.f32 1e-05, %v5722_v12  ;;  %v5715_v59 = vmul.f32 0.00390625, %v5707_v10  ;;  %v5692_v62 = vmul.f32 0.00390625, %v5686_v58 }
 0xa55   : > { %8379 = vrsqrt.f32 %v5734_v6  ;;  %v5723_v14 = vsub.f32 %v5715_v59, %v5719_v45  ;;  %v5720_v15 = vmul.f32 %v5692_v62, %v5692_v62  ;;  %v5730_v31 = vsub.f32 %v11054_v40, %v5692_v62  ;;  %v8523_v6 = vld [vmem:[%s11708_s2 + $0x40] sm:$0xff] }
 0xa56   : > { %v5710_v52 = vpop.xlane.xlu1 %5709  ;;  %v5689_v17 = vpop.xlane.xlu0 %5688  ;;  %v5731_v51 = vsub.f32 %v11058_v43, %v5692_v62 }
 0xa57   : > { %v5735_v9 = vadd.f32 1e-05, %v5723_v14  ;;  %v5716_v18 = vmul.f32 0.00390625, %v5710_v52  ;;  %v5693_v23 = vmul.f32 0.00390625, %v5689_v17  ;;  %v8524_v14 = vld [vmem:[%s11708_s2 + $0x48] sm:$0xff]  ;;  %v8525_v17 = vld [vmem:[%s11708_s2 + $0x50] sm:$0xff] }
 0xa59   : > { %8381 = vrsqrt.f32 %v5735_v9  ;;  %v5724_v25 = vsub.f32 %v5716_v18, %v5720_v15  ;;  %v5721_v21 = vmul.f32 %v5693_v23, %v5693_v23  ;;  %v5732_v57 = vsub.f32 %v11064_v47, %v5693_v23  ;;  %v8526_v15 = vld [vmem:[%s11708_s2 + $0x58] sm:$0xff] }
 0xa5a   : > { %v5713_v11 = vpop.xlane.xlu0 %5712  ;;  %v5733_v40 = vsub.f32 %v11068_v56, %v5693_v23 }
 0xa5b   : > { %v5736_v13 = vadd.f32 1e-05, %v5724_v25  ;;  %v5717_v22 = vmul.f32 0.00390625, %v5713_v11 }
 0xa5d   : > { %8383 = vrsqrt.f32 %v5736_v13  ;;  %v5725_v24 = vsub.f32 %v5717_v22, %v5721_v21 }
 0xa5f   : > { %v8380_v28 = vpop.eup %8379  ;;  %v5737_v29 = vadd.f32 1e-05, %v5725_v24 }
 0xa60   : > { %v5742_v16 = vmul.f32 %v8380_v28, %v5726_v27  ;;  %v5743_v34 = vmul.f32 %v8380_v28, %v5727_v32  ;;  %v8527_v32 = vld [vmem:[%s11708_s2 + $0x60] sm:$0xff] }
 0xa61   : > { %8385 = vrsqrt.f32 %v5737_v29 }
 0xa62   : > { %v11076_v35 = vmax.f32 %v5742_v16, 0.0  ;;  %v11082_v39 = vmax.f32 %v5743_v34, 0.0  ;;  %v8528_v34 = vld [vmem:[%s11708_s2 + $0x68] sm:$0xff] }
 0xa63   : > { %v8382_v38 = vpop.eup %8381 }
 0xa64   : > { %v5744_v42 = vmul.f32 %v8382_v38, %v5728_v37  ;;  %5794 = vrot.lane.b32.xlu1 %v11076_v35, %s8758_s12  ;;  %v5745_v26 = vmul.f32 %v8382_v38, %v5729_v41  ;;  %v8529_v38 = vld [vmem:[%s11708_s2 + $0x70] sm:$0xff] }
 0xa66   : > { %v11084_v46 = vmax.f32 %v5744_v42, 0.0  ;;  %v11092_v33 = vmax.f32 %v5745_v26, 0.0  ;;  %v8530_v42 = vld [vmem:[%s11708_s2 + $0x78] sm:$0xff] }
 0xa67   : > { %v8384_v48 = vpop.eup %8383 }
 0xa68   : > { %v5746_v63 = vmul.f32 %v8384_v48, %v5730_v31  ;;  %5802 = vrot.lane.b32.xlu1 %v11082_v39, %s8758_s12  ;;  %5796 = vrot.lane.b32.xlu0 %v11084_v46, %s8758_s12  ;;  %v5747_v36 = vmul.f32 %v8384_v48, %v5731_v51 }
 0xa6a   : > { %v11094_v49 = vmax.f32 %v5746_v63, 0.0  ;;  %v11102_v43 = vmax.f32 %v5747_v36, 0.0 }
 0xa6b   : > { %v8386_v61 = vpop.eup %8385 }
 0xa6c   : > { %v5748_v55 = vmul.f32 %v8386_v61, %v5732_v57  ;;  %5804 = vrot.lane.b32.xlu1 %v11092_v33, %s8758_s12  ;;  %5798 = vrot.lane.b32.xlu0 %v11094_v49, %s8758_s12  ;;  %v5749_v1 = vmul.f32 %v8386_v61, %v5733_v40  ;;  %v5827_v61 = vld [vmem:[#allocation9 + $0x20] sm:$0xff] }
 0xa6e   : > { %v11104_v3 = vmax.f32 %v5748_v55, 0.0  ;;  %v11110_v47 = vmax.f32 %v5749_v1, 0.0 }
 0xa70   : > { %5806 = vrot.lane.b32.xlu0 %v11102_v43, %s8758_s12  ;;  %5800 = vrot.lane.b32.xlu1 %v11104_v3, %s8758_s12 }
 0xa74   : > { %5758 = vrot.lane.b32.xlu0 %v11076_v35, %s8759_s26  ;;  %5808 = vrot.lane.b32.xlu1 %v11110_v47, %s8758_s12 }
 0xa78   : > { %5766 = vrot.lane.b32.xlu0 %v11082_v39, %s8759_s26  ;;  %5760 = vrot.lane.b32.xlu1 %v11084_v46, %s8759_s26 }
 0xa7c   : > { %5762 = vrot.lane.b32.xlu0 %v11094_v49, %s8759_s26  ;;  %5768 = vrot.lane.b32.xlu1 %v11092_v33, %s8759_s26 }
 0xa80   : > { %5770 = vrot.lane.b32.xlu0 %v11102_v43, %s8759_s26  ;;  %5764 = vrot.lane.b32.xlu1 %v11104_v3, %s8759_s26 }
 0xa84   : > { %6033 = vrot.lane.b32.xlu0 %v11076_v35, %s8761_s22  ;;  %5772 = vrot.lane.b32.xlu1 %v11110_v47, %s8759_s26 }
 0xa88   : > { %6041 = vrot.lane.b32.xlu0 %v11082_v39, %s8761_s22  ;;  %6035 = vrot.lane.b32.xlu1 %v11084_v46, %s8761_s22 }
 0xa8c   : > { %6037 = vrot.lane.b32.xlu0 %v11094_v49, %s8761_s22  ;;  %6043 = vrot.lane.b32.xlu1 %v11092_v33, %s8761_s22 }
 0xa90   : > { %6045 = vrot.lane.b32.xlu0 %v11102_v43, %s8761_s22  ;;  %6039 = vrot.lane.b32.xlu1 %v11104_v3, %s8761_s22 }
 0xa94   : > { %6179 = vrot.lane.b32.xlu0 %v11076_v35, %s8763_s17  ;;  %6047 = vrot.lane.b32.xlu1 %v11110_v47, %s8761_s22  ;;  %s7663_s22 = sshll.u32 %s11733_s16, 3 }
 0xa95   : > { %s440_s11 = scalar_lea.vmem %s11715_s9, %s7663_s22 }
 0xa98   : > { %6187 = vrot.lane.b32.xlu0 %v11082_v39, %s8763_s17  ;;  %6181 = vrot.lane.b32.xlu1 %v11084_v46, %s8763_s17 }
 0xa9c   : > { %6183 = vrot.lane.b32.xlu0 %v11094_v49, %s8763_s17  ;;  %6189 = vrot.lane.b32.xlu1 %v11092_v33, %s8763_s17 }
 0xaa0   : > { %6191 = vrot.lane.b32.xlu0 %v11102_v43, %s8763_s17  ;;  %6185 = vrot.lane.b32.xlu1 %v11104_v3, %s8763_s17 }
 0xaa4   : > { %6439 = vrot.lane.b32.xlu0 %v11076_v35, %s8757_s25  ;;  %6193 = vrot.lane.b32.xlu1 %v11110_v47, %s8763_s17 }
 0xaa8   : > { %6447 = vrot.lane.b32.xlu0 %v11082_v39, %s8757_s25  ;;  %6441 = vrot.lane.b32.xlu1 %v11084_v46, %s8757_s25 }
 0xaac   : > { %6443 = vrot.lane.b32.xlu0 %v11094_v49, %s8757_s25  ;;  %6449 = vrot.lane.b32.xlu1 %v11092_v33, %s8757_s25 }
 0xab0   : > { %6451 = vrot.lane.b32.xlu0 %v11102_v43, %s8757_s25  ;;  %6445 = vrot.lane.b32.xlu1 %v11104_v3, %s8757_s25 }
 0xab4   : > { %6585 = vrot.lane.b32.xlu0 %v11076_v35, %s8760_s19  ;;  %6453 = vrot.lane.b32.xlu1 %v11110_v47, %s8757_s25 }
 0xab8   : > { %6593 = vrot.lane.b32.xlu0 %v11082_v39, %s8760_s19  ;;  %6587 = vrot.lane.b32.xlu1 %v11084_v46, %s8760_s19 }
 0xabc   : > { %6589 = vrot.lane.b32.xlu0 %v11094_v49, %s8760_s19  ;;  %6595 = vrot.lane.b32.xlu1 %v11092_v33, %s8760_s19 }
 0xac0   : > { %6597 = vrot.lane.b32.xlu0 %v11102_v43, %s8760_s19  ;;  %6591 = vrot.lane.b32.xlu1 %v11104_v3, %s8760_s19 }
 0xac4   : > { %6731 = vrot.lane.b32.xlu0 %v11076_v35, %s8762_s30  ;;  %6599 = vrot.lane.b32.xlu1 %v11110_v47, %s8760_s19 }
 0xac8   : > { %6739 = vrot.lane.b32.xlu0 %v11082_v39, %s8762_s30  ;;  %6733 = vrot.lane.b32.xlu1 %v11084_v46, %s8762_s30 }
 0xacc   : > { %6735 = vrot.lane.b32.xlu0 %v11094_v49, %s8762_s30  ;;  %6741 = vrot.lane.b32.xlu1 %v11092_v33, %s8762_s30 }
 0xad0   : > { %6743 = vrot.lane.b32.xlu0 %v11102_v43, %s8762_s30  ;;  %6737 = vrot.lane.b32.xlu1 %v11104_v3, %s8762_s30 }
 0xad4   : > { %6877 = vrot.lane.b32.xlu0 %v11076_v35, %s8764_s20  ;;  %6745 = vrot.lane.b32.xlu1 %v11110_v47, %s8762_s30 }
 0xad6   : > { %v5795_v56 = vpop.permute.xlu1 %5794 }
 0xad8   : > { %6885 = vrot.lane.b32.xlu0 %v11082_v39, %s8764_s20  ;;  %6879 = vrot.lane.b32.xlu1 %v11084_v46, %s8764_s20 }
 0xada   : > { %v5803_v4 = vpop.permute.xlu1 %5802  ;;  %v5797_v53 = vpop.permute.xlu0 %5796 }
 0xadb   : > { %v5814_v5 = vsel %vm469_vm2, %v5803_v4, %v5795_v56  ;;  %v5810_v12 = vsel %vm469_vm2, %v5795_v56, %v5803_v4  ;;  %v8531_v4 = vld [vmem:[%s11708_s2] sm:$0xff] }
 0xadc   : > { %6881 = vrot.lane.b32.xlu0 %v11094_v49, %s8764_s20  ;;  %6887 = vrot.lane.b32.xlu1 %v11092_v33, %s8764_s20  ;;  %v5818_v59 = vmul.f32 %v8523_v6, %v5814_v5  ;;  %v5819_v52 = vmul.f32 %v8524_v14, %v5810_v12  ;;  %v8532_v5 = vld [vmem:[%s11708_s2 + $0x8] sm:$0xff]  ;;  %v8534_v6 = vld [vmem:[%s11708_s2 + $0x18] sm:$0xff] }
 0xade   : > { %v5805_v10 = vpop.permute.xlu1 %5804  ;;  %v5799_v58 = vpop.permute.xlu0 %5798 }
 0xadf   : > { %v5811_v45 = vsel %vm469_vm2, %v5797_v53, %v5805_v10  ;;  %v5815_v62 = vsel %vm469_vm2, %v5805_v10, %v5797_v53  ;;  %v8533_v10 = vld [vmem:[%s11708_s2 + $0x10] sm:$0xff] }
 0xae0   : > { %v5820_v9 = vmul.f32 %v8525_v17, %v5815_v62  ;;  %v5821_v18 = vmul.f32 %v8526_v15, %v5811_v45  ;;  %6889 = vrot.lane.b32.xlu0 %v11102_v43, %s8764_s20  ;;  %6883 = vrot.lane.b32.xlu1 %v11104_v3, %s8764_s20  ;;  %v5828_v45 = vld [vmem:[#allocation9 + $0x28] sm:$0xff] }
 0xae2   : > { %v7883_v23 = vpack.c.bf16 %v5820_v9, %v5818_v59  ;;  %v5801_v25 = vpop.permute.xlu1 %5800  ;;  %v5807_v11 = vpop.permute.xlu0 %5806  ;;  %v7881_v13 = vpack.c.bf16 %v5821_v18, %v5819_v52  ;;  %v5829_v18 = vld [vmem:[#allocation9 + $0x30] sm:$0xff] }
 0xae3   : > { %v5812_v21 = vsel %vm469_vm2, %v5799_v58, %v5807_v11  ;;  %v5816_v22 = vsel %vm469_vm2, %v5807_v11, %v5799_v58 }
 0xae4   : > { %6891 = vrot.lane.b32.xlu1 %v11110_v47, %s8764_s20  ;;  %7882 = vmatprep.subr.bf16.mxu0 %v7881_v13  ;;  %v5822_v16 = vmul.f32 %v8527_v32, %v5816_v22  ;;  %v5823_v37 = vmul.f32 %v8528_v34, %v5812_v21  ;;  %v8535_v21 = vld [vmem:[%s11708_s2 + $0x20] sm:$0xff]  ;;  %v8538_v32 = vld [vmem:[%s11708_s2 + $0x38] sm:$0xff]  ;;  %v5830_v34 = vld [vmem:[#allocation9 + $0x38] sm:$0xff]  ;;  %s445_s20 = scalar_lea.vmem %s11716_s10, %s7663_s22 }
 0xae5   : > { %7884 = vmatpush1.bf16.msra.mxu0 %v7883_v23 }
 0xae6   : > { %v5809_v24 = vpop.permute.xlu1 %5808  ;;  %v5759_v27 = vpop.permute.xlu0 %5758 }
 0xae7   : > { %v5813_v28 = vsel %vm469_vm2, %v5801_v25, %v5809_v24  ;;  %v5817_v29 = vsel %vm469_vm2, %v5809_v24, %v5801_v25  ;;  %v8536_v24 = vld [vmem:[%s11708_s2 + $0x28] sm:$0xff] }
 0xae8   : > { %v5824_v41 = vmul.f32 %v8529_v38, %v5817_v29  ;;  %v5825_v26 = vmul.f32 %v8530_v42, %v5813_v28  ;;  %v8537_v28 = vld [vmem:[%s11708_s2 + $0x30] sm:$0xff] }
 0xaea   : > { %v7887_v31 = vpack.c.bf16 %v5824_v41, %v5822_v16  ;;  %v5761_v48 = vpop.permute.xlu1 %5760  ;;  %v5767_v51 = vpop.permute.xlu0 %5766  ;;  %v7885_v63 = vpack.c.bf16 %v5825_v26, %v5823_v37 }
 0xaeb   : > { %v5774_v36 = vsel %vm454_vm3, %v5759_v27, %v5767_v51  ;;  %v5778_v57 = vsel %vm454_vm3, %v5767_v51, %v5759_v27 }
 0xaec   : > { %7886 = vmatprep.subr.bf16.mxu0 %v7885_v63  ;;  %v5782_v53 = vmul.f32 %v8531_v4, %v5778_v57  ;;  %v5783_v12 = vmul.f32 %v8532_v5, %v5774_v36 }
 0xaed   : > { %7888 = vmatpush1.bf16.msra.mxu0 %v7887_v31 }
 0xaee   : > { %v5769_v40 = vpop.permute.xlu1 %5768  ;;  %v5763_v55 = vpop.permute.xlu0 %5762 }
 0xaef   : > { %v5775_v1 = vsel %vm454_vm3, %v5761_v48, %v5769_v40  ;;  %v5779_v56 = vsel %vm454_vm3, %v5769_v40, %v5761_v48  ;;  %v5790_v48 = vld [vmem:[#allocation9] sm:$0xff] }
 0xaf0   : > { %v5784_v58 = vmul.f32 %v8533_v10, %v5779_v56  ;;  %v5785_v59 = vmul.f32 %v8534_v6, %v5775_v1  ;;  %7621 = vmatmul.mubr.msk.f32.vlgmr.msra.gmra.mrb[16].mxu0 %vm1741_vm9, %v5827_v61  ;;  %v8539_v61 = vld [vmem:[%s11708_s2 + $0x80] sm:$0xff]  ;;  %v8541_v56 = vld [vmem:[%s11708_s2 + $0x90] sm:$0xff] }
 0xaf1   : > { %5913 = vmatprep.mubr.f32.mxu0 %v8756_v0 }
 0xaf2   : > { %v7891_v62 = vpack.c.bf16 %v5784_v58, %v5782_v53  ;;  %v5765_v14 = vpop.permute.xlu1 %5764  ;;  %v5771_v52 = vpop.permute.xlu0 %5770  ;;  %v7889_v17 = vpack.c.bf16 %v5785_v59, %v5783_v12  ;;  %v8542_v53 = vld [vmem:[%s11708_s2 + $0x98] sm:$0xff] }
 0xaf3   : > { %v5776_v9 = vsel %vm454_vm3, %v5763_v55, %v5771_v52  ;;  %v5780_v15 = vsel %vm454_vm3, %v5771_v52, %v5763_v55  ;;  %v8540_v55 = vld [vmem:[%s11708_s2 + $0x88] sm:$0xff]  ;;  %v5791_v12 = vld [vmem:[#allocation9 + $0x8] sm:$0xff] }
 0xaf4   : > { %7622 = vmatmul.mubr.msk.f32.gmra.mrb[18].mxu0 %vm1741_vm9, %v5828_v45  ;;  %7890 = vmatprep.subr.bf16.mxu0 %v7889_v17  ;;  %v5786_v22 = vmul.f32 %v8535_v21, %v5780_v15  ;;  %v5787_v27 = vmul.f32 %v8536_v24, %v5776_v9 }
 0xaf5   : > { %7892 = vmatpush1.bf16.msra.mxu0 %v7891_v62  ;;  %5919 = vmatprep.mubr.f32.mxu0 %v8756_v0 }
 0xaf6   : > { %v5773_v23 = vpop.permute.xlu1 %5772  ;;  %v6034_v25 = vpop.permute.xlu0 %6033 }
 0xaf7   : > { %v5777_v11 = vsel %vm454_vm3, %v5765_v14, %v5773_v23  ;;  %v5781_v13 = vsel %vm454_vm3, %v5773_v23, %v5765_v14  ;;  %v5792_v14 = vld [vmem:[#allocation9 + $0x10] sm:$0xff] }
 0xaf8   : > { %v5788_v29 = vmul.f32 %v8537_v28, %v5781_v13  ;;  %v5789_v16 = vmul.f32 %v8538_v32, %v5777_v11  ;;  %7623 = vmatmul.mubr.msk.f32.gmra.mrb[20].mxu0 %vm1741_vm9, %v5829_v18  ;;  %v8543_v18 = vld [vmem:[%s11708_s2 + $0xa0] sm:$0xff]  ;;  %v8545_v13 = vld [vmem:[%s11708_s2 + $0xb0] sm:$0xff] }
 0xaf9   : > { %5925 = vmatprep.mubr.f32.mxu0 %v8756_v0 }
 0xafa   : > { %v7895_v37 = vpack.c.bf16 %v5788_v29, %v5786_v22  ;;  %v6036_v38 = vpop.permute.xlu1 %6035  ;;  %v6042_v41 = vpop.permute.xlu0 %6041  ;;  %v7893_v42 = vpack.c.bf16 %v5789_v16, %v5787_v27  ;;  %v8546_v22 = vld [vmem:[%s11708_s2 + $0xb8] sm:$0xff]  ;;  %v5793_v27 = vld [vmem:[#allocation9 + $0x18] sm:$0xff] }
 0xafb   : > { %v6049_v26 = vsel %vm689_vm5, %v6034_v25, %v6042_v41  ;;  %v6053_v31 = vsel %vm689_vm5, %v6042_v41, %v6034_v25  ;;  %v8544_v25 = vld [vmem:[%s11708_s2 + $0xa8] sm:$0xff] }
 0xafc   : > { %7624 = vmatmul.mubr.msk.f32.gmra.mrb[22].mxu0 %vm1741_vm9, %v5830_v34  ;;  %7894 = vmatprep.subr.bf16.mxu0 %v7893_v42  ;;  %v6057_v40 = vmul.f32 %v8539_v61, %v6053_v31  ;;  %v6058_v1 = vmul.f32 %v8540_v55, %v6049_v26 }
 0xafd   : > { %7896 = vmatpush1.bf16.msra.mxu0 %v7895_v37  ;;  %6008 = vmatprep.mubr.f32.mxu0 %v8756_v0 }
 0xafe   : > { %v6044_v51 = vpop.permute.xlu1 %6043  ;;  %v6038_v63 = vpop.permute.xlu0 %6037 }
 0xaff   : > { %v6050_v36 = vsel %vm689_vm5, %v6036_v38, %v6044_v51  ;;  %v6054_v57 = vsel %vm689_vm5, %v6044_v51, %v6036_v38  ;;  %v6066_v38 = vld [vmem:[#allocation9 + $0x40] sm:$0xff] }
 0xb00   : > { %v6059_v4 = vmul.f32 %v8541_v56, %v6054_v57  ;;  %v6060_v5 = vmul.f32 %v8542_v53, %v6050_v36  ;;  %7625 = vmatmul.mubr.msk.f32.vlgmr.msra.gmra.mrb[16].mxu0 %vm1741_vm9, %v5790_v48  ;;  %v8547_v48 = vld [vmem:[%s11708_s2 + $0xc0] sm:$0xff]  ;;  %v8549_v57 = vld [vmem:[%s11708_s2 + $0xd0] sm:$0xff] }
 0xb01   : > { %6014 = vmatprep.mubr.f32.mxu0 %v8756_v0 }
 0xb02   : > { %v7899_v10 = vpack.c.bf16 %v6059_v4, %v6057_v40  ;;  %v6040_v58 = vpop.permute.xlu1 %6039  ;;  %v6046_v6 = vpop.permute.xlu0 %6045  ;;  %v7897_v59 = vpack.c.bf16 %v6060_v5, %v6058_v1  ;;  %v8550_v40 = vld [vmem:[%s11708_s2 + $0xd8] sm:$0xff] }
 0xb03   : > { %v6051_v45 = vsel %vm689_vm5, %v6038_v63, %v6046_v6  ;;  %v6055_v62 = vsel %vm689_vm5, %v6046_v6, %v6038_v63  ;;  %v8548_v63 = vld [vmem:[%s11708_s2 + $0xc8] sm:$0xff]  ;;  %v6067_v1 = vld [vmem:[#allocation9 + $0x48] sm:$0xff] }
 0xb04   : > { %7626 = vmatmul.mubr.msk.f32.gmra.mrb[18].mxu0 %vm1741_vm9, %v5791_v12  ;;  %7898 = vmatprep.subr.bf16.mxu0 %v7897_v59  ;;  %v6061_v23 = vmul.f32 %v8543_v18, %v6055_v62  ;;  %v6062_v11 = vmul.f32 %v8544_v25, %v6051_v45 }
 0xb05   : > { %7900 = vmatpush1.bf16.msra.mxu0 %v7899_v10  ;;  %6020 = vmatprep.mubr.f32.mxu0 %v8756_v0 }
 0xb06   : > { %v6048_v52 = vpop.permute.xlu1 %6047  ;;  %v6180_v17 = vpop.permute.xlu0 %6179 }
 0xb07   : > { %v6052_v9 = vsel %vm689_vm5, %v6040_v58, %v6048_v52  ;;  %v6056_v15 = vsel %vm689_vm5, %v6048_v52, %v6040_v58  ;;  %v6068_v58 = vld [vmem:[#allocation9 + $0x50] sm:$0xff] }
 0xb08   : > { %v6063_v21 = vmul.f32 %v8545_v13, %v6056_v15  ;;  %v6064_v24 = vmul.f32 %v8546_v22, %v6052_v9  ;;  %7627 = vmatmul.mubr.msk.f32.gmra.mrb[20].mxu0 %vm1741_vm9, %v5792_v14  ;;  %v8551_v14 = vld [vmem:[%s11708_s2 + $0xe0] sm:$0xff]  ;;  %v8553_v15 = vld [vmem:[%s11708_s2 + $0xf0] sm:$0xff] }
 0xb09   : > { %6026 = vmatprep.mubr.f32.mxu0 %v8756_v0 }
 0xb0a   : > { %v7903_v28 = vpack.c.bf16 %v6063_v21, %v6061_v23  ;;  %v6182_v29 = vpop.permute.xlu1 %6181  ;;  %v6188_v32 = vpop.permute.xlu0 %6187  ;;  %v7901_v16 = vpack.c.bf16 %v6064_v24, %v6062_v11  ;;  %v8554_v23 = vld [vmem:[%s11708_s2 + $0xf8] sm:$0xff]  ;;  %v6069_v11 = vld [vmem:[#allocation9 + $0x58] sm:$0xff] }
 0xb0b   : > { %v6195_v34 = vsel %vm815_vm7, %v6180_v17, %v6188_v32  ;;  %v6199_v37 = vsel %vm815_vm7, %v6188_v32, %v6180_v17  ;;  %v8552_v17 = vld [vmem:[%s11708_s2 + $0xe8] sm:$0xff] }
 0xb0c   : > { %7628 = vmatmul.mubr.msk.f32.gmra.mrb[22].mxu0 %vm1741_vm9, %v5793_v27  ;;  %7902 = vmatprep.subr.bf16.mxu0 %v7901_v16  ;;  %v6203_v51 = vmul.f32 %v8547_v48, %v6199_v37  ;;  %v6204_v36 = vmul.f32 %v8548_v63, %v6195_v34  ;;  %v7913_v27 = vpack.c.bf16 %v11092_v33, %v11082_v39  ;;  %v8555_v39 = vld [vmem:[%s11708_s2 + $0x158] sm:$0xff] }
 0xb0d   : > { %7904 = vmatpush1.bf16.msra.mxu0 %v7903_v28  ;;  %6146 = vmatprep.mubr.f32.mxu0 %v8756_v0  ;;  %v6212_v28 = vld [vmem:[#allocation9 + $0x60] sm:$0xff]  ;;  %v7915_v37 = vpack.c.bf16 %v11084_v46, %v11076_v35 }
 0xb0e   : > { %v6190_v41 = vpop.permute.xlu1 %6189  ;;  %v6184_v42 = vpop.permute.xlu0 %6183 }
 0xb0f   : > { %v6196_v26 = vsel %vm815_vm7, %v6182_v29, %v6190_v41  ;;  %v6200_v31 = vsel %vm815_vm7, %v6190_v41, %v6182_v29  ;;  %v6213_v41 = vld [vmem:[#allocation9 + $0x68] sm:$0xff] }
 0xb10   : > { %v6205_v61 = vmul.f32 %v8549_v57, %v6200_v31  ;;  %v6206_v55 = vmul.f32 %v8550_v40, %v6196_v26  ;;  %7629 = vmatmul.mubr.msk.f32.vlgmr.msra.gmra.mrb[16].mxu0 %vm1741_vm9, %v6066_v38  ;;  %v7917_v38 = vpack.c.bf16 %v11110_v47, %v11102_v43  ;;  %v7919_v31 = vpack.c.bf16 %v11104_v3, %v11094_v49  ;;  %v6214_v43 = vld [vmem:[#allocation9 + $0x70] sm:$0xff]  ;;  %v6215_v49 = vld [vmem:[#allocation9 + $0x78] sm:$0xff]  ;;  %v8557_v40 = vld [vmem:[%s11708_s2 + $0x150] sm:$0xff] }
 0xb11   : > { %6152 = vmatprep.mubr.f32.mxu0 %v8756_v0 }
 0xb12   : > { %v7907_v56 = vpack.c.bf16 %v6205_v61, %v6203_v51  ;;  %v6186_v4 = vpop.permute.xlu1 %6185  ;;  %v6192_v53 = vpop.permute.xlu0 %6191  ;;  %v7905_v5 = vpack.c.bf16 %v6206_v55, %v6204_v36 }
 0xb13   : > { %v6197_v12 = vsel %vm815_vm7, %v6184_v42, %v6192_v53  ;;  %v6201_v10 = vsel %vm815_vm7, %v6192_v53, %v6184_v42  ;;  %v8556_v42 = vld [vmem:[%s11708_s2 + $0x148] sm:$0xff] }
 0xb14   : > { %7630 = vmatmul.mubr.msk.f32.gmra.mrb[18].mxu0 %vm1741_vm9, %v6067_v1  ;;  %7906 = vmatprep.subr.bf16.mxu0 %v7905_v5  ;;  %v6207_v52 = vmul.f32 %v8551_v14, %v6201_v10  ;;  %v6208_v9 = vmul.f32 %v8552_v17, %v6197_v12  ;;  %v8559_v5 = vld [vmem:[%s11708_s2 + $0x140] sm:$0xff]  ;;  %v8561_v17 = vld [vmem:[%s11708_s2 + $0x170] sm:$0xff] }
 0xb15   : > { %7908 = vmatpush1.bf16.msra.mxu0 %v7907_v56  ;;  %6158 = vmatprep.mubr.f32.mxu0 %v8756_v0 }
 0xb16   : > { %v6194_v6 = vpop.permute.xlu1 %6193  ;;  %v6440_v59 = vpop.permute.xlu0 %6439 }
 0xb17   : > { %v6198_v45 = vsel %vm815_vm7, %v6186_v4, %v6194_v6  ;;  %v6202_v62 = vsel %vm815_vm7, %v6194_v6, %v6186_v4  ;;  %v8558_v4 = vld [vmem:[%s11708_s2 + $0x178] sm:$0xff] }
 0xb18   : > { %v6209_v18 = vmul.f32 %v8553_v15, %v6202_v62  ;;  %v6210_v25 = vmul.f32 %v8554_v23, %v6198_v45  ;;  %7631 = vmatmul.mubr.msk.f32.gmra.mrb[20].mxu0 %vm1741_vm9, %v6068_v58  ;;  %v6326_v58 = vld [vmem:[#allocation9 + $0x80] sm:$0xff] }
 0xb19   : > { %6164 = vmatprep.mubr.f32.mxu0 %v8756_v0 }
 0xb1a   : > { %v7911_v13 = vpack.c.bf16 %v6209_v18, %v6207_v52  ;;  %v6442_v21 = vpop.permute.xlu1 %6441  ;;  %v6448_v22 = vpop.permute.xlu0 %6447  ;;  %v7909_v24 = vpack.c.bf16 %v6210_v25, %v6208_v9  ;;  %v8562_v18 = vld [vmem:[%s11708_s2 + $0x188] sm:$0xff]  ;;  %v8563_v25 = vld [vmem:[%s11708_s2 + $0x198] sm:$0xff] }
 0xb1b   : > { %v6459_v16 = vsel %vm1055_vm1, %v6448_v22, %v6440_v59  ;;  %v6455_v3 = vsel %vm1055_vm1, %v6440_v59, %v6448_v22  ;;  %v8560_v59 = vld [vmem:[%s11708_s2 + $0x168] sm:$0xff] }
 0xb1c   : > { %7632 = vmatmul.mubr.msk.f32.gmra.mrb[22].mxu0 %vm1741_vm9, %v6069_v11  ;;  %7910 = vmatprep.subr.bf16.mxu0 %v7909_v24  ;;  %v6464_v26 = vmul.f32 %v8556_v42, %v6459_v16  ;;  %v6463_v12 = vmul.f32 %v8559_v5, %v6455_v3  ;;  %v6327_v24 = vld [vmem:[#allocation9 + $0x88] sm:$0xff]  ;;  %v6328_v16 = vld [vmem:[#allocation9 + $0x90] sm:$0xff]  ;;  %v8570_v5 = vld [vmem:[%s11708_s2 + $0x1c8] sm:$0xff] }
 0xb1d   : > { %7912 = vmatpush1.bf16.msra.mxu0 %v7911_v13  ;;  %6292 = vmatprep.mubr.f32.mxu0 %v8756_v0 }
 0xb1e   : > { %v6450_v29 = vpop.permute.xlu1 %6449  ;;  %7914 = vmatprep.subr.bf16.mxu0 %v7913_v27  ;;  %v6444_v32 = vpop.permute.xlu0 %6443 }
 0xb1f   : > { %v6460_v34 = vsel %vm1055_vm1, %v6450_v29, %v6442_v21  ;;  %v6456_v63 = vsel %vm1055_vm1, %v6442_v21, %v6450_v29  ;;  %v8564_v21 = vld [vmem:[%s11708_s2 + $0x160] sm:$0xff] }
 0xb20   : > { %v6466_v33 = vmul.f32 %v8555_v39, %v6460_v34  ;;  %7633 = vmatmul.mubr.msk.f32.vlgmr.msra.gmra.mrb[16].mxu0 %vm1741_vm9, %v6212_v28  ;;  %v6465_v55 = vmul.f32 %v8557_v40, %v6456_v63 }
 0xb21   : > { %7916 = vmatpush1.bf16.msra.mxu0 %v7915_v37  ;;  %6298 = vmatprep.mubr.f32.mxu0 %v8756_v0 }
 0xb22   : > { %v6446_v35 = vpop.permute.xlu1 %6445  ;;  %7918 = vmatprep.subr.bf16.mxu0 %v7917_v38  ;;  %v6452_v46 = vpop.permute.xlu0 %6451  ;;  %v7921_v48 = vpack.c.bf16 %v6466_v33, %v6464_v26  ;;  %v7923_v52 = vpack.c.bf16 %v6465_v55, %v6463_v12  ;;  %v6329_v38 = vld [vmem:[#allocation9 + $0x98] sm:$0xff] }
 0xb23   : > { %v6461_v1 = vsel %vm1055_vm1, %v6452_v46, %v6444_v32  ;;  %v6457_v6 = vsel %vm1055_vm1, %v6444_v32, %v6452_v46 }
 0xb24   : > { %7634 = vmatmul.mubr.msk.f32.gmra.mrb[18].mxu0 %vm1741_vm9, %v6213_v41  ;;  %v6468_v45 = vmul.f32 %v8560_v59, %v6461_v1  ;;  %v6467_v22 = vmul.f32 %v8564_v21, %v6457_v6  ;;  %v8572_v59 = vld [vmem:[%s11708_s2 + $0x1a0] sm:$0xff] }
 0xb25   : > { %7920 = vmatpush1.bf16.msra.mxu0 %v7919_v31  ;;  %6304 = vmatprep.mubr.f32.mxu0 %v8756_v0 }
 0xb26   : > { %v6454_v47 = vpop.permute.xlu1 %6453  ;;  %7922 = vmatprep.subr.bf16.mxu0 %v7921_v48  ;;  %v6586_v51 = vpop.permute.xlu0 %6585 }
 0xb27   : > { %v6462_v36 = vsel %vm1055_vm1, %v6454_v47, %v6446_v35  ;;  %v6458_v56 = vsel %vm1055_vm1, %v6446_v35, %v6454_v47  ;;  %v8565_v35 = vld [vmem:[%s11708_s2 + $0x190] sm:$0xff]  ;;  %vm7181_vm1 = vcmask 1043456  }
 0xb28   : > { %7635 = vmatmul.mubr.msk.f32.gmra.mrb[20].mxu0 %vm1741_vm9, %v6214_v43  ;;  %v6470_v53 = vmul.f32 %v8558_v4, %v6462_v36  ;;  %v6469_v9 = vmul.f32 %v8561_v17, %v6458_v56  ;;  %v8566_v43 = vld [vmem:[%s11708_s2 + $0x1b8] sm:$0xff]  ;;  %v8569_v56 = vld [vmem:[%s11708_s2 + $0x1b0] sm:$0xff] }
 0xb29   : > { %6310 = vmatprep.mubr.f32.mxu0 %v8756_v0 }
 0xb2a   : > { %v6588_v57 = vpop.permute.xlu1 %6587  ;;  %v6594_v61 = vpop.permute.xlu0 %6593  ;;  %v7925_v13 = vpack.c.bf16 %v6470_v53, %v6468_v45  ;;  %v7927_v32 = vpack.c.bf16 %v6469_v9, %v6467_v22 }
 0xb2b   : > { %v6605_v10 = vsel %vm1181_vm4, %v6594_v61, %v6586_v51  ;;  %v6601_v41 = vsel %vm1181_vm4, %v6586_v51, %v6594_v61  ;;  %v8567_v51 = vld [vmem:[%s11708_s2 + $0x180] sm:$0xff] }
 0xb2c   : > { %7636 = vmatmul.mubr.msk.f32.gmra.mrb[22].mxu0 %vm1741_vm9, %v6215_v49  ;;  %v6610_v23 = vmul.f32 %v8562_v18, %v6605_v10  ;;  %v6609_v63 = vmul.f32 %v8567_v51, %v6601_v41  ;;  %v6472_v49 = vld [vmem:[#allocation9 + $0xa0] sm:$0xff]  ;;  %v8571_v10 = vld [vmem:[%s11708_s2 + $0x1d8] sm:$0xff] }
 0xb2d   : > { %6406 = vmatprep.mubr.f32.mxu0 %v8756_v0 }
 0xb2e   : > { %v6596_v62 = vpop.permute.xlu1 %6595  ;;  %v6590_v14 = vpop.permute.xlu0 %6589 }
 0xb2f   : > { %v6606_v15 = vsel %vm1181_vm4, %v6596_v62, %v6588_v57  ;;  %v6602_v39 = vsel %vm1181_vm4, %v6588_v57, %v6596_v62  ;;  %v8568_v57 = vld [vmem:[%s11708_s2 + $0x1a8] sm:$0xff]  ;;  %v6473_v62 = vld [vmem:[#allocation9 + $0xa8] sm:$0xff] }
 0xb30   : > { %v6612_v11 = vmul.f32 %v8563_v25, %v6606_v15  ;;  %7637 = vmatmul.mubr.msk.f32.vlgmr.msra.gmra.mrb[16].mxu0 %vm1741_vm9, %v6326_v58  ;;  %v6611_v46 = vmul.f32 %v8565_v35, %v6602_v39  ;;  %v6474_v15 = vld [vmem:[#allocation9 + $0xb0] sm:$0xff] }
 0xb31   : > { %7924 = vmatpush1.bf16.msra.mxu0 %v7923_v52  ;;  %6412 = vmatprep.mubr.f32.mxu0 %v8756_v0 }
 0xb32   : > { %7926 = vmatprep.subr.bf16.mxu0 %v7925_v13  ;;  %v6592_v27 = vpop.permute.xlu1 %6591  ;;  %v6598_v28 = vpop.permute.xlu0 %6597  ;;  %v7929_v29 = vpack.c.bf16 %v6612_v11, %v6610_v23  ;;  %v7931_v1 = vpack.c.bf16 %v6611_v46, %v6609_v63  ;;  %v6475_v13 = vld [vmem:[#allocation9 + $0xb8] sm:$0xff]  ;;  %v8579_v63 = vld [vmem:[%s11708_s2 + $0x218] sm:$0xff] }
 0xb33   : > { %v6607_v31 = vsel %vm1181_vm4, %v6598_v28, %v6590_v14  ;;  %v6603_v3 = vsel %vm1181_vm4, %v6590_v14, %v6598_v28 }
 0xb34   : > { %7638 = vmatmul.mubr.msk.f32.gmra.mrb[18].mxu0 %vm1741_vm9, %v6327_v24  ;;  %v6614_v61 = vmul.f32 %v8568_v57, %v6607_v31  ;;  %v6613_v45 = vmul.f32 %v8572_v59, %v6603_v3  ;;  %v8577_v31 = vld [vmem:[%s11708_s2 + $0x1f0] sm:$0xff]  ;;  %v8580_v3 = vld [vmem:[%s11708_s2 + $0x1e0] sm:$0xff] }
 0xb35   : > { %7928 = vmatpush1.bf16.msra.mxu0 %v7927_v32  ;;  %6418 = vmatprep.mubr.f32.mxu0 %v8756_v0  ;;  %v8581_v59 = vld [vmem:[%s11708_s2 + $0x210] sm:$0xff] }
 0xb36   : > { %7930 = vmatprep.subr.bf16.mxu0 %v7929_v29  ;;  %v6600_v34 = vpop.permute.xlu1 %6599  ;;  %v6732_v37 = vpop.permute.xlu0 %6731 }
 0xb37   : > { %v6608_v33 = vsel %vm1181_vm4, %v6600_v34, %v6592_v27  ;;  %v6604_v48 = vsel %vm1181_vm4, %v6592_v27, %v6600_v34  ;;  %v8573_v27 = vld [vmem:[%s11708_s2 + $0x1d0] sm:$0xff] }
 0xb38   : > { %7639 = vmatmul.mubr.msk.f32.gmra.mrb[20].mxu0 %vm1741_vm9, %v6328_v16  ;;  %v6616_v47 = vmul.f32 %v8566_v43, %v6608_v33  ;;  %v6615_v4 = vmul.f32 %v8569_v56, %v6604_v48  ;;  %v8574_v16 = vld [vmem:[%s11708_s2 + $0x1f8] sm:$0xff] }
 0xb39   : > { %6424 = vmatprep.mubr.f32.mxu0 %v8756_v0 }
 0xb3a   : > { %v6734_v42 = vpop.permute.xlu1 %6733  ;;  %v6740_v26 = vpop.permute.xlu0 %6739  ;;  %v7933_v6 = vpack.c.bf16 %v6616_v47, %v6614_v61  ;;  %v7935_v9 = vpack.c.bf16 %v6615_v4, %v6613_v45  ;;  %v8578_v47 = vld [vmem:[%s11708_s2 + $0x208] sm:$0xff]  ;;  %v6619_v61 = vld [vmem:[#allocation9 + $0xc8] sm:$0xff]  ;;  %v6620_v4 = vld [vmem:[#allocation9 + $0xd0] sm:$0xff] }
 0xb3b   : > { %v6751_v36 = vsel %vm1307_vm6, %v6740_v26, %v6732_v37  ;;  %v6747_v21 = vsel %vm1307_vm6, %v6732_v37, %v6740_v26  ;;  %v8575_v37 = vld [vmem:[%s11708_s2 + $0x1c0] sm:$0xff] }
 0xb3c   : > { %7640 = vmatmul.mubr.msk.f32.gmra.mrb[22].mxu0 %vm1741_vm9, %v6329_v38  ;;  %v6756_v12 = vmul.f32 %v8570_v5, %v6751_v36  ;;  %v6755_v39 = vmul.f32 %v8575_v37, %v6747_v21  ;;  %v6618_v38 = vld [vmem:[#allocation9 + $0xc0] sm:$0xff]  ;;  %v6911_v37 = vld [vmem:[#allocation9 + $0x108] sm:$0xff] }
 0xb3d   : > { %6552 = vmatprep.mubr.f32.mxu0 %v8756_v0  ;;  %v8585_v21 = vld [vmem:[%s11708_s2 + $0x230] sm:$0xff] }
 0xb3e   : > { %v6742_v40 = vpop.permute.xlu1 %6741  ;;  %v6736_v55 = vpop.permute.xlu0 %6735 }
 0xb3f   : > { %v6752_v53 = vsel %vm1307_vm6, %v6742_v40, %v6734_v42  ;;  %v6748_v25 = vsel %vm1307_vm6, %v6734_v42, %v6742_v40  ;;  %v8576_v42 = vld [vmem:[%s11708_s2 + $0x1e8] sm:$0xff] }
 0xb40   : > { %v6758_v58 = vmul.f32 %v8571_v10, %v6752_v53  ;;  %7641 = vmatmul.mubr.msk.f32.vlgmr.msra.gmra.mrb[16].mxu0 %vm1741_vm9, %v6472_v49  ;;  %v6757_v28 = vmul.f32 %v8573_v27, %v6748_v25  ;;  %v8584_v25 = vld [vmem:[%s11708_s2 + $0x228] sm:$0xff]  ;;  %v8586_v27 = vld [vmem:[%s11708_s2 + $0x220] sm:$0xff] }
 0xb41   : > { %7932 = vmatpush1.bf16.msra.mxu0 %v7931_v1  ;;  %6558 = vmatprep.mubr.f32.mxu0 %v8756_v0 }
 0xb42   : > { %7934 = vmatprep.subr.bf16.mxu0 %v7933_v6  ;;  %v6738_v14 = vpop.permute.xlu1 %6737  ;;  %v6744_v52 = vpop.permute.xlu0 %6743  ;;  %v7937_v17 = vpack.c.bf16 %v6758_v58, %v6756_v12  ;;  %v7939_v46 = vpack.c.bf16 %v6757_v28, %v6755_v39  ;;  %v6621_v58 = vld [vmem:[#allocation9 + $0xd8] sm:$0xff]  ;;  %v6765_v28 = vld [vmem:[#allocation9 + $0xe8] sm:$0xff]  ;;  %v6912_v39 = vld [vmem:[#allocation9 + $0x110] sm:$0xff] }
 0xb43   : > { %v6753_v29 = vsel %vm1307_vm6, %v6744_v52, %v6736_v55  ;;  %v6749_v41 = vsel %vm1307_vm6, %v6736_v55, %v6744_v52  ;;  %v8582_v52 = vld [vmem:[%s11708_s2 + $0x238] sm:$0xff] }
 0xb44   : > { %7642 = vmatmul.mubr.msk.f32.gmra.mrb[18].mxu0 %vm1741_vm9, %v6473_v62  ;;  %v6760_v26 = vmul.f32 %v8576_v42, %v6753_v29  ;;  %v6759_v57 = vmul.f32 %v8580_v3, %v6749_v41 }
 0xb45   : > { %7936 = vmatpush1.bf16.msra.mxu0 %v7935_v9  ;;  %6564 = vmatprep.mubr.f32.mxu0 %v8756_v0  ;;  %v8583_v9 = vld [vmem:[%s11708_s2 + $0x200] sm:$0xff] }
 0xb46   : > { %7938 = vmatprep.subr.bf16.mxu0 %v7937_v17  ;;  %v6746_v18 = vpop.permute.xlu1 %6745  ;;  %v6878_v23 = vpop.permute.xlu0 %6877 }
 0xb47   : > { %v6754_v11 = vsel %vm1307_vm6, %v6746_v18, %v6738_v14  ;;  %v6750_v32 = vsel %vm1307_vm6, %v6738_v14, %v6746_v18  ;;  %v6764_v18 = vld [vmem:[#allocation9 + $0xe0] sm:$0xff] }
 0xb48   : > { %7643 = vmatmul.mubr.msk.f32.gmra.mrb[20].mxu0 %vm1741_vm9, %v6474_v15  ;;  %v6762_v34 = vmul.f32 %v8574_v16, %v6754_v11  ;;  %v6761_v48 = vmul.f32 %v8577_v31, %v6750_v32  ;;  %v6766_v32 = vld [vmem:[#allocation9 + $0xf0] sm:$0xff]  ;;  %v6767_v16 = vld [vmem:[#allocation9 + $0xf8] sm:$0xff] }
 0xb49   : > { %6570 = vmatprep.mubr.f32.mxu0 %v8756_v0 }
 0xb4a   : > { %v6880_v22 = vpop.permute.xlu1 %6879  ;;  %v6886_v24 = vpop.permute.xlu0 %6885  ;;  %v7941_v49 = vpack.c.bf16 %v6762_v34, %v6760_v26  ;;  %v7943_v56 = vpack.c.bf16 %v6761_v48, %v6759_v57  ;;  %v6910_v34 = vld [vmem:[#allocation9 + $0x100] sm:$0xff] }
 0xb4b   : > { %v6897_v33 = vsel %vm1433_vm8, %v6886_v24, %v6878_v23  ;;  %v6893_v6 = vsel %vm1433_vm8, %v6878_v23, %v6886_v24 }
 0xb4c   : > { %7644 = vmatmul.mubr.msk.f32.gmra.mrb[22].mxu0 %vm1741_vm9, %v6475_v13  ;;  %v6902_v51 = vmul.f32 %v8578_v47, %v6897_v33  ;;  %v6901_v15 = vmul.f32 %v8583_v9, %v6893_v6  ;;  %v6913_v33 = vld [vmem:[#allocation9 + $0x118] sm:$0xff] }
 0xb4d   : > { %6698 = vmatprep.mubr.f32.mxu0 %v8756_v0 }
 0xb4e   : > { %v6888_v35 = vpop.permute.xlu1 %6887  ;;  %v6882_v40 = vpop.permute.xlu0 %6881 }
 0xb4f   : > { %v6898_v43 = vsel %vm1433_vm8, %v6888_v35, %v6880_v22  ;;  %v6894_v5 = vsel %vm1433_vm8, %v6880_v22, %v6888_v35 }
 0xb50   : > { %v6904_v36 = vmul.f32 %v8579_v63, %v6898_v43  ;;  %7645 = vmatmul.mubr.msk.f32.vlgmr.msra.gmra.mrb[16].mxu0 %vm1741_vm9, %v6618_v38  ;;  %v6903_v45 = vmul.f32 %v8581_v59, %v6894_v5 }
 0xb51   : > { %7940 = vmatpush1.bf16.msra.mxu0 %v7939_v46  ;;  %6704 = vmatprep.mubr.f32.mxu0 %v8756_v0 }
 0xb52   : > { %7942 = vmatprep.subr.bf16.mxu0 %v7941_v49  ;;  %v6884_v55 = vpop.permute.xlu1 %6883  ;;  %v7945_v1 = vpack.c.bf16 %v6904_v36, %v6902_v51  ;;  %v6890_v12 = vpop.permute.xlu0 %6889  ;;  %v7947_v13 = vpack.c.bf16 %v6903_v45, %v6901_v15 }
 0xb53   : > { %v6899_v62 = vsel %vm1433_vm8, %v6890_v12, %v6882_v40  ;;  %v6895_v23 = vsel %vm1433_vm8, %v6882_v40, %v6890_v12 }
 0xb54   : > { %7646 = vmatmul.mubr.msk.f32.gmra.mrb[18].mxu0 %vm1741_vm9, %v6619_v61  ;;  %v6906_v11 = vmul.f32 %v8584_v25, %v6899_v62  ;;  %v6905_v8 = vmul.f32 %v8586_v27, %v6895_v23 }
 0xb55   : > { %7944 = vmatpush1.bf16.msra.mxu0 %v7943_v56  ;;  %6710 = vmatprep.mubr.f32.mxu0 %v8756_v0 }
 0xb56   : > { %7946 = vmatprep.subr.bf16.mxu0 %v7945_v1  ;;  %v6892_v53 = vpop.permute.xlu1 %6891 }
 0xb57   : > { %v6900_v10 = vsel %vm1433_vm8, %v6892_v53, %v6884_v55  ;;  %v6896_v14 = vsel %vm1433_vm8, %v6884_v55, %v6892_v53 }
 0xb58   : > { %7647 = vmatmul.mubr.msk.f32.gmra.mrb[20].mxu0 %vm1741_vm9, %v6620_v4  ;;  %v6908_v17 = vmul.f32 %v8582_v52, %v6900_v10  ;;  %v6907_v22 = vmul.f32 %v8585_v21, %v6896_v14 }
 0xb59   : > { %6716 = vmatprep.mubr.f32.mxu0 %v8756_v0 }
 0xb5a   : > { %v7949_v24 = vpack.c.bf16 %v6908_v17, %v6906_v11  ;;  %v7951_v29 = vpack.c.bf16 %v6907_v22, %v6905_v8 }
 0xb5c   : > { %7648 = vmatmul.mubr.msk.f32.gmra.mrb[22].mxu0 %vm1741_vm9, %v6621_v58 }
 0xb5d   : > { %6844 = vmatprep.mubr.f32.mxu0 %v8756_v0 }
 0xb60   : > { %7649 = vmatmul.mubr.msk.f32.vlgmr.msra.gmra.mrb[16].mxu0 %vm1741_vm9, %v6764_v18 }
 0xb61   : > { %7948 = vmatpush1.bf16.msra.mxu0 %v7947_v13  ;;  %6850 = vmatprep.mubr.f32.mxu0 %v8756_v0 }
 0xb62   : > { %7950 = vmatprep.subr.bf16.mxu0 %v7949_v24 }
 0xb64   : > { %7650 = vmatmul.mubr.msk.f32.gmra.mrb[18].mxu0 %vm1741_vm9, %v6765_v28 }
 0xb65   : > { %7952 = vmatpush1.bf16.msra.mxu0 %v7951_v29  ;;  %6856 = vmatprep.mubr.f32.mxu0 %v8756_v0 }
 0xb68   : > { %7651 = vmatmul.mubr.msk.f32.gmra.mrb[20].mxu0 %vm1741_vm9, %v6766_v32 }
 0xb69   : > { %6862 = vmatprep.mubr.f32.mxu0 %v8756_v0 }
 0xb6c   : > { %7652 = vmatmul.mubr.msk.f32.gmra.mrb[22].mxu0 %vm1741_vm9, %v6767_v16 }
 0xb6d   : > { %6990 = vmatprep.mubr.f32.mxu0 %v8756_v0 }
 0xb70   : > { %7653 = vmatmul.mubr.msk.f32.vlgmr.msra.gmra.mrb[16].mxu0 %vm1741_vm9, %v6910_v34 }
 0xb71   : > { %6996 = vmatprep.mubr.f32.mxu0 %v8756_v0 }
 0xb74   : > { %7654 = vmatmul.mubr.msk.f32.gmra.mrb[18].mxu0 %vm1741_vm9, %v6911_v37 }
 0xb75   : > { %7002 = vmatprep.mubr.f32.mxu0 %v8756_v0 }
 0xb78   : > { %7655 = vmatmul.mubr.msk.f32.gmra.mrb[20].mxu0 %vm1741_vm9, %v6912_v39 }
 0xb79   : > { %7008 = vmatprep.mubr.f32.mxu0 %v8756_v0 }
 0xb7c   : > { %7656 = vmatmul.mubr.msk.f32.gmra.mrb[22].mxu0 %vm1741_vm9, %v6913_v33 }
 0xc43   : > { %v11625_v38 = vpop.f32.mrb[16].mxu0 }
 0xc44   : > { %v7039_v41 = vmul.f32 %v11625_v38, %v11625_v38  ;;  %v11629_v42 = vpop.f32.mrb[17].mxu0 }
 0xc45   : > { %v7023_v26 = vadd.f32 %v11629_v42, %v11625_v38  ;;  %v7040_v35 = vmul.f32 %v11629_v42, %v11629_v42 }
 0xc47   : > { %7024 = vadd.xlane.f32.xlu0 %v7023_v26  ;;  %v11635_v46 = vpop.f32.mrb[18].mxu0  ;;  %v7047_v31 = vadd.f32 %v7040_v35, %v7039_v41 }
 0xc48   : > { %v7041_v48 = vmul.f32 %v11635_v46, %v11635_v46  ;;  %v11639_v43 = vpop.f32.mrb[19].mxu0 }
 0xc49   : > { %v7026_v47 = vadd.f32 %v11639_v43, %v11635_v46  ;;  %v7042_v51 = vmul.f32 %v11639_v43, %v11639_v43 }
 0xc4b   : > { %7048 = vadd.xlane.f32.xlu0 %v7047_v31  ;;  %7027 = vadd.xlane.f32.xlu1 %v7026_v47  ;;  %v11645_v63 = vpop.f32.mrb[20].mxu0  ;;  %v7050_v36 = vadd.f32 %v7042_v51, %v7041_v48 }
 0xc4c   : > { %v7043_v49 = vmul.f32 %v11645_v63, %v11645_v63  ;;  %v11649_v3 = vpop.f32.mrb[21].mxu0 }
 0xc4d   : > { %v7029_v57 = vadd.f32 %v11649_v3, %v11645_v63  ;;  %v7044_v61 = vmul.f32 %v11649_v3, %v11649_v3 }
 0xc4f   : > { %7051 = vadd.xlane.f32.xlu0 %v7050_v36  ;;  %7030 = vadd.xlane.f32.xlu1 %v7029_v57  ;;  %v11655_v40 = vpop.f32.mrb[22].mxu0  ;;  %v7053_v55 = vadd.f32 %v7044_v61, %v7043_v49 }
 0xc50   : > { %v7045_v1 = vmul.f32 %v11655_v40, %v11655_v40  ;;  %v11659_v56 = vpop.f32.mrb[23].mxu0 }
 0xc51   : > { %v7032_v4 = vadd.f32 %v11659_v56, %v11655_v40  ;;  %v7046_v53 = vmul.f32 %v11659_v56, %v11659_v56 }
 0xc53   : > { %v7056_v5 = vadd.f32 %v7046_v53, %v7045_v1  ;;  %7054 = vadd.xlane.f32.xlu1 %v7053_v55  ;;  %7033 = vadd.xlane.f32.xlu0 %v7032_v4 }
 0xc57   : > { %7057 = vadd.xlane.f32.xlu0 %v7056_v5 }
 0xcd4   : > { %v7025_v12 = vpop.xlane.xlu0 %7024 }
 0xcd5   : > { %v7035_v10 = vmul.f32 0.00390625, %v7025_v12 }
 0xcd7   : > { %v7063_v59 = vmul.f32 %v7035_v10, %v7035_v10  ;;  %v7071_v33 = vsub.f32 %v11625_v38, %v7035_v10  ;;  %v7072_v41 = vsub.f32 %v11629_v42, %v7035_v10 }
 0xcd8   : > { %v7049_v58 = vpop.xlane.xlu0 %7048  ;;  %v7028_v6 = vpop.xlane.xlu1 %7027 }
 0xcd9   : > { %v7059_v45 = vmul.f32 0.00390625, %v7049_v58  ;;  %v7036_v62 = vmul.f32 0.00390625, %v7028_v6 }
 0xcdb   : > { %v7067_v14 = vsub.f32 %v7059_v45, %v7063_v59  ;;  %v7064_v18 = vmul.f32 %v7036_v62, %v7036_v62  ;;  %v7073_v26 = vsub.f32 %v11635_v46, %v7036_v62  ;;  %v7074_v35 = vsub.f32 %v11639_v43, %v7036_v62 }
 0xcdc   : > { %v7052_v52 = vpop.xlane.xlu0 %7051  ;;  %v7031_v17 = vpop.xlane.xlu1 %7030 }
 0xcdd   : > { %v7079_v9 = vadd.f32 1e-05, %v7067_v14  ;;  %v7060_v15 = vmul.f32 0.00390625, %v7052_v52  ;;  %v7037_v23 = vmul.f32 0.00390625, %v7031_v17  ;;  %v7179_v17 = vshrl.u32 %v452_v7, 7 }
 0xcdf   : > { %8387 = vrsqrt.f32 %v7079_v9  ;;  %v7068_v25 = vsub.f32 %v7060_v15, %v7064_v18  ;;  %v7065_v22 = vmul.f32 %v7037_v23, %v7037_v23  ;;  %v7075_v42 = vsub.f32 %v11645_v63, %v7037_v23 }
 0xce0   : > { %v7055_v11 = vpop.xlane.xlu1 %7054  ;;  %v7034_v13 = vpop.xlane.xlu0 %7033  ;;  %v7076_v46 = vsub.f32 %v11649_v3, %v7037_v23 }
 0xce1   : > { %v7080_v21 = vadd.f32 1e-05, %v7068_v25  ;;  %v7061_v24 = vmul.f32 0.00390625, %v7055_v11  ;;  %v7038_v27 = vmul.f32 0.00390625, %v7034_v13  ;;  %v7180_v25 = vcvt.s32.f32 %v7179_v17 }
 0xce3   : > { %8389 = vrsqrt.f32 %v7080_v21  ;;  %v7069_v8 = vsub.f32 %v7061_v24, %v7065_v22  ;;  %v7066_v32 = vmul.f32 %v7038_v27, %v7038_v27  ;;  %v7077_v4 = vsub.f32 %v11655_v40, %v7038_v27 }
 0xce4   : > { %v7058_v28 = vpop.xlane.xlu0 %7057  ;;  %v7078_v53 = vsub.f32 %v11659_v56, %v7038_v27  ;;  %v7103_v56 = vld [vmem:[%s11714_s8] sm:$0xf] }
 0xce5   : > { %v7081_v29 = vadd.f32 1e-05, %v7069_v8  ;;  %v7062_v16 = vmul.f32 0.00390625, %v7058_v28 }
 0xce7   : > { %8391 = vrsqrt.f32 %v7081_v29  ;;  %v7070_v34 = vsub.f32 %v7062_v16, %v7066_v32 }
 0xce9   : > { %v8388_v37 = vpop.eup %8387  ;;  %v7082_v39 = vadd.f32 1e-05, %v7070_v34 }
 0xcea   : > { %v7088_v31 = vmul.f32 %v8388_v37, %v7072_v41  ;;  %v7087_v48 = vmul.f32 %v8388_v37, %v7071_v33 }
 0xceb   : > { %8393 = vrsqrt.f32 %v7082_v39 }
 0xcec   : > { %v7096_v49 = vadd.f32 %v7088_v31, %v10484_v54  ;;  %v7095_v61 = vadd.f32 %v7087_v48, %v10477_v60 }
 0xced   : > { %v8390_v47 = vpop.eup %8389 }
 0xcee   : > { %v7090_v51 = vmul.f32 %v8390_v47, %v7074_v35  ;;  %v7089_v36 = vmul.f32 %v8390_v47, %v7073_v26 }
 0xcf0   : > { %v7098_v57 = vadd.f32 %v7090_v51, %v10496_v2  ;;  %v7097_v38 = vadd.f32 %v7089_v36, %v10487_v44 }
 0xcf1   : > { %v8392_v55 = vpop.eup %8391 }
 0xcf2   : > { %v7953_v1 = vpack.c.bf16 %v7098_v57, %v7096_v49  ;;  %v7955_v43 = vpack.c.bf16 %v7097_v38, %v7095_v61  ;;  %v7092_v5 = vmul.f32 %v8392_v55, %v7076_v46  ;;  %v7091_v54 = vmul.f32 %v8392_v55, %v7075_v42 }
 0xcf4   : > { %7954 = vmatprep.subr.bf16.mxu1 %v7953_v1  ;;  %v7100_v12 = vadd.f32 %v7092_v5, %v10508_v19  ;;  %v7099_v3 = vadd.f32 %v7091_v54, %v10499_v50 }
 0xcf5   : > { %v8394_v2 = vpop.eup %8393  ;;  %7956 = vmatpush1.bf16.msra.mxu1 %v7955_v43 }
 0xcf6   : > { %v7094_v60 = vmul.f32 %v8394_v2, %v7078_v53  ;;  %v7093_v44 = vmul.f32 %v8394_v2, %v7077_v4 }
 0xcf8   : > { %v7102_v63 = vadd.f32 %v7094_v60, %v10518_v30  ;;  %v7101_v10 = vadd.f32 %v7093_v44, %v10511_v20 }
 0xcfa   : > { %v7957_v40 = vpack.c.bf16 %v7102_v63, %v7100_v12  ;;  %v7959_v58 = vpack.c.bf16 %v7101_v10, %v7099_v3 }
 0xcfc   : > { %7958 = vmatprep.subr.bf16.mxu1 %v7957_v40 }
 0xcfd   : > { %7960 = vmatpush1.bf16.msra.mxu1 %v7959_v58 }
 0xd00   : > { %7657 = vmatmul.mubr.msk.f32.vlgmr.msra.gmra.mrb[28].mxu1 %vm1741_vm9, %v7103_v56 }
 0xdd3   : > { %v7173_v6 = vpop.f32.mrb[28].mxu1 }
 0xdd4   : > { %v7182_v19 = vsel %vm7181_vm1, %v7173_v6, -inf  ;;  %v7175_v50 = vpop.f32.mrb[29].mxu1 }
 0xdd5   : > { %v7183_v20 = vrot.slane %v7182_v19, 4  ;;  %v7189_v30 = vsel %vm7181_vm1, %v7175_v50, -inf  ;;  %v7222_v59 = vcombine.low %v7173_v6, %v7175_v50 }
 0xdd6   : > { %v7190_v45 = vrot.slane %v7189_v30, 4 }
 0xdd7   : > { %v7184_v62 = vmax.f32 %v7182_v19, %v7183_v20  ;;  %7224 = vst [vmem:[%s440_s11] sm:$0xff] %v7222_v59 }
 0xdd8   : > { %v7191_v14 = vmax.f32 %v7189_v30, %v7190_v45 }
 0xdd9   : > { %v7185_v52 = vrot.slane %v7184_v62, 2 }
 0xdda   : > { %v7192_v9 = vrot.slane %v7191_v14, 2 }
 0xddb   : > { %v7186_v15 = vmax.f32 %v7184_v62, %v7185_v52 }
 0xddc   : > { %v7193_v18 = vmax.f32 %v7191_v14, %v7192_v9 }
 0xddd   : > { %v7187_v23 = vrot.slane %v7186_v15, 1 }
 0xdde   : > { %v7194_v11 = vrot.slane %v7193_v18, 1 }
 0xddf   : > { %v7188_v13 = vmax.f32 %v7186_v15, %v7187_v23 }
 0xde0   : > { %v7195_v21 = vmax.f32 %v7193_v18, %v7194_v11 }
 0xde1   : > { %vm7196_vm2 = vcmp.ge.f32.partialorder %v7173_v6, %v7188_v13 }
 0xde2   : > { %v7198_v22 = vsel %vm7196_vm2, %v7180_v25, 4.0  ;;  %vm7197_vm3 = vcmp.ge.f32.partialorder %v7175_v50, %v7195_v21 }
 0xde3   : > { %v7200_v24 = vsel %vm7181_vm1, %v7198_v22, inf  ;;  %v7199_v27 = vsel %vm7197_vm3, %v7180_v25, 4.0 }
 0xde4   : > { %v7201_v8 = vrot.slane %v7200_v24, 4  ;;  %v7207_v28 = vsel %vm7181_vm1, %v7199_v27, inf }
 0xde5   : > { %v7208_v29 = vrot.slane %v7207_v28, 4 }
 0xde6   : > { %v7202_v7 = vmin.f32 %v7200_v24, %v7201_v8 }
 0xde7   : > { %v7209_v32 = vmin.f32 %v7207_v28, %v7208_v29 }
 0xde8   : > { %v7203_v16 = vrot.slane %v7202_v7, 2 }
 0xde9   : > { %v7210_v34 = vrot.slane %v7209_v32, 2 }
 0xdea   : > { %v7204_v37 = vmin.f32 %v7202_v7, %v7203_v16 }
 0xdeb   : > { %v7211_v39 = vmin.f32 %v7209_v32, %v7210_v34 }
 0xdec   : > { %v7205_v33 = vrot.slane %v7204_v37, 1 }
 0xded   : > { %v7212_v41 = vrot.slane %v7211_v39, 1 }
 0xdee   : > { %v7206_v26 = vmin.f32 %v7204_v37, %v7205_v33 }
 0xdef   : > { %v7213_v35 = vmin.f32 %v7211_v39, %v7212_v41 }
 0xdf0   : > { %vm7214_vm4 = vcmp.eq.f32.partialorder %v7180_v25, %v7206_v26 }
 0xdf1   : > { %v7658_v31 = vsel %vm7214_vm4, 1.0, %v8756_v0  ;;  %vm7215_vm5 = vcmp.eq.f32.partialorder %v7180_v25, %v7213_v35 }
 0xdf2   : > { %v7659_v48 = vsel %vm7215_vm5, 1.0, %v8756_v0 }
 0xdf3   : > { %v7227_v47 = vcombine.low %v7658_v31, %v7659_v48 }
 0xdf5   : > { %7229 = vst [vmem:[%s445_s20] sm:$0xff] %v7227_v47 }
 0xdf6 PF: > { %s24_s13 = sadd.s32 1, %s8745_s13  }
 0xdf7   : > { %p21_p6 = scmp.ge.s32.totalorder %s24_s13, 4  }
 0xdf9   :  { %23 = sbr.rel (!%p21_p6) target bundleno = 3 (0x3), region = 173 }
 0xe00   :  { %7267 = vsyncpa [#allocation3], 1 }
 0xe01   :  { %7269 = vsyncpa [#allocation3 + $0x1], 1 }
 0xe02   :  { %7270 = vsyncpa [#allocation5], 1 }
 0xe03   :  { %7271 = vsyncpa [#allocation8], 1 }

</bundles_post_ra>
